<compile_context>
chip_gen: v7x
topology: tpu7x:2x2x1
jax: 0.10.0
libtpu: 0.0.40
codegen_flags: <defaults>
</compile_context>

<pallas_src>
import functools

import jax
import jax.numpy as jnp
from jax.experimental import pallas as pl
from jax.experimental.pallas import tpu as pltpu


# ---- fused CBAM kernel ------------------------------------------------------
def _cbam_kernel(x_ref, w1_ref, w2_ref, wsp_ref, o_ref, *, H, W, C, K, P):
    # x_ref  : (1, C, H*W)  VMEM   activations (flat spatial on lanes)
    # w1_ref : (CR, C)      VMEM   first  nn.Linear weight (PyTorch (out, in))
    # w2_ref : (C, CR)      VMEM   second nn.Linear weight
    # wsp_ref: (2*K*K,)     SMEM   7x7 conv weights, idx = c*K*K + kh*K + kw
    # o_ref  : (1, C, H*W)  VMEM
    HW = H * W
    x = x_ref[0]                                     # (C, HW), native dtype

    # --- channel attention: global avg/max pool, shared MLP, sigmoid --------
    # f32 accumulation for the pools; C on sublanes, stats on lanes.
    avg = jnp.sum(x, axis=1, keepdims=True, dtype=jnp.float32) * (1.0 / HW)   # (C,1)
    mx = jnp.max(x, axis=1, keepdims=True).astype(jnp.float32)                # (C,1)
    pools = jnp.concatenate([avg, mx], axis=1)                                # (C,2)

    w1 = w1_ref[...]                                  # (CR, C) f32
    w2 = w2_ref[...]                                  # (C, CR) f32
    h = jnp.maximum(jnp.dot(w1, pools, preferred_element_type=jnp.float32), 0.0)  # (CR,2)
    logits2 = jnp.dot(w2, h, preferred_element_type=jnp.float32)                  # (C,2)
    gate_c = jax.nn.sigmoid(logits2[:, 0:1] + logits2[:, 1:2])                    # (C,1)

    y = x * gate_c.astype(x.dtype)                    # (C, HW) lane-broadcast

    # --- spatial attention: channel mean/max maps, 7x7 conv, sigmoid --------
    cmean = jnp.sum(y, axis=0, keepdims=True, dtype=jnp.float32) * (1.0 / C)  # (1,HW)
    cmax = jnp.max(y, axis=0, keepdims=True).astype(jnp.float32)              # (1,HW)

    # (1, HW) -> zero-padded (H+2P, W+2P) plane via static row slices + concats
    # (no scratch / no jnp.pad; W stays on lanes so kw shifts are lane shifts
    #  and kh shifts are sublane shifts).
    def to_padded_plane(flat):
        zl = jnp.zeros((1, P), jnp.float32)
        body = jnp.concatenate(
            [jnp.concatenate([zl, flat[:, r * W:(r + 1) * W], zl], axis=1)
             for r in range(H)], axis=0)                          # (H, W+2P)
        zr = jnp.zeros((P, W + 2 * P), jnp.float32)
        return jnp.concatenate([zr, body, zr], axis=0)            # (H+2P, W+2P)

    pm = to_padded_plane(cmean)
    px = to_padded_plane(cmax)

    # 7x7 conv (2 -> 1): 49 shifted windows, per-kh partial sums + tree sum to
    # keep the dependency chain / live ranges short.
    KK = K * K
    row_terms = []
    for kh in range(K):
        t = None
        for kw in range(K):
            term = (wsp_ref[kh * K + kw] * pm[kh:kh + H, kw:kw + W]
                    + wsp_ref[KK + kh * K + kw] * px[kh:kh + H, kw:kw + W])
            t = term if t is None else t + term
        row_terms.append(t)
    while len(row_terms) > 1:
        nxt = [row_terms[i] + row_terms[i + 1]
               for i in range(0, len(row_terms) - 1, 2)]
        if len(row_terms) % 2:
            nxt.append(row_terms[-1])
        row_terms = nxt
    conv = row_terms[0]                               # (H, W) f32

    gate_s = jax.nn.sigmoid(conv)                     # (H, W) f32
    # flatten back to (1, H*W): final gate is a sublane broadcast over (C, HW)
    gate_flat = jnp.concatenate([gate_s[r:r + 1, :] for r in range(H)], axis=1)

    o_ref[0] = (y * gate_flat.astype(y.dtype)).astype(o_ref.dtype)


# ---- wrapper ---------------------------------------------------------------
def cbam_forward(x_nchw, w1_t, w2_t, conv_w, *, kernel_size=7):
    """CBAM forward.

    x_nchw: (N, C, H, W)     activations (PyTorch layout, kept as-is)
    w1_t:   (C//ratio, C)    first  nn.Linear weight (PyTorch (out, in))
    w2_t:   (C, C//ratio)    second nn.Linear weight
    conv_w: (1, 2, K, K)     spatial-attention conv weight (PyTorch OIHW)
    """
    N, C, H, W = x_nchw.shape
    CR = w1_t.shape[0]
    K = kernel_size
    P = K // 2

    # Free, layout-preserving reshape (no transpose, no extra HBM traffic):
    # flat spatial dim on lanes.
    x_flat = x_nchw.reshape(N, C, H * W)
    w1 = w1_t.astype(jnp.float32)                      # (CR, C)
    w2 = w2_t.astype(jnp.float32)                      # (C, CR)
    wsp = conv_w.reshape(2 * K * K).astype(jnp.float32)

    kernel = functools.partial(_cbam_kernel, H=H, W=W, C=C, K=K, P=P)

    img_bytes = C * H * W * x_flat.dtype.itemsize
    # 2x double-buffered in + out blocks + a few full-size temporaries, clamped.
    vmem_limit = int(min(100 * 2 ** 20, max(32 * 2 ** 20, 12 * img_bytes + (1 << 20))))

    out_flat = pl.pallas_call(
        kernel,
        out_shape=jax.ShapeDtypeStruct((N, C, H * W), x_flat.dtype),
        grid_spec=pltpu.PrefetchScalarGridSpec(
            num_scalar_prefetch=0,
            grid=(N,),
            in_specs=[
                pl.BlockSpec((1, C, H * W), lambda n: (n, 0, 0)),
                pl.BlockSpec((CR, C), lambda n: (0, 0)),
                pl.BlockSpec((C, CR), lambda n: (0, 0)),
                pl.BlockSpec(memory_space=pltpu.MemorySpace.SMEM),   # conv weights
            ],
            out_specs=pl.BlockSpec((1, C, H * W), lambda n: (n, 0, 0)),
        ),
        compiler_params=pltpu.CompilerParams(
            dimension_semantics=("parallel",),   # note: balances 2 TCs only for even per-chip N
            vmem_limit_bytes=vmem_limit),
    )(x_flat, w1, w2, wsp)

    return out_flat.reshape(N, C, H, W)


# ---- pure-JAX reference (for correctness gating) ---------------------------
def cbam_reference(x, w1_t, w2_t, conv_w):
    avg = jnp.mean(x, axis=(2, 3))                            # (N, C)
    mx = jnp.max(x, axis=(2, 3))                              # (N, C)

    def mlp(v):
        return jnp.maximum(v @ w1_t.T, 0.0) @ w2_t.T

    gate_c = jax.nn.sigmoid(mlp(avg) + mlp(mx))[:, :, None, None]
    y = x * gate_c
    cmean = jnp.mean(y, axis=1, keepdims=True)
    cmax = jnp.max(y, axis=1, keepdims=True)
    feats = jnp.concatenate([cmean, cmax], axis=1)            # (N, 2, H, W)
    s = jax.lax.conv_general_dilated(
        feats, conv_w, window_strides=(1, 1), padding=((3, 3), (3, 3)),
        dimension_numbers=("NCHW", "OIHW", "NCHW"))
    return y * jax.nn.sigmoid(s)


if __name__ == "__main__":
    N, C, H, W = 2, 32, 16, 16        # CBAM default ch=32, ratio=8
    ratio = 8
    CR = C // ratio
    K = 7

    key = jax.random.PRNGKey(0)
    kx, k1, k2, k3 = jax.random.split(key, 4)
    x = jax.random.normal(kx, (N, C, H, W), dtype=jnp.float32)
    w1_t = jax.random.normal(k1, (CR, C), dtype=jnp.float32) * (1.0 / jnp.sqrt(C))
    w2_t = jax.random.normal(k2, (C, CR), dtype=jnp.float32) * (1.0 / jnp.sqrt(CR))
    conv_w = jax.random.normal(k3, (1, 2, K, K), dtype=jnp.float32) * 0.1

    out = jax.jit(cbam_forward)(x, w1_t, w2_t, conv_w)
    out = jax.block_until_ready(out)

    ref = cbam_reference(x, w1_t, w2_t, conv_w)
    assert out.shape == (N, C, H, W)
    max_err = float(jnp.max(jnp.abs(out - ref)))
    if max_err > 2e-3:
        raise AssertionError(f"mismatch vs reference: max abs err = {max_err}")
    print("KERNEL_OK")
</pallas_src>

<mosaic_0001>
module attributes {stable_mosaic.version = 11 : i64} {
  func.func @_cbam_kernel(%arg0: i32, %arg1: memref<1x32x256xf32, #tpu.memory_space<vmem>>, %arg2: memref<4x32xf32, #tpu.memory_space<vmem>>, %arg3: memref<32x4xf32, #tpu.memory_space<vmem>>, %arg4: memref<98xf32, #tpu.memory_space<smem>>, %arg5: memref<1x32x256xf32, #tpu.memory_space<vmem>>) attributes {dimension_semantics = [#tpu.dimension_semantics<parallel>], iteration_bounds = array<i64: 2>, scalar_prefetch = 0 : i64, scratch_operands = 0 : i64, tpu.core_type = #tpu.core_type<tc>, window_params = [{transform_indices = @transform_0, window_bounds = array<i64: 1, 32, 256>}, {pipeline_mode = #tpu.pipeline_mode<synchronous>, transform_indices = @transform_1, window_bounds = array<i64: 4, 32>}, {pipeline_mode = #tpu.pipeline_mode<synchronous>, transform_indices = @transform_2, window_bounds = array<i64: 32, 4>}, {transform_indices = @transform_3, window_bounds = array<i64: 98>}, {transform_indices = @transform_4, window_bounds = array<i64: 1, 32, 256>}]} {
    %c0 = arith.constant 0 : index
    %c0_0 = arith.constant 0 : index
    %c0_1 = arith.constant 0 : index
    %0 = vector.load %arg1[%c0, %c0_0, %c0_1] : memref<1x32x256xf32, #tpu.memory_space<vmem>>, vector<1x32x256xf32>
    %1 = vector.shape_cast %0 : vector<1x32x256xf32> to vector<32x256xf32>
    %cst = arith.constant dense<0.000000e+00> : vector<32xf32>
    %2 = vector.multi_reduction <add>, %1, %cst [1] : vector<32x256xf32> to vector<32xf32>
    %3 = vector.shape_cast %2 : vector<32xf32> to vector<32x1xf32>
    %cst_2 = arith.constant 3.906250e-03 : f32
    %4 = vector.broadcast %cst_2 : f32 to vector<32x1xf32>
    %5 = arith.mulf %3, %4 : vector<32x1xf32>
    %cst_3 = arith.constant dense<0xFF800000> : vector<32xf32>
    %6 = vector.multi_reduction <maximumf>, %1, %cst_3 [1] : vector<32x256xf32> to vector<32xf32>
    %7 = vector.shape_cast %6 : vector<32xf32> to vector<32x1xf32>
    %8 = tpu.concatenate %5, %7 in 1 : vector<32x1xf32>, vector<32x1xf32> -> vector<32x2xf32>
    %c0_4 = arith.constant 0 : index
    %c0_5 = arith.constant 0 : index
    %9 = vector.load %arg2[%c0_4, %c0_5] : memref<4x32xf32, #tpu.memory_space<vmem>>, vector<4x32xf32>
    %c0_6 = arith.constant 0 : index
    %c0_7 = arith.constant 0 : index
    %10 = vector.load %arg3[%c0_6, %c0_7] : memref<32x4xf32, #tpu.memory_space<vmem>>, vector<32x4xf32>
    %cst_8 = arith.constant dense<0.000000e+00> : vector<4x2xf32>
    %11 = tpu.matmul %9, %8, %cst_8 {dimension_numbers = #tpu.dot_dimension_numbers<[1], [0], [0], [1], [0, 0, 1, 1], [], []>} : vector<4x32xf32>, vector<32x2xf32>, vector<4x2xf32> -> vector<4x2xf32>
    %cst_9 = arith.constant 0.000000e+00 : f32
    %12 = vector.broadcast %cst_9 : f32 to vector<4x2xf32>
    %13 = arith.maximumf %11, %12 : vector<4x2xf32>
    %cst_10 = arith.constant dense<0.000000e+00> : vector<32x2xf32>
    %14 = tpu.matmul %10, %13, %cst_10 {dimension_numbers = #tpu.dot_dimension_numbers<[1], [0], [0], [1], [0, 0, 1, 1], [], []>} : vector<32x4xf32>, vector<4x2xf32>, vector<32x2xf32> -> vector<32x2xf32>
    %15 = vector.extract_strided_slice %14 {offsets = [0, 0], sizes = [32, 1], strides = [1, 1]} : vector<32x2xf32> to vector<32x1xf32>
    %16 = vector.extract_strided_slice %14 {offsets = [0, 1], sizes = [32, 1], strides = [1, 1]} : vector<32x2xf32> to vector<32x1xf32>
    %17 = arith.addf %15, %16 : vector<32x1xf32>
    %18 = arith.negf %17 : vector<32x1xf32>
    %19 = math.exp %18 : vector<32x1xf32>
    %cst_11 = arith.constant 1.000000e+00 : f32
    %20 = vector.broadcast %cst_11 : f32 to vector<32x1xf32>
    %21 = arith.addf %20, %19 : vector<32x1xf32>
    %22 = arith.divf %20, %21 : vector<32x1xf32>
    %23 = vector.broadcast %22 : vector<32x1xf32> to vector<32x256xf32>
    %24 = arith.mulf %1, %23 : vector<32x256xf32>
    %cst_12 = arith.constant dense<0.000000e+00> : vector<256xf32>
    %25 = vector.multi_reduction <add>, %24, %cst_12 [0] : vector<32x256xf32> to vector<256xf32>
    %26 = vector.shape_cast %25 : vector<256xf32> to vector<1x256xf32>
    %cst_13 = arith.constant 3.125000e-02 : f32
    %27 = vector.broadcast %cst_13 : f32 to vector<1x256xf32>
    %28 = arith.mulf %26, %27 : vector<1x256xf32>
    %cst_14 = arith.constant dense<0xFF800000> : vector<256xf32>
    %29 = vector.multi_reduction <maximumf>, %24, %cst_14 [0] : vector<32x256xf32> to vector<256xf32>
    %30 = vector.shape_cast %29 : vector<256xf32> to vector<1x256xf32>
    %cst_15 = arith.constant 0.000000e+00 : f32
    %31 = vector.broadcast %cst_15 : f32 to vector<1x3xf32>
    %32 = vector.extract_strided_slice %28 {offsets = [0, 0], sizes = [1, 16], strides = [1, 1]} : vector<1x256xf32> to vector<1x16xf32>
    %33 = tpu.concatenate %31, %32, %31 in 1 : vector<1x3xf32>, vector<1x16xf32>, vector<1x3xf32> -> vector<1x22xf32>
    %34 = vector.extract_strided_slice %28 {offsets = [0, 16], sizes = [1, 16], strides = [1, 1]} : vector<1x256xf32> to vector<1x16xf32>
    %35 = tpu.concatenate %31, %34, %31 in 1 : vector<1x3xf32>, vector<1x16xf32>, vector<1x3xf32> -> vector<1x22xf32>
    %36 = vector.extract_strided_slice %28 {offsets = [0, 32], sizes = [1, 16], strides = [1, 1]} : vector<1x256xf32> to vector<1x16xf32>
    %37 = tpu.concatenate %31, %36, %31 in 1 : vector<1x3xf32>, vector<1x16xf32>, vector<1x3xf32> -> vector<1x22xf32>
    %38 = vector.extract_strided_slice %28 {offsets = [0, 48], sizes = [1, 16], strides = [1, 1]} : vector<1x256xf32> to vector<1x16xf32>
    %39 = tpu.concatenate %31, %38, %31 in 1 : vector<1x3xf32>, vector<1x16xf32>, vector<1x3xf32> -> vector<1x22xf32>
    %40 = vector.extract_strided_slice %28 {offsets = [0, 64], sizes = [1, 16], strides = [1, 1]} : vector<1x256xf32> to vector<1x16xf32>
    %41 = tpu.concatenate %31, %40, %31 in 1 : vector<1x3xf32>, vector<1x16xf32>, vector<1x3xf32> -> vector<1x22xf32>
    %42 = vector.extract_strided_slice %28 {offsets = [0, 80], sizes = [1, 16], strides = [1, 1]} : vector<1x256xf32> to vector<1x16xf32>
    %43 = tpu.concatenate %31, %42, %31 in 1 : vector<1x3xf32>, vector<1x16xf32>, vector<1x3xf32> -> vector<1x22xf32>
    %44 = vector.extract_strided_slice %28 {offsets = [0, 96], sizes = [1, 16], strides = [1, 1]} : vector<1x256xf32> to vector<1x16xf32>
    %45 = tpu.concatenate %31, %44, %31 in 1 : vector<1x3xf32>, vector<1x16xf32>, vector<1x3xf32> -> vector<1x22xf32>
    %46 = vector.extract_strided_slice %28 {offsets = [0, 112], sizes = [1, 16], strides = [1, 1]} : vector<1x256xf32> to vector<1x16xf32>
    %47 = tpu.concatenate %31, %46, %31 in 1 : vector<1x3xf32>, vector<1x16xf32>, vector<1x3xf32> -> vector<1x22xf32>
    %48 = vector.extract_strided_slice %28 {offsets = [0, 128], sizes = [1, 16], strides = [1, 1]} : vector<1x256xf32> to vector<1x16xf32>
    %49 = tpu.concatenate %31, %48, %31 in 1 : vector<1x3xf32>, vector<1x16xf32>, vector<1x3xf32> -> vector<1x22xf32>
    %50 = vector.extract_strided_slice %28 {offsets = [0, 144], sizes = [1, 16], strides = [1, 1]} : vector<1x256xf32> to vector<1x16xf32>
    %51 = tpu.concatenate %31, %50, %31 in 1 : vector<1x3xf32>, vector<1x16xf32>, vector<1x3xf32> -> vector<1x22xf32>
    %52 = vector.extract_strided_slice %28 {offsets = [0, 160], sizes = [1, 16], strides = [1, 1]} : vector<1x256xf32> to vector<1x16xf32>
    %53 = tpu.concatenate %31, %52, %31 in 1 : vector<1x3xf32>, vector<1x16xf32>, vector<1x3xf32> -> vector<1x22xf32>
    %54 = vector.extract_strided_slice %28 {offsets = [0, 176], sizes = [1, 16], strides = [1, 1]} : vector<1x256xf32> to vector<1x16xf32>
    %55 = tpu.concatenate %31, %54, %31 in 1 : vector<1x3xf32>, vector<1x16xf32>, vector<1x3xf32> -> vector<1x22xf32>
    %56 = vector.extract_strided_slice %28 {offsets = [0, 192], sizes = [1, 16], strides = [1, 1]} : vector<1x256xf32> to vector<1x16xf32>
    %57 = tpu.concatenate %31, %56, %31 in 1 : vector<1x3xf32>, vector<1x16xf32>, vector<1x3xf32> -> vector<1x22xf32>
    %58 = vector.extract_strided_slice %28 {offsets = [0, 208], sizes = [1, 16], strides = [1, 1]} : vector<1x256xf32> to vector<1x16xf32>
    %59 = tpu.concatenate %31, %58, %31 in 1 : vector<1x3xf32>, vector<1x16xf32>, vector<1x3xf32> -> vector<1x22xf32>
    %60 = vector.extract_strided_slice %28 {offsets = [0, 224], sizes = [1, 16], strides = [1, 1]} : vector<1x256xf32> to vector<1x16xf32>
    %61 = tpu.concatenate %31, %60, %31 in 1 : vector<1x3xf32>, vector<1x16xf32>, vector<1x3xf32> -> vector<1x22xf32>
    %62 = vector.extract_strided_slice %28 {offsets = [0, 240], sizes = [1, 16], strides = [1, 1]} : vector<1x256xf32> to vector<1x16xf32>
    %63 = tpu.concatenate %31, %62, %31 in 1 : vector<1x3xf32>, vector<1x16xf32>, vector<1x3xf32> -> vector<1x22xf32>
    %64 = tpu.concatenate %33, %35, %37, %39, %41, %43, %45, %47, %49, %51, %53, %55, %57, %59, %61, %63 in 0 : vector<1x22xf32>, vector<1x22xf32>, vector<1x22xf32>, vector<1x22xf32>, vector<1x22xf32>, vector<1x22xf32>, vector<1x22xf32>, vector<1x22xf32>, vector<1x22xf32>, vector<1x22xf32>, vector<1x22xf32>, vector<1x22xf32>, vector<1x22xf32>, vector<1x22xf32>, vector<1x22xf32>, vector<1x22xf32> -> vector<16x22xf32>
    %cst_16 = arith.constant 0.000000e+00 : f32
    %65 = vector.broadcast %cst_16 : f32 to vector<3x22xf32>
    %66 = tpu.concatenate %65, %64, %65 in 0 : vector<3x22xf32>, vector<16x22xf32>, vector<3x22xf32> -> vector<22x22xf32>
    %cst_17 = arith.constant 0.000000e+00 : f32
    %67 = vector.broadcast %cst_17 : f32 to vector<1x3xf32>
    %68 = vector.extract_strided_slice %30 {offsets = [0, 0], sizes = [1, 16], strides = [1, 1]} : vector<1x256xf32> to vector<1x16xf32>
    %69 = tpu.concatenate %67, %68, %67 in 1 : vector<1x3xf32>, vector<1x16xf32>, vector<1x3xf32> -> vector<1x22xf32>
    %70 = vector.extract_strided_slice %30 {offsets = [0, 16], sizes = [1, 16], strides = [1, 1]} : vector<1x256xf32> to vector<1x16xf32>
    %71 = tpu.concatenate %67, %70, %67 in 1 : vector<1x3xf32>, vector<1x16xf32>, vector<1x3xf32> -> vector<1x22xf32>
    %72 = vector.extract_strided_slice %30 {offsets = [0, 32], sizes = [1, 16], strides = [1, 1]} : vector<1x256xf32> to vector<1x16xf32>
    %73 = tpu.concatenate %67, %72, %67 in 1 : vector<1x3xf32>, vector<1x16xf32>, vector<1x3xf32> -> vector<1x22xf32>
    %74 = vector.extract_strided_slice %30 {offsets = [0, 48], sizes = [1, 16], strides = [1, 1]} : vector<1x256xf32> to vector<1x16xf32>
    %75 = tpu.concatenate %67, %74, %67 in 1 : vector<1x3xf32>, vector<1x16xf32>, vector<1x3xf32> -> vector<1x22xf32>
    %76 = vector.extract_strided_slice %30 {offsets = [0, 64], sizes = [1, 16], strides = [1, 1]} : vector<1x256xf32> to vector<1x16xf32>
    %77 = tpu.concatenate %67, %76, %67 in 1 : vector<1x3xf32>, vector<1x16xf32>, vector<1x3xf32> -> vector<1x22xf32>
    %78 = vector.extract_strided_slice %30 {offsets = [0, 80], sizes = [1, 16], strides = [1, 1]} : vector<1x256xf32> to vector<1x16xf32>
    %79 = tpu.concatenate %67, %78, %67 in 1 : vector<1x3xf32>, vector<1x16xf32>, vector<1x3xf32> -> vector<1x22xf32>
    %80 = vector.extract_strided_slice %30 {offsets = [0, 96], sizes = [1, 16], strides = [1, 1]} : vector<1x256xf32> to vector<1x16xf32>
    %81 = tpu.concatenate %67, %80, %67 in 1 : vector<1x3xf32>, vector<1x16xf32>, vector<1x3xf32> -> vector<1x22xf32>
    %82 = vector.extract_strided_slice %30 {offsets = [0, 112], sizes = [1, 16], strides = [1, 1]} : vector<1x256xf32> to vector<1x16xf32>
    %83 = tpu.concatenate %67, %82, %67 in 1 : vector<1x3xf32>, vector<1x16xf32>, vector<1x3xf32> -> vector<1x22xf32>
    %84 = vector.extract_strided_slice %30 {offsets = [0, 128], sizes = [1, 16], strides = [1, 1]} : vector<1x256xf32> to vector<1x16xf32>
    %85 = tpu.concatenate %67, %84, %67 in 1 : vector<1x3xf32>, vector<1x16xf32>, vector<1x3xf32> -> vector<1x22xf32>
    %86 = vector.extract_strided_slice %30 {offsets = [0, 144], sizes = [1, 16], strides = [1, 1]} : vector<1x256xf32> to vector<1x16xf32>
    %87 = tpu.concatenate %67, %86, %67 in 1 : vector<1x3xf32>, vector<1x16xf32>, vector<1x3xf32> -> vector<1x22xf32>
    %88 = vector.extract_strided_slice %30 {offsets = [0, 160], sizes = [1, 16], strides = [1, 1]} : vector<1x256xf32> to vector<1x16xf32>
    %89 = tpu.concatenate %67, %88, %67 in 1 : vector<1x3xf32>, vector<1x16xf32>, vector<1x3xf32> -> vector<1x22xf32>
    %90 = vector.extract_strided_slice %30 {offsets = [0, 176], sizes = [1, 16], strides = [1, 1]} : vector<1x256xf32> to vector<1x16xf32>
    %91 = tpu.concatenate %67, %90, %67 in 1 : vector<1x3xf32>, vector<1x16xf32>, vector<1x3xf32> -> vector<1x22xf32>
    %92 = vector.extract_strided_slice %30 {offsets = [0, 192], sizes = [1, 16], strides = [1, 1]} : vector<1x256xf32> to vector<1x16xf32>
    %93 = tpu.concatenate %67, %92, %67 in 1 : vector<1x3xf32>, vector<1x16xf32>, vector<1x3xf32> -> vector<1x22xf32>
    %94 = vector.extract_strided_slice %30 {offsets = [0, 208], sizes = [1, 16], strides = [1, 1]} : vector<1x256xf32> to vector<1x16xf32>
    %95 = tpu.concatenate %67, %94, %67 in 1 : vector<1x3xf32>, vector<1x16xf32>, vector<1x3xf32> -> vector<1x22xf32>
    %96 = vector.extract_strided_slice %30 {offsets = [0, 224], sizes = [1, 16], strides = [1, 1]} : vector<1x256xf32> to vector<1x16xf32>
    %97 = tpu.concatenate %67, %96, %67 in 1 : vector<1x3xf32>, vector<1x16xf32>, vector<1x3xf32> -> vector<1x22xf32>
    %98 = vector.extract_strided_slice %30 {offsets = [0, 240], sizes = [1, 16], strides = [1, 1]} : vector<1x256xf32> to vector<1x16xf32>
    %99 = tpu.concatenate %67, %98, %67 in 1 : vector<1x3xf32>, vector<1x16xf32>, vector<1x3xf32> -> vector<1x22xf32>
    %100 = tpu.concatenate %69, %71, %73, %75, %77, %79, %81, %83, %85, %87, %89, %91, %93, %95, %97, %99 in 0 : vector<1x22xf32>, vector<1x22xf32>, vector<1x22xf32>, vector<1x22xf32>, vector<1x22xf32>, vector<1x22xf32>, vector<1x22xf32>, vector<1x22xf32>, vector<1x22xf32>, vector<1x22xf32>, vector<1x22xf32>, vector<1x22xf32>, vector<1x22xf32>, vector<1x22xf32>, vector<1x22xf32>, vector<1x22xf32> -> vector<16x22xf32>
    %cst_18 = arith.constant 0.000000e+00 : f32
    %101 = vector.broadcast %cst_18 : f32 to vector<3x22xf32>
    %102 = tpu.concatenate %101, %100, %101 in 0 : vector<3x22xf32>, vector<16x22xf32>, vector<3x22xf32> -> vector<22x22xf32>
    %c0_19 = arith.constant 0 : index
    %103 = memref.load %arg4[%c0_19] : memref<98xf32, #tpu.memory_space<smem>>
    %104 = vector.extract_strided_slice %66 {offsets = [0, 0], sizes = [16, 16], strides = [1, 1]} : vector<22x22xf32> to vector<16x16xf32>
    %105 = vector.broadcast %103 : f32 to vector<16x16xf32>
    %106 = arith.mulf %105, %104 : vector<16x16xf32>
    %c49 = arith.constant 49 : index
    %107 = memref.load %arg4[%c49] : memref<98xf32, #tpu.memory_space<smem>>
    %108 = vector.extract_strided_slice %102 {offsets = [0, 0], sizes = [16, 16], strides = [1, 1]} : vector<22x22xf32> to vector<16x16xf32>
    %109 = vector.broadcast %107 : f32 to vector<16x16xf32>
    %110 = arith.mulf %109, %108 : vector<16x16xf32>
    %111 = arith.addf %106, %110 : vector<16x16xf32>
    %c1 = arith.constant 1 : index
    %112 = memref.load %arg4[%c1] : memref<98xf32, #tpu.memory_space<smem>>
    %113 = vector.extract_strided_slice %66 {offsets = [0, 1], sizes = [16, 16], strides = [1, 1]} : vector<22x22xf32> to vector<16x16xf32>
    %114 = vector.broadcast %112 : f32 to vector<16x16xf32>
    %115 = arith.mulf %114, %113 : vector<16x16xf32>
    %c50 = arith.constant 50 : index
    %116 = memref.load %arg4[%c50] : memref<98xf32, #tpu.memory_space<smem>>
    %117 = vector.extract_strided_slice %102 {offsets = [0, 1], sizes = [16, 16], strides = [1, 1]} : vector<22x22xf32> to vector<16x16xf32>
    %118 = vector.broadcast %116 : f32 to vector<16x16xf32>
    %119 = arith.mulf %118, %117 : vector<16x16xf32>
    %120 = arith.addf %115, %119 : vector<16x16xf32>
    %121 = arith.addf %111, %120 : vector<16x16xf32>
    %c2 = arith.constant 2 : index
    %122 = memref.load %arg4[%c2] : memref<98xf32, #tpu.memory_space<smem>>
    %123 = vector.extract_strided_slice %66 {offsets = [0, 2], sizes = [16, 16], strides = [1, 1]} : vector<22x22xf32> to vector<16x16xf32>
    %124 = vector.broadcast %122 : f32 to vector<16x16xf32>
    %125 = arith.mulf %124, %123 : vector<16x16xf32>
    %c51 = arith.constant 51 : index
    %126 = memref.load %arg4[%c51] : memref<98xf32, #tpu.memory_space<smem>>
    %127 = vector.extract_strided_slice %102 {offsets = [0, 2], sizes = [16, 16], strides = [1, 1]} : vector<22x22xf32> to vector<16x16xf32>
    %128 = vector.broadcast %126 : f32 to vector<16x16xf32>
    %129 = arith.mulf %128, %127 : vector<16x16xf32>
    %130 = arith.addf %125, %129 : vector<16x16xf32>
    %131 = arith.addf %121, %130 : vector<16x16xf32>
    %c3 = arith.constant 3 : index
    %132 = memref.load %arg4[%c3] : memref<98xf32, #tpu.memory_space<smem>>
    %133 = vector.extract_strided_slice %66 {offsets = [0, 3], sizes = [16, 16], strides = [1, 1]} : vector<22x22xf32> to vector<16x16xf32>
    %134 = vector.broadcast %132 : f32 to vector<16x16xf32>
    %135 = arith.mulf %134, %133 : vector<16x16xf32>
    %c52 = arith.constant 52 : index
    %136 = memref.load %arg4[%c52] : memref<98xf32, #tpu.memory_space<smem>>
    %137 = vector.extract_strided_slice %102 {offsets = [0, 3], sizes = [16, 16], strides = [1, 1]} : vector<22x22xf32> to vector<16x16xf32>
    %138 = vector.broadcast %136 : f32 to vector<16x16xf32>
    %139 = arith.mulf %138, %137 : vector<16x16xf32>
    %140 = arith.addf %135, %139 : vector<16x16xf32>
    %141 = arith.addf %131, %140 : vector<16x16xf32>
    %c4 = arith.constant 4 : index
    %142 = memref.load %arg4[%c4] : memref<98xf32, #tpu.memory_space<smem>>
    %143 = vector.extract_strided_slice %66 {offsets = [0, 4], sizes = [16, 16], strides = [1, 1]} : vector<22x22xf32> to vector<16x16xf32>
    %144 = vector.broadcast %142 : f32 to vector<16x16xf32>
    %145 = arith.mulf %144, %143 : vector<16x16xf32>
    %c53 = arith.constant 53 : index
    %146 = memref.load %arg4[%c53] : memref<98xf32, #tpu.memory_space<smem>>
    %147 = vector.extract_strided_slice %102 {offsets = [0, 4], sizes = [16, 16], strides = [1, 1]} : vector<22x22xf32> to vector<16x16xf32>
    %148 = vector.broadcast %146 : f32 to vector<16x16xf32>
    %149 = arith.mulf %148, %147 : vector<16x16xf32>
    %150 = arith.addf %145, %149 : vector<16x16xf32>
    %151 = arith.addf %141, %150 : vector<16x16xf32>
    %c5 = arith.constant 5 : index
    %152 = memref.load %arg4[%c5] : memref<98xf32, #tpu.memory_space<smem>>
    %153 = vector.extract_strided_slice %66 {offsets = [0, 5], sizes = [16, 16], strides = [1, 1]} : vector<22x22xf32> to vector<16x16xf32>
    %154 = vector.broadcast %152 : f32 to vector<16x16xf32>
    %155 = arith.mulf %154, %153 : vector<16x16xf32>
    %c54 = arith.constant 54 : index
    %156 = memref.load %arg4[%c54] : memref<98xf32, #tpu.memory_space<smem>>
    %157 = vector.extract_strided_slice %102 {offsets = [0, 5], sizes = [16, 16], strides = [1, 1]} : vector<22x22xf32> to vector<16x16xf32>
    %158 = vector.broadcast %156 : f32 to vector<16x16xf32>
    %159 = arith.mulf %158, %157 : vector<16x16xf32>
    %160 = arith.addf %155, %159 : vector<16x16xf32>
    %161 = arith.addf %151, %160 : vector<16x16xf32>
    %c6 = arith.constant 6 : index
    %162 = memref.load %arg4[%c6] : memref<98xf32, #tpu.memory_space<smem>>
    %163 = vector.extract_strided_slice %66 {offsets = [0, 6], sizes = [16, 16], strides = [1, 1]} : vector<22x22xf32> to vector<16x16xf32>
    %164 = vector.broadcast %162 : f32 to vector<16x16xf32>
    %165 = arith.mulf %164, %163 : vector<16x16xf32>
    %c55 = arith.constant 55 : index
    %166 = memref.load %arg4[%c55] : memref<98xf32, #tpu.memory_space<smem>>
    %167 = vector.extract_strided_slice %102 {offsets = [0, 6], sizes = [16, 16], strides = [1, 1]} : vector<22x22xf32> to vector<16x16xf32>
    %168 = vector.broadcast %166 : f32 to vector<16x16xf32>
    %169 = arith.mulf %168, %167 : vector<16x16xf32>
    %170 = arith.addf %165, %169 : vector<16x16xf32>
    %171 = arith.addf %161, %170 : vector<16x16xf32>
    %c7 = arith.constant 7 : index
    %172 = memref.load %arg4[%c7] : memref<98xf32, #tpu.memory_space<smem>>
    %173 = vector.extract_strided_slice %66 {offsets = [1, 0], sizes = [16, 16], strides = [1, 1]} : vector<22x22xf32> to vector<16x16xf32>
    %174 = vector.broadcast %172 : f32 to vector<16x16xf32>
    %175 = arith.mulf %174, %173 : vector<16x16xf32>
    %c56 = arith.constant 56 : index
    %176 = memref.load %arg4[%c56] : memref<98xf32, #tpu.memory_space<smem>>
    %177 = vector.extract_strided_slice %102 {offsets = [1, 0], sizes = [16, 16], strides = [1, 1]} : vector<22x22xf32> to vector<16x16xf32>
    %178 = vector.broadcast %176 : f32 to vector<16x16xf32>
    %179 = arith.mulf %178, %177 : vector<16x16xf32>
    %180 = arith.addf %175, %179 : vector<16x16xf32>
    %c8 = arith.constant 8 : index
    %181 = memref.load %arg4[%c8] : memref<98xf32, #tpu.memory_space<smem>>
    %182 = vector.extract_strided_slice %66 {offsets = [1, 1], sizes = [16, 16], strides = [1, 1]} : vector<22x22xf32> to vector<16x16xf32>
    %183 = vector.broadcast %181 : f32 to vector<16x16xf32>
    %184 = arith.mulf %183, %182 : vector<16x16xf32>
    %c57 = arith.constant 57 : index
    %185 = memref.load %arg4[%c57] : memref<98xf32, #tpu.memory_space<smem>>
    %186 = vector.extract_strided_slice %102 {offsets = [1, 1], sizes = [16, 16], strides = [1, 1]} : vector<22x22xf32> to vector<16x16xf32>
    %187 = vector.broadcast %185 : f32 to vector<16x16xf32>
    %188 = arith.mulf %187, %186 : vector<16x16xf32>
    %189 = arith.addf %184, %188 : vector<16x16xf32>
    %190 = arith.addf %180, %189 : vector<16x16xf32>
    %c9 = arith.constant 9 : index
    %191 = memref.load %arg4[%c9] : memref<98xf32, #tpu.memory_space<smem>>
    %192 = vector.extract_strided_slice %66 {offsets = [1, 2], sizes = [16, 16], strides = [1, 1]} : vector<22x22xf32> to vector<16x16xf32>
    %193 = vector.broadcast %191 : f32 to vector<16x16xf32>
    %194 = arith.mulf %193, %192 : vector<16x16xf32>
    %c58 = arith.constant 58 : index
    %195 = memref.load %arg4[%c58] : memref<98xf32, #tpu.memory_space<smem>>
    %196 = vector.extract_strided_slice %102 {offsets = [1, 2], sizes = [16, 16], strides = [1, 1]} : vector<22x22xf32> to vector<16x16xf32>
    %197 = vector.broadcast %195 : f32 to vector<16x16xf32>
    %198 = arith.mulf %197, %196 : vector<16x16xf32>
    %199 = arith.addf %194, %198 : vector<16x16xf32>
    %200 = arith.addf %190, %199 : vector<16x16xf32>
    %c10 = arith.constant 10 : index
    %201 = memref.load %arg4[%c10] : memref<98xf32, #tpu.memory_space<smem>>
    %202 = vector.extract_strided_slice %66 {offsets = [1, 3], sizes = [16, 16], strides = [1, 1]} : vector<22x22xf32> to vector<16x16xf32>
    %203 = vector.broadcast %201 : f32 to vector<16x16xf32>
    %204 = arith.mulf %203, %202 : vector<16x16xf32>
    %c59 = arith.constant 59 : index
    %205 = memref.load %arg4[%c59] : memref<98xf32, #tpu.memory_space<smem>>
    %206 = vector.extract_strided_slice %102 {offsets = [1, 3], sizes = [16, 16], strides = [1, 1]} : vector<22x22xf32> to vector<16x16xf32>
    %207 = vector.broadcast %205 : f32 to vector<16x16xf32>
    %208 = arith.mulf %207, %206 : vector<16x16xf32>
    %209 = arith.addf %204, %208 : vector<16x16xf32>
    %210 = arith.addf %200, %209 : vector<16x16xf32>
    %c11 = arith.constant 11 : index
    %211 = memref.load %arg4[%c11] : memref<98xf32, #tpu.memory_space<smem>>
    %212 = vector.extract_strided_slice %66 {offsets = [1, 4], sizes = [16, 16], strides = [1, 1]} : vector<22x22xf32> to vector<16x16xf32>
    %213 = vector.broadcast %211 : f32 to vector<16x16xf32>
    %214 = arith.mulf %213, %212 : vector<16x16xf32>
    %c60 = arith.constant 60 : index
    %215 = memref.load %arg4[%c60] : memref<98xf32, #tpu.memory_space<smem>>
    %216 = vector.extract_strided_slice %102 {offsets = [1, 4], sizes = [16, 16], strides = [1, 1]} : vector<22x22xf32> to vector<16x16xf32>
    %217 = vector.broadcast %215 : f32 to vector<16x16xf32>
    %218 = arith.mulf %217, %216 : vector<16x16xf32>
    %219 = arith.addf %214, %218 : vector<16x16xf32>
    %220 = arith.addf %210, %219 : vector<16x16xf32>
    %c12 = arith.constant 12 : index
    %221 = memref.load %arg4[%c12] : memref<98xf32, #tpu.memory_space<smem>>
    %222 = vector.extract_strided_slice %66 {offsets = [1, 5], sizes = [16, 16], strides = [1, 1]} : vector<22x22xf32> to vector<16x16xf32>
    %223 = vector.broadcast %221 : f32 to vector<16x16xf32>
    %224 = arith.mulf %223, %222 : vector<16x16xf32>
    %c61 = arith.constant 61 : index
    %225 = memref.load %arg4[%c61] : memref<98xf32, #tpu.memory_space<smem>>
    %226 = vector.extract_strided_slice %102 {offsets = [1, 5], sizes = [16, 16], strides = [1, 1]} : vector<22x22xf32> to vector<16x16xf32>
    %227 = vector.broadcast %225 : f32 to vector<16x16xf32>
    %228 = arith.mulf %227, %226 : vector<16x16xf32>
    %229 = arith.addf %224, %228 : vector<16x16xf32>
    %230 = arith.addf %220, %229 : vector<16x16xf32>
    %c13 = arith.constant 13 : index
    %231 = memref.load %arg4[%c13] : memref<98xf32, #tpu.memory_space<smem>>
    %232 = vector.extract_strided_slice %66 {offsets = [1, 6], sizes = [16, 16], strides = [1, 1]} : vector<22x22xf32> to vector<16x16xf32>
    %233 = vector.broadcast %231 : f32 to vector<16x16xf32>
    %234 = arith.mulf %233, %232 : vector<16x16xf32>
    %c62 = arith.constant 62 : index
    %235 = memref.load %arg4[%c62] : memref<98xf32, #tpu.memory_space<smem>>
    %236 = vector.extract_strided_slice %102 {offsets = [1, 6], sizes = [16, 16], strides = [1, 1]} : vector<22x22xf32> to vector<16x16xf32>
    %237 = vector.broadcast %235 : f32 to vector<16x16xf32>
    %238 = arith.mulf %237, %236 : vector<16x16xf32>
    %239 = arith.addf %234, %238 : vector<16x16xf32>
    %240 = arith.addf %230, %239 : vector<16x16xf32>
    %c14 = arith.constant 14 : index
    %241 = memref.load %arg4[%c14] : memref<98xf32, #tpu.memory_space<smem>>
    %242 = vector.extract_strided_slice %66 {offsets = [2, 0], sizes = [16, 16], strides = [1, 1]} : vector<22x22xf32> to vector<16x16xf32>
    %243 = vector.broadcast %241 : f32 to vector<16x16xf32>
    %244 = arith.mulf %243, %242 : vector<16x16xf32>
    %c63 = arith.constant 63 : index
    %245 = memref.load %arg4[%c63] : memref<98xf32, #tpu.memory_space<smem>>
    %246 = vector.extract_strided_slice %102 {offsets = [2, 0], sizes = [16, 16], strides = [1, 1]} : vector<22x22xf32> to vector<16x16xf32>
    %247 = vector.broadcast %245 : f32 to vector<16x16xf32>
    %248 = arith.mulf %247, %246 : vector<16x16xf32>
    %249 = arith.addf %244, %248 : vector<16x16xf32>
    %c15 = arith.constant 15 : index
    %250 = memref.load %arg4[%c15] : memref<98xf32, #tpu.memory_space<smem>>
    %251 = vector.extract_strided_slice %66 {offsets = [2, 1], sizes = [16, 16], strides = [1, 1]} : vector<22x22xf32> to vector<16x16xf32>
    %252 = vector.broadcast %250 : f32 to vector<16x16xf32>
    %253 = arith.mulf %252, %251 : vector<16x16xf32>
    %c64 = arith.constant 64 : index
    %254 = memref.load %arg4[%c64] : memref<98xf32, #tpu.memory_space<smem>>
    %255 = vector.extract_strided_slice %102 {offsets = [2, 1], sizes = [16, 16], strides = [1, 1]} : vector<22x22xf32> to vector<16x16xf32>
    %256 = vector.broadcast %254 : f32 to vector<16x16xf32>
    %257 = arith.mulf %256, %255 : vector<16x16xf32>
    %258 = arith.addf %253, %257 : vector<16x16xf32>
    %259 = arith.addf %249, %258 : vector<16x16xf32>
    %c16 = arith.constant 16 : index
    %260 = memref.load %arg4[%c16] : memref<98xf32, #tpu.memory_space<smem>>
    %261 = vector.extract_strided_slice %66 {offsets = [2, 2], sizes = [16, 16], strides = [1, 1]} : vector<22x22xf32> to vector<16x16xf32>
    %262 = vector.broadcast %260 : f32 to vector<16x16xf32>
    %263 = arith.mulf %262, %261 : vector<16x16xf32>
    %c65 = arith.constant 65 : index
    %264 = memref.load %arg4[%c65] : memref<98xf32, #tpu.memory_space<smem>>
    %265 = vector.extract_strided_slice %102 {offsets = [2, 2], sizes = [16, 16], strides = [1, 1]} : vector<22x22xf32> to vector<16x16xf32>
    %266 = vector.broadcast %264 : f32 to vector<16x16xf32>
    %267 = arith.mulf %266, %265 : vector<16x16xf32>
    %268 = arith.addf %263, %267 : vector<16x16xf32>
    %269 = arith.addf %259, %268 : vector<16x16xf32>
    %c17 = arith.constant 17 : index
    %270 = memref.load %arg4[%c17] : memref<98xf32, #tpu.memory_space<smem>>
    %271 = vector.extract_strided_slice %66 {offsets = [2, 3], sizes = [16, 16], strides = [1, 1]} : vector<22x22xf32> to vector<16x16xf32>
    %272 = vector.broadcast %270 : f32 to vector<16x16xf32>
    %273 = arith.mulf %272, %271 : vector<16x16xf32>
    %c66 = arith.constant 66 : index
    %274 = memref.load %arg4[%c66] : memref<98xf32, #tpu.memory_space<smem>>
    %275 = vector.extract_strided_slice %102 {offsets = [2, 3], sizes = [16, 16], strides = [1, 1]} : vector<22x22xf32> to vector<16x16xf32>
    %276 = vector.broadcast %274 : f32 to vector<16x16xf32>
    %277 = arith.mulf %276, %275 : vector<16x16xf32>
    %278 = arith.addf %273, %277 : vector<16x16xf32>
    %279 = arith.addf %269, %278 : vector<16x16xf32>
    %c18 = arith.constant 18 : index
    %280 = memref.load %arg4[%c18] : memref<98xf32, #tpu.memory_space<smem>>
    %281 = vector.extract_strided_slice %66 {offsets = [2, 4], sizes = [16, 16], strides = [1, 1]} : vector<22x22xf32> to vector<16x16xf32>
    %282 = vector.broadcast %280 : f32 to vector<16x16xf32>
    %283 = arith.mulf %282, %281 : vector<16x16xf32>
    %c67 = arith.constant 67 : index
    %284 = memref.load %arg4[%c67] : memref<98xf32, #tpu.memory_space<smem>>
    %285 = vector.extract_strided_slice %102 {offsets = [2, 4], sizes = [16, 16], strides = [1, 1]} : vector<22x22xf32> to vector<16x16xf32>
    %286 = vector.broadcast %284 : f32 to vector<16x16xf32>
    %287 = arith.mulf %286, %285 : vector<16x16xf32>
    %288 = arith.addf %283, %287 : vector<16x16xf32>
    %289 = arith.addf %279, %288 : vector<16x16xf32>
    %c19 = arith.constant 19 : index
    %290 = memref.load %arg4[%c19] : memref<98xf32, #tpu.memory_space<smem>>
    %291 = vector.extract_strided_slice %66 {offsets = [2, 5], sizes = [16, 16], strides = [1, 1]} : vector<22x22xf32> to vector<16x16xf32>
    %292 = vector.broadcast %290 : f32 to vector<16x16xf32>
    %293 = arith.mulf %292, %291 : vector<16x16xf32>
    %c68 = arith.constant 68 : index
    %294 = memref.load %arg4[%c68] : memref<98xf32, #tpu.memory_space<smem>>
    %295 = vector.extract_strided_slice %102 {offsets = [2, 5], sizes = [16, 16], strides = [1, 1]} : vector<22x22xf32> to vector<16x16xf32>
    %296 = vector.broadcast %294 : f32 to vector<16x16xf32>
    %297 = arith.mulf %296, %295 : vector<16x16xf32>
    %298 = arith.addf %293, %297 : vector<16x16xf32>
    %299 = arith.addf %289, %298 : vector<16x16xf32>
    %c20 = arith.constant 20 : index
    %300 = memref.load %arg4[%c20] : memref<98xf32, #tpu.memory_space<smem>>
    %301 = vector.extract_strided_slice %66 {offsets = [2, 6], sizes = [16, 16], strides = [1, 1]} : vector<22x22xf32> to vector<16x16xf32>
    %302 = vector.broadcast %300 : f32 to vector<16x16xf32>
    %303 = arith.mulf %302, %301 : vector<16x16xf32>
    %c69 = arith.constant 69 : index
    %304 = memref.load %arg4[%c69] : memref<98xf32, #tpu.memory_space<smem>>
    %305 = vector.extract_strided_slice %102 {offsets = [2, 6], sizes = [16, 16], strides = [1, 1]} : vector<22x22xf32> to vector<16x16xf32>
    %306 = vector.broadcast %304 : f32 to vector<16x16xf32>
    %307 = arith.mulf %306, %305 : vector<16x16xf32>
    %308 = arith.addf %303, %307 : vector<16x16xf32>
    %309 = arith.addf %299, %308 : vector<16x16xf32>
    %c21 = arith.constant 21 : index
    %310 = memref.load %arg4[%c21] : memref<98xf32, #tpu.memory_space<smem>>
    %311 = vector.extract_strided_slice %66 {offsets = [3, 0], sizes = [16, 16], strides = [1, 1]} : vector<22x22xf32> to vector<16x16xf32>
    %312 = vector.broadcast %310 : f32 to vector<16x16xf32>
    %313 = arith.mulf %312, %311 : vector<16x16xf32>
    %c70 = arith.constant 70 : index
    %314 = memref.load %arg4[%c70] : memref<98xf32, #tpu.memory_space<smem>>
    %315 = vector.extract_strided_slice %102 {offsets = [3, 0], sizes = [16, 16], strides = [1, 1]} : vector<22x22xf32> to vector<16x16xf32>
    %316 = vector.broadcast %314 : f32 to vector<16x16xf32>
    %317 = arith.mulf %316, %315 : vector<16x16xf32>
    %318 = arith.addf %313, %317 : vector<16x16xf32>
    %c22 = arith.constant 22 : index
    %319 = memref.load %arg4[%c22] : memref<98xf32, #tpu.memory_space<smem>>
    %320 = vector.extract_strided_slice %66 {offsets = [3, 1], sizes = [16, 16], strides = [1, 1]} : vector<22x22xf32> to vector<16x16xf32>
    %321 = vector.broadcast %319 : f32 to vector<16x16xf32>
    %322 = arith.mulf %321, %320 : vector<16x16xf32>
    %c71 = arith.constant 71 : index
    %323 = memref.load %arg4[%c71] : memref<98xf32, #tpu.memory_space<smem>>
    %324 = vector.extract_strided_slice %102 {offsets = [3, 1], sizes = [16, 16], strides = [1, 1]} : vector<22x22xf32> to vector<16x16xf32>
    %325 = vector.broadcast %323 : f32 to vector<16x16xf32>
    %326 = arith.mulf %325, %324 : vector<16x16xf32>
    %327 = arith.addf %322, %326 : vector<16x16xf32>
    %328 = arith.addf %318, %327 : vector<16x16xf32>
    %c23 = arith.constant 23 : index
    %329 = memref.load %arg4[%c23] : memref<98xf32, #tpu.memory_space<smem>>
    %330 = vector.extract_strided_slice %66 {offsets = [3, 2], sizes = [16, 16], strides = [1, 1]} : vector<22x22xf32> to vector<16x16xf32>
    %331 = vector.broadcast %329 : f32 to vector<16x16xf32>
    %332 = arith.mulf %331, %330 : vector<16x16xf32>
    %c72 = arith.constant 72 : index
    %333 = memref.load %arg4[%c72] : memref<98xf32, #tpu.memory_space<smem>>
    %334 = vector.extract_strided_slice %102 {offsets = [3, 2], sizes = [16, 16], strides = [1, 1]} : vector<22x22xf32> to vector<16x16xf32>
    %335 = vector.broadcast %333 : f32 to vector<16x16xf32>
    %336 = arith.mulf %335, %334 : vector<16x16xf32>
    %337 = arith.addf %332, %336 : vector<16x16xf32>
    %338 = arith.addf %328, %337 : vector<16x16xf32>
    %c24 = arith.constant 24 : index
    %339 = memref.load %arg4[%c24] : memref<98xf32, #tpu.memory_space<smem>>
    %340 = vector.extract_strided_slice %66 {offsets = [3, 3], sizes = [16, 16], strides = [1, 1]} : vector<22x22xf32> to vector<16x16xf32>
    %341 = vector.broadcast %339 : f32 to vector<16x16xf32>
    %342 = arith.mulf %341, %340 : vector<16x16xf32>
    %c73 = arith.constant 73 : index
    %343 = memref.load %arg4[%c73] : memref<98xf32, #tpu.memory_space<smem>>
    %344 = vector.extract_strided_slice %102 {offsets = [3, 3], sizes = [16, 16], strides = [1, 1]} : vector<22x22xf32> to vector<16x16xf32>
    %345 = vector.broadcast %343 : f32 to vector<16x16xf32>
    %346 = arith.mulf %345, %344 : vector<16x16xf32>
    %347 = arith.addf %342, %346 : vector<16x16xf32>
    %348 = arith.addf %338, %347 : vector<16x16xf32>
    %c25 = arith.constant 25 : index
    %349 = memref.load %arg4[%c25] : memref<98xf32, #tpu.memory_space<smem>>
    %350 = vector.extract_strided_slice %66 {offsets = [3, 4], sizes = [16, 16], strides = [1, 1]} : vector<22x22xf32> to vector<16x16xf32>
    %351 = vector.broadcast %349 : f32 to vector<16x16xf32>
    %352 = arith.mulf %351, %350 : vector<16x16xf32>
    %c74 = arith.constant 74 : index
    %353 = memref.load %arg4[%c74] : memref<98xf32, #tpu.memory_space<smem>>
    %354 = vector.extract_strided_slice %102 {offsets = [3, 4], sizes = [16, 16], strides = [1, 1]} : vector<22x22xf32> to vector<16x16xf32>
    %355 = vector.broadcast %353 : f32 to vector<16x16xf32>
    %356 = arith.mulf %355, %354 : vector<16x16xf32>
    %357 = arith.addf %352, %356 : vector<16x16xf32>
    %358 = arith.addf %348, %357 : vector<16x16xf32>
    %c26 = arith.constant 26 : index
    %359 = memref.load %arg4[%c26] : memref<98xf32, #tpu.memory_space<smem>>
    %360 = vector.extract_strided_slice %66 {offsets = [3, 5], sizes = [16, 16], strides = [1, 1]} : vector<22x22xf32> to vector<16x16xf32>
    %361 = vector.broadcast %359 : f32 to vector<16x16xf32>
    %362 = arith.mulf %361, %360 : vector<16x16xf32>
    %c75 = arith.constant 75 : index
    %363 = memref.load %arg4[%c75] : memref<98xf32, #tpu.memory_space<smem>>
    %364 = vector.extract_strided_slice %102 {offsets = [3, 5], sizes = [16, 16], strides = [1, 1]} : vector<22x22xf32> to vector<16x16xf32>
    %365 = vector.broadcast %363 : f32 to vector<16x16xf32>
    %366 = arith.mulf %365, %364 : vector<16x16xf32>
    %367 = arith.addf %362, %366 : vector<16x16xf32>
    %368 = arith.addf %358, %367 : vector<16x16xf32>
    %c27 = arith.constant 27 : index
    %369 = memref.load %arg4[%c27] : memref<98xf32, #tpu.memory_space<smem>>
    %370 = vector.extract_strided_slice %66 {offsets = [3, 6], sizes = [16, 16], strides = [1, 1]} : vector<22x22xf32> to vector<16x16xf32>
    %371 = vector.broadcast %369 : f32 to vector<16x16xf32>
    %372 = arith.mulf %371, %370 : vector<16x16xf32>
    %c76 = arith.constant 76 : index
    %373 = memref.load %arg4[%c76] : memref<98xf32, #tpu.memory_space<smem>>
    %374 = vector.extract_strided_slice %102 {offsets = [3, 6], sizes = [16, 16], strides = [1, 1]} : vector<22x22xf32> to vector<16x16xf32>
    %375 = vector.broadcast %373 : f32 to vector<16x16xf32>
    %376 = arith.mulf %375, %374 : vector<16x16xf32>
    %377 = arith.addf %372, %376 : vector<16x16xf32>
    %378 = arith.addf %368, %377 : vector<16x16xf32>
    %c28 = arith.constant 28 : index
    %379 = memref.load %arg4[%c28] : memref<98xf32, #tpu.memory_space<smem>>
    %380 = vector.extract_strided_slice %66 {offsets = [4, 0], sizes = [16, 16], strides = [1, 1]} : vector<22x22xf32> to vector<16x16xf32>
    %381 = vector.broadcast %379 : f32 to vector<16x16xf32>
    %382 = arith.mulf %381, %380 : vector<16x16xf32>
    %c77 = arith.constant 77 : index
    %383 = memref.load %arg4[%c77] : memref<98xf32, #tpu.memory_space<smem>>
    %384 = vector.extract_strided_slice %102 {offsets = [4, 0], sizes = [16, 16], strides = [1, 1]} : vector<22x22xf32> to vector<16x16xf32>
    %385 = vector.broadcast %383 : f32 to vector<16x16xf32>
    %386 = arith.mulf %385, %384 : vector<16x16xf32>
    %387 = arith.addf %382, %386 : vector<16x16xf32>
    %c29 = arith.constant 29 : index
    %388 = memref.load %arg4[%c29] : memref<98xf32, #tpu.memory_space<smem>>
    %389 = vector.extract_strided_slice %66 {offsets = [4, 1], sizes = [16, 16], strides = [1, 1]} : vector<22x22xf32> to vector<16x16xf32>
    %390 = vector.broadcast %388 : f32 to vector<16x16xf32>
    %391 = arith.mulf %390, %389 : vector<16x16xf32>
    %c78 = arith.constant 78 : index
    %392 = memref.load %arg4[%c78] : memref<98xf32, #tpu.memory_space<smem>>
    %393 = vector.extract_strided_slice %102 {offsets = [4, 1], sizes = [16, 16], strides = [1, 1]} : vector<22x22xf32> to vector<16x16xf32>
    %394 = vector.broadcast %392 : f32 to vector<16x16xf32>
    %395 = arith.mulf %394, %393 : vector<16x16xf32>
    %396 = arith.addf %391, %395 : vector<16x16xf32>
    %397 = arith.addf %387, %396 : vector<16x16xf32>
    %c30 = arith.constant 30 : index
    %398 = memref.load %arg4[%c30] : memref<98xf32, #tpu.memory_space<smem>>
    %399 = vector.extract_strided_slice %66 {offsets = [4, 2], sizes = [16, 16], strides = [1, 1]} : vector<22x22xf32> to vector<16x16xf32>
    %400 = vector.broadcast %398 : f32 to vector<16x16xf32>
    %401 = arith.mulf %400, %399 : vector<16x16xf32>
    %c79 = arith.constant 79 : index
    %402 = memref.load %arg4[%c79] : memref<98xf32, #tpu.memory_space<smem>>
    %403 = vector.extract_strided_slice %102 {offsets = [4, 2], sizes = [16, 16], strides = [1, 1]} : vector<22x22xf32> to vector<16x16xf32>
    %404 = vector.broadcast %402 : f32 to vector<16x16xf32>
    %405 = arith.mulf %404, %403 : vector<16x16xf32>
    %406 = arith.addf %401, %405 : vector<16x16xf32>
    %407 = arith.addf %397, %406 : vector<16x16xf32>
    %c31 = arith.constant 31 : index
    %408 = memref.load %arg4[%c31] : memref<98xf32, #tpu.memory_space<smem>>
    %409 = vector.extract_strided_slice %66 {offsets = [4, 3], sizes = [16, 16], strides = [1, 1]} : vector<22x22xf32> to vector<16x16xf32>
    %410 = vector.broadcast %408 : f32 to vector<16x16xf32>
    %411 = arith.mulf %410, %409 : vector<16x16xf32>
    %c80 = arith.constant 80 : index
    %412 = memref.load %arg4[%c80] : memref<98xf32, #tpu.memory_space<smem>>
    %413 = vector.extract_strided_slice %102 {offsets = [4, 3], sizes = [16, 16], strides = [1, 1]} : vector<22x22xf32> to vector<16x16xf32>
    %414 = vector.broadcast %412 : f32 to vector<16x16xf32>
    %415 = arith.mulf %414, %413 : vector<16x16xf32>
    %416 = arith.addf %411, %415 : vector<16x16xf32>
    %417 = arith.addf %407, %416 : vector<16x16xf32>
    %c32 = arith.constant 32 : index
    %418 = memref.load %arg4[%c32] : memref<98xf32, #tpu.memory_space<smem>>
    %419 = vector.extract_strided_slice %66 {offsets = [4, 4], sizes = [16, 16], strides = [1, 1]} : vector<22x22xf32> to vector<16x16xf32>
    %420 = vector.broadcast %418 : f32 to vector<16x16xf32>
    %421 = arith.mulf %420, %419 : vector<16x16xf32>
    %c81 = arith.constant 81 : index
    %422 = memref.load %arg4[%c81] : memref<98xf32, #tpu.memory_space<smem>>
    %423 = vector.extract_strided_slice %102 {offsets = [4, 4], sizes = [16, 16], strides = [1, 1]} : vector<22x22xf32> to vector<16x16xf32>
    %424 = vector.broadcast %422 : f32 to vector<16x16xf32>
    %425 = arith.mulf %424, %423 : vector<16x16xf32>
    %426 = arith.addf %421, %425 : vector<16x16xf32>
    %427 = arith.addf %417, %426 : vector<16x16xf32>
    %c33 = arith.constant 33 : index
    %428 = memref.load %arg4[%c33] : memref<98xf32, #tpu.memory_space<smem>>
    %429 = vector.extract_strided_slice %66 {offsets = [4, 5], sizes = [16, 16], strides = [1, 1]} : vector<22x22xf32> to vector<16x16xf32>
    %430 = vector.broadcast %428 : f32 to vector<16x16xf32>
    %431 = arith.mulf %430, %429 : vector<16x16xf32>
    %c82 = arith.constant 82 : index
    %432 = memref.load %arg4[%c82] : memref<98xf32, #tpu.memory_space<smem>>
    %433 = vector.extract_strided_slice %102 {offsets = [4, 5], sizes = [16, 16], strides = [1, 1]} : vector<22x22xf32> to vector<16x16xf32>
    %434 = vector.broadcast %432 : f32 to vector<16x16xf32>
    %435 = arith.mulf %434, %433 : vector<16x16xf32>
    %436 = arith.addf %431, %435 : vector<16x16xf32>
    %437 = arith.addf %427, %436 : vector<16x16xf32>
    %c34 = arith.constant 34 : index
    %438 = memref.load %arg4[%c34] : memref<98xf32, #tpu.memory_space<smem>>
    %439 = vector.extract_strided_slice %66 {offsets = [4, 6], sizes = [16, 16], strides = [1, 1]} : vector<22x22xf32> to vector<16x16xf32>
    %440 = vector.broadcast %438 : f32 to vector<16x16xf32>
    %441 = arith.mulf %440, %439 : vector<16x16xf32>
    %c83 = arith.constant 83 : index
    %442 = memref.load %arg4[%c83] : memref<98xf32, #tpu.memory_space<smem>>
    %443 = vector.extract_strided_slice %102 {offsets = [4, 6], sizes = [16, 16], strides = [1, 1]} : vector<22x22xf32> to vector<16x16xf32>
    %444 = vector.broadcast %442 : f32 to vector<16x16xf32>
    %445 = arith.mulf %444, %443 : vector<16x16xf32>
    %446 = arith.addf %441, %445 : vector<16x16xf32>
    %447 = arith.addf %437, %446 : vector<16x16xf32>
    %c35 = arith.constant 35 : index
    %448 = memref.load %arg4[%c35] : memref<98xf32, #tpu.memory_space<smem>>
    %449 = vector.extract_strided_slice %66 {offsets = [5, 0], sizes = [16, 16], strides = [1, 1]} : vector<22x22xf32> to vector<16x16xf32>
    %450 = vector.broadcast %448 : f32 to vector<16x16xf32>
    %451 = arith.mulf %450, %449 : vector<16x16xf32>
    %c84 = arith.constant 84 : index
    %452 = memref.load %arg4[%c84] : memref<98xf32, #tpu.memory_space<smem>>
    %453 = vector.extract_strided_slice %102 {offsets = [5, 0], sizes = [16, 16], strides = [1, 1]} : vector<22x22xf32> to vector<16x16xf32>
    %454 = vector.broadcast %452 : f32 to vector<16x16xf32>
    %455 = arith.mulf %454, %453 : vector<16x16xf32>
    %456 = arith.addf %451, %455 : vector<16x16xf32>
    %c36 = arith.constant 36 : index
    %457 = memref.load %arg4[%c36] : memref<98xf32, #tpu.memory_space<smem>>
    %458 = vector.extract_strided_slice %66 {offsets = [5, 1], sizes = [16, 16], strides = [1, 1]} : vector<22x22xf32> to vector<16x16xf32>
    %459 = vector.broadcast %457 : f32 to vector<16x16xf32>
    %460 = arith.mulf %459, %458 : vector<16x16xf32>
    %c85 = arith.constant 85 : index
    %461 = memref.load %arg4[%c85] : memref<98xf32, #tpu.memory_space<smem>>
    %462 = vector.extract_strided_slice %102 {offsets = [5, 1], sizes = [16, 16], strides = [1, 1]} : vector<22x22xf32> to vector<16x16xf32>
    %463 = vector.broadcast %461 : f32 to vector<16x16xf32>
    %464 = arith.mulf %463, %462 : vector<16x16xf32>
    %465 = arith.addf %460, %464 : vector<16x16xf32>
    %466 = arith.addf %456, %465 : vector<16x16xf32>
    %c37 = arith.constant 37 : index
    %467 = memref.load %arg4[%c37] : memref<98xf32, #tpu.memory_space<smem>>
    %468 = vector.extract_strided_slice %66 {offsets = [5, 2], sizes = [16, 16], strides = [1, 1]} : vector<22x22xf32> to vector<16x16xf32>
    %469 = vector.broadcast %467 : f32 to vector<16x16xf32>
    %470 = arith.mulf %469, %468 : vector<16x16xf32>
    %c86 = arith.constant 86 : index
    %471 = memref.load %arg4[%c86] : memref<98xf32, #tpu.memory_space<smem>>
    %472 = vector.extract_strided_slice %102 {offsets = [5, 2], sizes = [16, 16], strides = [1, 1]} : vector<22x22xf32> to vector<16x16xf32>
    %473 = vector.broadcast %471 : f32 to vector<16x16xf32>
    %474 = arith.mulf %473, %472 : vector<16x16xf32>
    %475 = arith.addf %470, %474 : vector<16x16xf32>
    %476 = arith.addf %466, %475 : vector<16x16xf32>
    %c38 = arith.constant 38 : index
    %477 = memref.load %arg4[%c38] : memref<98xf32, #tpu.memory_space<smem>>
    %478 = vector.extract_strided_slice %66 {offsets = [5, 3], sizes = [16, 16], strides = [1, 1]} : vector<22x22xf32> to vector<16x16xf32>
    %479 = vector.broadcast %477 : f32 to vector<16x16xf32>
    %480 = arith.mulf %479, %478 : vector<16x16xf32>
    %c87 = arith.constant 87 : index
    %481 = memref.load %arg4[%c87] : memref<98xf32, #tpu.memory_space<smem>>
    %482 = vector.extract_strided_slice %102 {offsets = [5, 3], sizes = [16, 16], strides = [1, 1]} : vector<22x22xf32> to vector<16x16xf32>
    %483 = vector.broadcast %481 : f32 to vector<16x16xf32>
    %484 = arith.mulf %483, %482 : vector<16x16xf32>
    %485 = arith.addf %480, %484 : vector<16x16xf32>
    %486 = arith.addf %476, %485 : vector<16x16xf32>
    %c39 = arith.constant 39 : index
    %487 = memref.load %arg4[%c39] : memref<98xf32, #tpu.memory_space<smem>>
    %488 = vector.extract_strided_slice %66 {offsets = [5, 4], sizes = [16, 16], strides = [1, 1]} : vector<22x22xf32> to vector<16x16xf32>
    %489 = vector.broadcast %487 : f32 to vector<16x16xf32>
    %490 = arith.mulf %489, %488 : vector<16x16xf32>
    %c88 = arith.constant 88 : index
    %491 = memref.load %arg4[%c88] : memref<98xf32, #tpu.memory_space<smem>>
    %492 = vector.extract_strided_slice %102 {offsets = [5, 4], sizes = [16, 16], strides = [1, 1]} : vector<22x22xf32> to vector<16x16xf32>
    %493 = vector.broadcast %491 : f32 to vector<16x16xf32>
    %494 = arith.mulf %493, %492 : vector<16x16xf32>
    %495 = arith.addf %490, %494 : vector<16x16xf32>
    %496 = arith.addf %486, %495 : vector<16x16xf32>
    %c40 = arith.constant 40 : index
    %497 = memref.load %arg4[%c40] : memref<98xf32, #tpu.memory_space<smem>>
    %498 = vector.extract_strided_slice %66 {offsets = [5, 5], sizes = [16, 16], strides = [1, 1]} : vector<22x22xf32> to vector<16x16xf32>
    %499 = vector.broadcast %497 : f32 to vector<16x16xf32>
    %500 = arith.mulf %499, %498 : vector<16x16xf32>
    %c89 = arith.constant 89 : index
    %501 = memref.load %arg4[%c89] : memref<98xf32, #tpu.memory_space<smem>>
    %502 = vector.extract_strided_slice %102 {offsets = [5, 5], sizes = [16, 16], strides = [1, 1]} : vector<22x22xf32> to vector<16x16xf32>
    %503 = vector.broadcast %501 : f32 to vector<16x16xf32>
    %504 = arith.mulf %503, %502 : vector<16x16xf32>
    %505 = arith.addf %500, %504 : vector<16x16xf32>
    %506 = arith.addf %496, %505 : vector<16x16xf32>
    %c41 = arith.constant 41 : index
    %507 = memref.load %arg4[%c41] : memref<98xf32, #tpu.memory_space<smem>>
    %508 = vector.extract_strided_slice %66 {offsets = [5, 6], sizes = [16, 16], strides = [1, 1]} : vector<22x22xf32> to vector<16x16xf32>
    %509 = vector.broadcast %507 : f32 to vector<16x16xf32>
    %510 = arith.mulf %509, %508 : vector<16x16xf32>
    %c90 = arith.constant 90 : index
    %511 = memref.load %arg4[%c90] : memref<98xf32, #tpu.memory_space<smem>>
    %512 = vector.extract_strided_slice %102 {offsets = [5, 6], sizes = [16, 16], strides = [1, 1]} : vector<22x22xf32> to vector<16x16xf32>
    %513 = vector.broadcast %511 : f32 to vector<16x16xf32>
    %514 = arith.mulf %513, %512 : vector<16x16xf32>
    %515 = arith.addf %510, %514 : vector<16x16xf32>
    %516 = arith.addf %506, %515 : vector<16x16xf32>
    %c42 = arith.constant 42 : index
    %517 = memref.load %arg4[%c42] : memref<98xf32, #tpu.memory_space<smem>>
    %518 = vector.extract_strided_slice %66 {offsets = [6, 0], sizes = [16, 16], strides = [1, 1]} : vector<22x22xf32> to vector<16x16xf32>
    %519 = vector.broadcast %517 : f32 to vector<16x16xf32>
    %520 = arith.mulf %519, %518 : vector<16x16xf32>
    %c91 = arith.constant 91 : index
    %521 = memref.load %arg4[%c91] : memref<98xf32, #tpu.memory_space<smem>>
    %522 = vector.extract_strided_slice %102 {offsets = [6, 0], sizes = [16, 16], strides = [1, 1]} : vector<22x22xf32> to vector<16x16xf32>
    %523 = vector.broadcast %521 : f32 to vector<16x16xf32>
    %524 = arith.mulf %523, %522 : vector<16x16xf32>
    %525 = arith.addf %520, %524 : vector<16x16xf32>
    %c43 = arith.constant 43 : index
    %526 = memref.load %arg4[%c43] : memref<98xf32, #tpu.memory_space<smem>>
    %527 = vector.extract_strided_slice %66 {offsets = [6, 1], sizes = [16, 16], strides = [1, 1]} : vector<22x22xf32> to vector<16x16xf32>
    %528 = vector.broadcast %526 : f32 to vector<16x16xf32>
    %529 = arith.mulf %528, %527 : vector<16x16xf32>
    %c92 = arith.constant 92 : index
    %530 = memref.load %arg4[%c92] : memref<98xf32, #tpu.memory_space<smem>>
    %531 = vector.extract_strided_slice %102 {offsets = [6, 1], sizes = [16, 16], strides = [1, 1]} : vector<22x22xf32> to vector<16x16xf32>
    %532 = vector.broadcast %530 : f32 to vector<16x16xf32>
    %533 = arith.mulf %532, %531 : vector<16x16xf32>
    %534 = arith.addf %529, %533 : vector<16x16xf32>
    %535 = arith.addf %525, %534 : vector<16x16xf32>
    %c44 = arith.constant 44 : index
    %536 = memref.load %arg4[%c44] : memref<98xf32, #tpu.memory_space<smem>>
    %537 = vector.extract_strided_slice %66 {offsets = [6, 2], sizes = [16, 16], strides = [1, 1]} : vector<22x22xf32> to vector<16x16xf32>
    %538 = vector.broadcast %536 : f32 to vector<16x16xf32>
    %539 = arith.mulf %538, %537 : vector<16x16xf32>
    %c93 = arith.constant 93 : index
    %540 = memref.load %arg4[%c93] : memref<98xf32, #tpu.memory_space<smem>>
    %541 = vector.extract_strided_slice %102 {offsets = [6, 2], sizes = [16, 16], strides = [1, 1]} : vector<22x22xf32> to vector<16x16xf32>
    %542 = vector.broadcast %540 : f32 to vector<16x16xf32>
    %543 = arith.mulf %542, %541 : vector<16x16xf32>
    %544 = arith.addf %539, %543 : vector<16x16xf32>
    %545 = arith.addf %535, %544 : vector<16x16xf32>
    %c45 = arith.constant 45 : index
    %546 = memref.load %arg4[%c45] : memref<98xf32, #tpu.memory_space<smem>>
    %547 = vector.extract_strided_slice %66 {offsets = [6, 3], sizes = [16, 16], strides = [1, 1]} : vector<22x22xf32> to vector<16x16xf32>
    %548 = vector.broadcast %546 : f32 to vector<16x16xf32>
    %549 = arith.mulf %548, %547 : vector<16x16xf32>
    %c94 = arith.constant 94 : index
    %550 = memref.load %arg4[%c94] : memref<98xf32, #tpu.memory_space<smem>>
    %551 = vector.extract_strided_slice %102 {offsets = [6, 3], sizes = [16, 16], strides = [1, 1]} : vector<22x22xf32> to vector<16x16xf32>
    %552 = vector.broadcast %550 : f32 to vector<16x16xf32>
    %553 = arith.mulf %552, %551 : vector<16x16xf32>
    %554 = arith.addf %549, %553 : vector<16x16xf32>
    %555 = arith.addf %545, %554 : vector<16x16xf32>
    %c46 = arith.constant 46 : index
    %556 = memref.load %arg4[%c46] : memref<98xf32, #tpu.memory_space<smem>>
    %557 = vector.extract_strided_slice %66 {offsets = [6, 4], sizes = [16, 16], strides = [1, 1]} : vector<22x22xf32> to vector<16x16xf32>
    %558 = vector.broadcast %556 : f32 to vector<16x16xf32>
    %559 = arith.mulf %558, %557 : vector<16x16xf32>
    %c95 = arith.constant 95 : index
    %560 = memref.load %arg4[%c95] : memref<98xf32, #tpu.memory_space<smem>>
    %561 = vector.extract_strided_slice %102 {offsets = [6, 4], sizes = [16, 16], strides = [1, 1]} : vector<22x22xf32> to vector<16x16xf32>
    %562 = vector.broadcast %560 : f32 to vector<16x16xf32>
    %563 = arith.mulf %562, %561 : vector<16x16xf32>
    %564 = arith.addf %559, %563 : vector<16x16xf32>
    %565 = arith.addf %555, %564 : vector<16x16xf32>
    %c47 = arith.constant 47 : index
    %566 = memref.load %arg4[%c47] : memref<98xf32, #tpu.memory_space<smem>>
    %567 = vector.extract_strided_slice %66 {offsets = [6, 5], sizes = [16, 16], strides = [1, 1]} : vector<22x22xf32> to vector<16x16xf32>
    %568 = vector.broadcast %566 : f32 to vector<16x16xf32>
    %569 = arith.mulf %568, %567 : vector<16x16xf32>
    %c96 = arith.constant 96 : index
    %570 = memref.load %arg4[%c96] : memref<98xf32, #tpu.memory_space<smem>>
    %571 = vector.extract_strided_slice %102 {offsets = [6, 5], sizes = [16, 16], strides = [1, 1]} : vector<22x22xf32> to vector<16x16xf32>
    %572 = vector.broadcast %570 : f32 to vector<16x16xf32>
    %573 = arith.mulf %572, %571 : vector<16x16xf32>
    %574 = arith.addf %569, %573 : vector<16x16xf32>
    %575 = arith.addf %565, %574 : vector<16x16xf32>
    %c48 = arith.constant 48 : index
    %576 = memref.load %arg4[%c48] : memref<98xf32, #tpu.memory_space<smem>>
    %577 = vector.extract_strided_slice %66 {offsets = [6, 6], sizes = [16, 16], strides = [1, 1]} : vector<22x22xf32> to vector<16x16xf32>
    %578 = vector.broadcast %576 : f32 to vector<16x16xf32>
    %579 = arith.mulf %578, %577 : vector<16x16xf32>
    %c97 = arith.constant 97 : index
    %580 = memref.load %arg4[%c97] : memref<98xf32, #tpu.memory_space<smem>>
    %581 = vector.extract_strided_slice %102 {offsets = [6, 6], sizes = [16, 16], strides = [1, 1]} : vector<22x22xf32> to vector<16x16xf32>
    %582 = vector.broadcast %580 : f32 to vector<16x16xf32>
    %583 = arith.mulf %582, %581 : vector<16x16xf32>
    %584 = arith.addf %579, %583 : vector<16x16xf32>
    %585 = arith.addf %575, %584 : vector<16x16xf32>
    %586 = arith.addf %171, %240 : vector<16x16xf32>
    %587 = arith.addf %309, %378 : vector<16x16xf32>
    %588 = arith.addf %447, %516 : vector<16x16xf32>
    %589 = arith.addf %586, %587 : vector<16x16xf32>
    %590 = arith.addf %588, %585 : vector<16x16xf32>
    %591 = arith.addf %589, %590 : vector<16x16xf32>
    %592 = arith.negf %591 : vector<16x16xf32>
    %593 = math.exp %592 : vector<16x16xf32>
    %cst_20 = arith.constant 1.000000e+00 : f32
    %594 = vector.broadcast %cst_20 : f32 to vector<16x16xf32>
    %595 = arith.addf %594, %593 : vector<16x16xf32>
    %596 = arith.divf %594, %595 : vector<16x16xf32>
    %597 = vector.extract_strided_slice %596 {offsets = [0, 0], sizes = [1, 16], strides = [1, 1]} : vector<16x16xf32> to vector<1x16xf32>
    %598 = vector.extract_strided_slice %596 {offsets = [1, 0], sizes = [1, 16], strides = [1, 1]} : vector<16x16xf32> to vector<1x16xf32>
    %599 = vector.extract_strided_slice %596 {offsets = [2, 0], sizes = [1, 16], strides = [1, 1]} : vector<16x16xf32> to vector<1x16xf32>
    %600 = vector.extract_strided_slice %596 {offsets = [3, 0], sizes = [1, 16], strides = [1, 1]} : vector<16x16xf32> to vector<1x16xf32>
    %601 = vector.extract_strided_slice %596 {offsets = [4, 0], sizes = [1, 16], strides = [1, 1]} : vector<16x16xf32> to vector<1x16xf32>
    %602 = vector.extract_strided_slice %596 {offsets = [5, 0], sizes = [1, 16], strides = [1, 1]} : vector<16x16xf32> to vector<1x16xf32>
    %603 = vector.extract_strided_slice %596 {offsets = [6, 0], sizes = [1, 16], strides = [1, 1]} : vector<16x16xf32> to vector<1x16xf32>
    %604 = vector.extract_strided_slice %596 {offsets = [7, 0], sizes = [1, 16], strides = [1, 1]} : vector<16x16xf32> to vector<1x16xf32>
    %605 = vector.extract_strided_slice %596 {offsets = [8, 0], sizes = [1, 16], strides = [1, 1]} : vector<16x16xf32> to vector<1x16xf32>
    %606 = vector.extract_strided_slice %596 {offsets = [9, 0], sizes = [1, 16], strides = [1, 1]} : vector<16x16xf32> to vector<1x16xf32>
    %607 = vector.extract_strided_slice %596 {offsets = [10, 0], sizes = [1, 16], strides = [1, 1]} : vector<16x16xf32> to vector<1x16xf32>
    %608 = vector.extract_strided_slice %596 {offsets = [11, 0], sizes = [1, 16], strides = [1, 1]} : vector<16x16xf32> to vector<1x16xf32>
    %609 = vector.extract_strided_slice %596 {offsets = [12, 0], sizes = [1, 16], strides = [1, 1]} : vector<16x16xf32> to vector<1x16xf32>
    %610 = vector.extract_strided_slice %596 {offsets = [13, 0], sizes = [1, 16], strides = [1, 1]} : vector<16x16xf32> to vector<1x16xf32>
    %611 = vector.extract_strided_slice %596 {offsets = [14, 0], sizes = [1, 16], strides = [1, 1]} : vector<16x16xf32> to vector<1x16xf32>
    %612 = vector.extract_strided_slice %596 {offsets = [15, 0], sizes = [1, 16], strides = [1, 1]} : vector<16x16xf32> to vector<1x16xf32>
    %613 = tpu.concatenate %597, %598, %599, %600, %601, %602, %603, %604, %605, %606, %607, %608, %609, %610, %611, %612 in 1 : vector<1x16xf32>, vector<1x16xf32>, vector<1x16xf32>, vector<1x16xf32>, vector<1x16xf32>, vector<1x16xf32>, vector<1x16xf32>, vector<1x16xf32>, vector<1x16xf32>, vector<1x16xf32>, vector<1x16xf32>, vector<1x16xf32>, vector<1x16xf32>, vector<1x16xf32>, vector<1x16xf32>, vector<1x16xf32> -> vector<1x256xf32>
    %614 = vector.broadcast %613 : vector<1x256xf32> to vector<32x256xf32>
    %615 = arith.mulf %24, %614 : vector<32x256xf32>
    %c0_21 = arith.constant 0 : index
    %c0_22 = arith.constant 0 : index
    %c0_23 = arith.constant 0 : index
    %616 = vector.load %arg5[%c0_21, %c0_22, %c0_23] : memref<1x32x256xf32, #tpu.memory_space<vmem>>, vector<1x32x256xf32>
    %617 = vector.shape_cast %616 : vector<1x32x256xf32> to vector<32x256xf32>
    %618 = vector.shape_cast %615 : vector<32x256xf32> to vector<1x32x256xf32>
    tpu.vector_store %arg5[%c0_21, %c0_22, %c0_23], %618 {strides = array<i32>} : memref<1x32x256xf32, #tpu.memory_space<vmem>>, vector<1x32x256xf32>,
    return
  }
  func.func @transform_0(%arg0: i32) -> (i32, i32, i32) {
    %c0_i32 = arith.constant 0 : i32
    %c0_i32_0 = arith.constant 0 : i32
    %c0_i32_1 = arith.constant 0 : i32
    return %arg0, %c0_i32, %c0_i32_0 : i32, i32, i32
  }
  func.func @transform_1(%arg0: i32) -> (i32, i32) {
    %c0_i32 = arith.constant 0 : i32
    %c0_i32_0 = arith.constant 0 : i32
    %c0_i32_1 = arith.constant 0 : i32
    return %c0_i32, %c0_i32_0 : i32, i32
  }
  func.func @transform_2(%arg0: i32) -> (i32, i32) {
    %c0_i32 = arith.constant 0 : i32
    %c0_i32_0 = arith.constant 0 : i32
    %c0_i32_1 = arith.constant 0 : i32
    return %c0_i32, %c0_i32_0 : i32, i32
  }
  func.func @transform_3(%arg0: i32) -> i32 {
    %c0_i32 = arith.constant 0 : i32
    %c0_i32_0 = arith.constant 0 : i32
    return %c0_i32 : i32
  }
  func.func @transform_4(%arg0: i32) -> (i32, i32, i32) {
    %c0_i32 = arith.constant 0 : i32
    %c0_i32_0 = arith.constant 0 : i32
    %c0_i32_1 = arith.constant 0 : i32
    return %arg0, %c0_i32, %c0_i32_0 : i32, i32, i32
  }
}

</mosaic_0001>

<bundles_post_ra>
// kernel: cbam_forward.1
= control target key start
LH: loop header
LB: loop body
LE: loop exit
PB: predicated region body
PF: predicated region fallthrough
CT: control target
= control target key end

     0   :  { %9 = vsyncpa [#allocation3], 0  ;;  %s2631_s15 = smov 0   ;;  %s3811_s0 = inlined_call_operand.vmem [shape: f32[2,32,256], index: 0, kind: input, shape index: {}]   ;;  %s3812_s1 = inlined_call_operand.vmem [shape: f32[4,32], index: 1, kind: input, shape index: {}]   ;;  %s3813_s2 = inlined_call_operand.vmem [shape: f32[32,4], index: 2, kind: input, shape index: {}]   ;;  %s3814_s3 = inlined_call_operand.vmem [shape: f32[98], index: 3, kind: input, shape index: {}]   ;;  %s3815_s4 = inlined_call_operand.vmem [shape: f32[2,32,256], index: 4, kind: output, shape index: {}]  }
   0x1 LB: > { %s2324_s16 = sadd.s32 4294967295, %s2578_s15   ;;  %p2326_p0 = scmp.ge.s32.totalorder %s2578_s15, 1  ;;  %s2578_s15 = sphi %s2631_s15, %s15_s15  }
   0x2   : > { %p135_p1 = scmp.lt.s32.totalorder %s2578_s15, 3  ;;  %s154_s19 = sshll.u32 %s3814_s3, 4  ;;  %s155_s19 = int_to_ptr.vmem [resolvable:$true] %s154_s19 }
   0x3   : > { %p2491_p3 = scmp.eq.s32.totalorder %s2324_s16, 0  ;;  %s2553_s21 = scalar_lea.vmem %s155_s19, 16 }
   0x4   : > { %p2642_p2 = pnand %p2326_p0, %p135_p1  ;;  %p2554_p6 = scmp.ne.s32.totalorder %s155_s19, %s2553_s21 }
   0x5   : > { %p2561_p10 = scmp.lt.s32.totalorder %s155_s19, %s155_s19  ;;  %p2562_p11 = scmp.lt.s32.totalorder %s2553_s21, %s2553_s21 }
   0x6   : > { %p2487_p4 = pneg %p2642_p2 }
   0x7   : > { %p2563_p12 = por %p2562_p11, %p2561_p10 }
   0x8   : > { %p2488_p5 = pnand %p2491_p3, %p2487_p4 }
   0xa   : > { %p2555_p7 = pneg %p2488_p5 }
   0xc   : > { %p2556_p8 = pnand %p2555_p7, %p2554_p6 }
   0xe   : > { %p2557_p9 = pneg %p2556_p8 }
  0x10   : > { %p2564_p13 = pnand %p2563_p12, %p2557_p9 }
  0x12   : > { %2567 = shalt.err (!%p2564_p13)
}
  0x13   : > { %s2580_s22 = smov [#allocation2]   ;;  %175 = sbr.rel (%p2642_p2) target bundleno = 1646 (0x66e), region = 36 }
  0x14   : > { %2490 = dma.vmem_to_smem (!%p2488_p5), %s155_s19, 16, %s2580_s22, [#allocation3]  }
  0x1a   : > { %2573 = dma.done.wait (%p2491_p3), [#allocation3], 16  }
  0x1b   : > { %2575 = vsyncadd (%p2491_p3), [#allocation3], 4294967280 }
  0x1c   : > { %181 = sfence }
  0x1d   : > { %p202_p0 = scmp.lt.s32.totalorder %s2324_s16, 1  ;;  %v2581_v16 = vmov 0.0|0.0   ;;  %vm2582_vm0 = vmmov 0   ;;  %v2583_v17 = vmov 0.0   ;;  %vm248_vm1 = vcmask 7168   ;;  %v254_v37 = vld [vmem:[%s3813_s2] sm:$0xff] }
  0x1e   : > { %2477 = vmatprep.subr.bf16.mxu0 %v2581_v16  ;;  %2466 = vmatprep.mubr.msk.f32.mxu0 %vm2582_vm0, %v2583_v17  ;;  %v253_v36 = vld [vmem:[%s3812_s1] sm:$0xf]  ;;  %vm258_vm2 = vcmask 261120   ;;  %vm333_vm3 = vcmask 31744   ;;  %vm346_vm4 = vcmask 1043456   ;;  %v255_v41 = vld [vmem:[%s3813_s2 + $0x8] sm:$0xff] }
  0x1f   : > { %s3886_s16 = smov (!%p202_p0, %s2324_s16), 1  ;;  %2471 = vmatprep.mubr.msk.f32.mxu1 %vm333_vm3, %v254_v37  ;;  %v256_v42 = vld [vmem:[%s3813_s2 + $0x10] sm:$0xff]  ;;  %v257_v43 = vld [vmem:[%s3813_s2 + $0x18] sm:$0xff]  ;;  %s2584_s11 = smov 127   ;;  %v2585_v48 = vmov 0   ;;  %vm549_vm5 = vcmask 23552  }
  0x20   : > { %s2446_s23 = sshll.u32 %s3886_s16, 6  ;;  %2527 = vset.pattern.permute.xlu1 %v2585_v48  ;;  %2528 = vset.pattern.permute.xlu0 %v2585_v48  ;;  %s2586_s12 = smov 115   ;;  %vm551_vm6 = vcmask 154624   ;;  %vm671_vm7 = vcmask 1040384   ;;  %vm673_vm8 = vcmask 1041408   ;;  %vm675_vm9 = vcmask 1042432  }
  0x21   : > { %s206_s26 = scalar_lea.vmem %s3811_s0, %s2446_s23  ;;  %s2587_s13 = smov 3   ;;  %vm678_vm10 = vcmask 1044480   ;;  %vm680_vm11 = vcmask 1045504   ;;  %vm682_vm12 = vcmask 1046528   ;;  %vm2213_vm13 = vcmask 130048  }
  0x22   : > { %v2661_v0 = vld [vmem:[%s206_s26] sm:$0xff]  ;;  %v2663_v1 = vld [vmem:[%s206_s26 + $0x8] sm:$0xff]  ;;  %v2665_v2 = vld [vmem:[%s206_s26 + $0x10] sm:$0xff]  ;;  %s2588_s14 = smov 83   ;;  %s2589_s17 = smov 99   ;;  %vm2216_vm14 = vcmask 392192  }
  0x23   : > { %v236_v3 = vmax.f32 %v2661_v0, %v2663_v1  ;;  %v220_v4 = vadd.f32 %v2663_v1, %v2661_v0  ;;  %v2671_v5 = vld [vmem:[%s206_s26 + $0x18] sm:$0xff]  ;;  %v2677_v8 = vld [vmem:[%s206_s26 + $0x30] sm:$0xff]  ;;  %v2681_v10 = vld [vmem:[%s206_s26 + $0x20] sm:$0xff]  ;;  %s2590_s18 = smov 51   ;;  %s2591_s19 = smov 67   ;;  %vm2218_vm15 = vcmask 523264  }
  0x24   : > { %v239_v6 = vmax.f32 %v2665_v2, %v2671_v5  ;;  %v223_v7 = vadd.f32 %v2671_v5, %v2665_v2  ;;  %v2679_v9 = vld [vmem:[%s206_s26 + $0x38] sm:$0xff]  ;;  %v2683_v11 = vld [vmem:[%s206_s26 + $0x28] sm:$0xff]  ;;  %s2592_s20 = smov 19   ;;  %s2593_s21 = smov 35   ;;  %vm2220_vm0 = vcmask 654336  }
  0x25   : > { %237 = vmax.xlane.f32.xlu1 %v236_v3  ;;  %221 = vadd.xlane.f32.xlu0 %v220_v4  ;;  %v229_v12 = vadd.f32 %v2679_v9, %v2677_v8  ;;  %v226_v13 = vadd.f32 %v2683_v11, %v2681_v10  ;;  %v245_v14 = vmax.f32 %v2677_v8, %v2679_v9  ;;  %s2829_s22 = sld [smem:[#allocation2 + $0x32]]  ;;  %s2833_s24 = sld [smem:[#allocation2 + $0x33]] }
  0x26   : > { %v242_v15 = vmax.f32 %v2681_v10, %v2683_v11  ;;  %s2845_s25 = sld [smem:[#allocation2 + $0x1]]  ;;  %s2851_s26 = sld [smem:[#allocation2 + $0x2]] }
  0x27   : > { %s2874_s27 = sld [smem:[#allocation2 + $0x3]]  ;;  %s2884_s28 = sld [smem:[#allocation2 + $0x34]] }
  0x28   : > { %s2899_s29 = sld [smem:[#allocation2 + $0x4]]  ;;  %s2909_s30 = sld [smem:[#allocation2 + $0x35]] }
  0x29   : > { %240 = vmax.xlane.f32.xlu1 %v239_v6  ;;  %224 = vadd.xlane.f32.xlu0 %v223_v7  ;;  %s2919_s5 = sld [smem:[#allocation2 + $0x5]]  ;;  %s2931_s6 = sld [smem:[#allocation2 + $0x36]] }
  0x2a   : > { %s2941_s7 = sld [smem:[#allocation2 + $0x6]]  ;;  %s2594_s8 = smov 126  }
  0x2b   : > { %s2951_s9 = sld [smem:[#allocation2 + $0x37]]  ;;  %s2360_s10 = sld [smem:[#allocation2 + $0x8]] }
  0x2d   : > { %230 = vadd.xlane.f32.xlu1 %v229_v12  ;;  %227 = vadd.xlane.f32.xlu0 %v226_v13 }
  0x31   : > { %246 = vmax.xlane.f32.xlu1 %v245_v14  ;;  %243 = vmax.xlane.f32.xlu0 %v242_v15 }
  0xb2   : > { %v238_v18 = vpop.xlane.xlu1 %237  ;;  %v222_v19 = vpop.xlane.xlu0 %221 }
  0xb3   : > { %v232_v20 = vmul.f32 0.00390625, %v222_v19 }
  0xb5   : > { %v249_v24 = vsel %vm248_vm1, %v232_v20, %v238_v18 }
  0xb6   : > { %v241_v21 = vpop.xlane.xlu1 %240  ;;  %v225_v22 = vpop.xlane.xlu0 %224 }
  0xb7   : > { %v233_v23 = vmul.f32 0.00390625, %v225_v22 }
  0xb9   : > { %v250_v25 = vsel %vm248_vm1, %v233_v23, %v241_v21 }
  0xba   : > { %v231_v26 = vpop.xlane.xlu1 %230  ;;  %v228_v27 = vpop.xlane.xlu0 %227  ;;  %v2478_v28 = vpack.c.bf16 %v250_v25, %v249_v24 }
  0xbb   : > { %v235_v29 = vmul.f32 0.00390625, %v231_v26  ;;  %v234_v30 = vmul.f32 0.00390625, %v228_v27 }
  0xbc   : > { %2479 = vmatpush3.bf16.msra.mxu0 %v2478_v28 }
  0xbd   : > { %2480 = vmatprep.subr.bf16.mxu0 %v2581_v16 }
  0xbe   : > { %v247_v31 = vpop.xlane.xlu1 %246  ;;  %v244_v32 = vpop.xlane.xlu0 %243 }
  0xbf   : > { %v252_v33 = vsel %vm248_vm1, %v235_v29, %v247_v31  ;;  %v251_v34 = vsel %vm248_vm1, %v234_v30, %v244_v32  ;;  %vm2222_vm1 = vcmask 785408  }
  0xc0   : > { %v2481_v35 = vpack.c.bf16 %v252_v33, %v251_v34 }
  0xc2   : > { %2482 = vmatpush3.bf16.msra.mxu0 %v2481_v35 }
  0xc5   : > { %2467 = vmatmul.mubr.msk.f32.vlgmr.msra.gmra.mrb[0].mxu0 %vm258_vm2, %v253_v36 }
 0x198   : > { %v328_v38 = vpop.f32.mrb[0].mxu0 }
 0x199   : > { %v332_v39 = vmax.f32 %v328_v38, 0.0  ;;  %v2468_v40 = vpop.f32.mrb[1].mxu0 }
 0x19b   : > { %2469 = vmatprep.subr.msk.mxu1 %vm346_vm4, %v332_v39 }
 0x19c   : > { %2470 = vmatpush3.msk.msra.mxu1 %vm346_vm4, %v332_v39 }
 0x19d   : > { %2472 = vmatmul.mubr.msk.f32.vlgmr.msra.gmra.mrb[0].mxu1 %vm333_vm3, %v255_v41 }
 0x19e   : > { %2474 = vmatprep.mubr.msk.f32.mxu1 %vm333_vm3, %v256_v42 }
 0x1a1   : > { %2475 = vmatmul.mubr.msk.f32.gmra.mrb[2].mxu1 %vm333_vm3, %v257_v43  ;;  %vm2224_vm3 = vcmask 916480  }
 0x270   : > { %v2473_v44 = vpop.f32.mrb[0].mxu1 }
 0x271   : > { %441 = vrot.lane.b32.xlu1 %v2473_v44, %s2584_s11  ;;  %v416_v45 = vpop.f32.mrb[1].mxu1 }
 0x272   : > { %439 = vrot.lane.b32.xlu0 %v416_v45, %s2584_s11 }
 0x274   : > { %v2476_v46 = vpop.f32.mrb[2].mxu1 }
 0x275   : > { %445 = vrot.lane.b32.xlu1 %v2476_v46, %s2584_s11  ;;  %v426_v47 = vpop.f32.mrb[3].mxu1 }
 0x279   : > { %443 = vrot.lane.b32.xlu1 %v426_v47, %s2584_s11 }
 0x2e3   : > { %v442_v49 = vpop.permute.xlu1 %441 }
 0x2e4   : > { %v452_v50 = vadd.f32 %v2473_v44, %v442_v49  ;;  %v440_v51 = vpop.permute.xlu0 %439 }
 0x2e5   : > { %v451_v52 = vadd.f32 %v440_v51, %v416_v45 }
 0x2e6   : > { %v2342_v53 = vmul.f32 -1.442695, %v452_v50 }
 0x2e7   : > { %v2341_v54 = vmul.f32 -1.442695, %v451_v52  ;;  %v446_v55 = vpop.permute.xlu1 %445 }
 0x2e8   : > { %2529 = vpow2.f32 %v2342_v53  ;;  %v454_v56 = vadd.f32 %v2476_v46, %v446_v55 }
 0x2e9   : > { %2531 = vpow2.f32 %v2341_v54 }
 0x2ea   : > { %v2344_v57 = vmul.f32 -1.442695, %v454_v56 }
 0x2eb   : > { %v444_v58 = vpop.permute.xlu1 %443 }
 0x2ec   : > { %2533 = vpow2.f32 %v2344_v57  ;;  %v453_v59 = vadd.f32 %v444_v58, %v426_v47 }
 0x2ee   : > { %v2343_v60 = vmul.f32 -1.442695, %v453_v59 }
 0x2f0   : > { %2535 = vpow2.f32 %v2343_v60 }
 0x2f2   : > { %v2530_v61 = vpop.eup %2529 }
 0x2f3   : > { %v2532_v62 = vpop.eup %2531  ;;  %v468_v63 = vadd.f32 1.0, %v2530_v61 }
 0x2f4   : > { %v467_v3 = vadd.f32 1.0, %v2532_v62 }
 0x2f5   : > { %2537 = vrcp.f32 %v468_v63 }
 0x2f6   : > { %v2534_v4 = vpop.eup %2533  ;;  %2539 = vrcp.f32 %v467_v3 }
 0x2f7   : > { %v470_v6 = vadd.f32 1.0, %v2534_v4 }
 0x2f9   : > { %2541 = vrcp.f32 %v470_v6 }
 0x2fa   : > { %v2536_v7 = vpop.eup %2535 }
 0x2fb   : > { %v469_v12 = vadd.f32 1.0, %v2536_v7 }
 0x2fd   : > { %2543 = vrcp.f32 %v469_v12 }
 0x2ff   : > { %v2538_v13 = vpop.eup %2537 }
 0x300   : > { %v2540_v14 = vpop.eup %2539  ;;  %486 = vperm.xlu1 %2527, %v2538_v13  }
 0x301   : > { %481 = vperm.xlu0 %2528, %v2540_v14  }
 0x303   : > { %v2542_v15 = vpop.eup %2541 }
 0x305   : > { %496 = vperm.xlu0 %2528, %v2542_v15  }
 0x307   : > { %v2544_v16 = vpop.eup %2543 }
 0x308   : > { %491 = vperm.xlu1 %2527, %v2544_v16  }
 0x37f   : > { %v487_v18 = vpop.permute.xlu1 %486 }
 0x380   : > { %v482_v17 = vpop.permute.xlu0 %481  ;;  %v2719_v22 = vmul.f32 %v487_v18, %v2665_v2 }
 0x381   : > { %v2722_v23 = vmul.f32 %v482_v17, %v2661_v0  ;;  %v2731_v26 = vmul.f32 %v482_v17, %v2663_v1  ;;  %v2741_v0 = vmul.f32 %v487_v18, %v2671_v5 }
 0x382   : > { %3826 = vst [vmem:[#allocation6_spill] sm:$0xff] %v2719_v22 }
 0x383   : > { %3827 = vst [vmem:[#allocation7_spill] sm:$0xff] %v2722_v23  ;;  %3830 = vst [vmem:[#allocation10_spill] sm:$0xff] %v2731_v26  ;;  %v507_v33 = vadd.f32 %v2719_v22, %v2722_v23  ;;  %v516_v43 = vadd.f32 %v2741_v0, %v2731_v26 }
 0x384   : > { %v497_v19 = vpop.permute.xlu0 %496  ;;  %3832 = vst [vmem:[#allocation12_spill] sm:$0xff] %v2741_v0 }
 0x385   : > { %v2716_v20 = vmul.f32 %v497_v19, %v2677_v8  ;;  %v2734_v27 = vmul.f32 %v497_v19, %v2679_v9 }
 0x387   : > { %3825 = vst [vmem:[#allocation5_spill] sm:$0xff] %v2716_v20  ;;  %v492_v21 = vpop.permute.xlu1 %491  ;;  %3831 = vst [vmem:[#allocation11_spill] sm:$0xff] %v2734_v27  ;;  %v528_v8 = vmax.f32 %v2719_v22, %v2716_v20  ;;  %v537_v1 = vmax.f32 %v2741_v0, %v2734_v27 }
 0x388   : > { %v2725_v24 = vmul.f32 %v492_v21, %v2681_v10  ;;  %v2728_v25 = vmul.f32 %v492_v21, %v2683_v11 }
 0x38a   : > { %3828 = vst [vmem:[#allocation8_spill] sm:$0xff] %v2725_v24  ;;  %3829 = vst [vmem:[#allocation9_spill] sm:$0xff] %v2728_v25  ;;  %v527_v2 = vmax.f32 %v2722_v23, %v2725_v24  ;;  %v536_v11 = vmax.f32 %v2731_v26, %v2728_v25  ;;  %v508_v5 = vadd.f32 %v507_v33, %v2725_v24 }
 0x38b   : > { %v517_v45 = vadd.f32 %v516_v43, %v2728_v25 }
 0x38c   : > { %v529_v10 = vmax.f32 %v527_v2, %v528_v8  ;;  %v538_v9 = vmax.f32 %v536_v11, %v537_v1  ;;  %v509_v37 = vadd.f32 %v508_v5, %v2716_v20 }
 0x38d   : > { %v518_v48 = vadd.f32 %v517_v45, %v2734_v27 }
 0x38e   : > { %v530_v28 = vrot.slane %v529_v10, 4  ;;  %v539_v32 = vrot.slane %v538_v9, 4  ;;  %v510_v39 = vrot.slane %v509_v37, 4 }
 0x38f   : > { %v519_v50 = vrot.slane %v518_v48, 4 }
 0x390   : > { %v531_v29 = vmax.f32 %v529_v10, %v530_v28  ;;  %v540_v36 = vmax.f32 %v538_v9, %v539_v32  ;;  %v511_v41 = vadd.f32 %v510_v39, %v509_v37 }
 0x391   : > { %v520_v52 = vadd.f32 %v519_v50, %v518_v48 }
 0x392   : > { %v532_v30 = vrot.slane %v531_v29, 2  ;;  %v541_v38 = vrot.slane %v540_v36, 2  ;;  %v512_v44 = vrot.slane %v511_v41, 2 }
 0x393   : > { %v521_v53 = vrot.slane %v520_v52, 2 }
 0x394   : > { %v533_v31 = vmax.f32 %v531_v29, %v532_v30  ;;  %v542_v40 = vmax.f32 %v540_v36, %v541_v38  ;;  %v513_v47 = vadd.f32 %v512_v44, %v511_v41 }
 0x395   : > { %v522_v55 = vadd.f32 %v521_v53, %v520_v52 }
 0x396   : > { %v534_v34 = vrot.slane %v533_v31, 1  ;;  %v543_v42 = vrot.slane %v542_v40, 1  ;;  %v514_v49 = vrot.slane %v513_v47, 1 }
 0x397   : > { %v523_v56 = vrot.slane %v522_v55, 1 }
 0x398   : > { %v535_v35 = vmax.f32 %v533_v31, %v534_v34  ;;  %v544_v46 = vmax.f32 %v542_v40, %v543_v42  ;;  %v515_v51 = vadd.f32 %v514_v49, %v513_v47 }
 0x399   : > { %v524_v57 = vadd.f32 %v523_v56, %v522_v55 }
 0x39a   : > { %707 = vrot.lane.b32.xlu0 %v535_v35, %s2586_s12  ;;  %702 = vrot.lane.b32.xlu1 %v535_v35, %s2587_s13  ;;  %v525_v54 = vmul.f32 0.03125, %v515_v51 }
 0x39b   : > { %v526_v58 = vmul.f32 0.03125, %v524_v57 }
 0x39e   : > { %717 = vrot.lane.b32.xlu0 %v535_v35, %s2588_s14  ;;  %712 = vrot.lane.b32.xlu1 %v535_v35, %s2589_s17 }
 0x3a2   : > { %727 = vrot.lane.b32.xlu0 %v535_v35, %s2590_s18  ;;  %722 = vrot.lane.b32.xlu1 %v535_v35, %s2591_s19 }
 0x3a6   : > { %737 = vrot.lane.b32.xlu0 %v535_v35, %s2592_s20  ;;  %732 = vrot.lane.b32.xlu1 %v535_v35, %s2593_s21 }
 0x3aa   : > { %748 = vrot.lane.b32.xlu0 %v544_v46, %s2586_s12  ;;  %743 = vrot.lane.b32.xlu1 %v544_v46, %s2587_s13 }
 0x3ae   : > { %758 = vrot.lane.b32.xlu0 %v544_v46, %s2588_s14  ;;  %753 = vrot.lane.b32.xlu1 %v544_v46, %s2589_s17 }
 0x3b2   : > { %768 = vrot.lane.b32.xlu0 %v544_v46, %s2590_s18  ;;  %763 = vrot.lane.b32.xlu1 %v544_v46, %s2591_s19 }
 0x3b6   : > { %778 = vrot.lane.b32.xlu0 %v544_v46, %s2592_s20  ;;  %773 = vrot.lane.b32.xlu1 %v544_v46, %s2593_s21 }
 0x3ba   : > { %553 = vrot.lane.b32.xlu0 %v525_v54, %s2586_s12  ;;  %546 = vrot.lane.b32.xlu1 %v525_v54, %s2587_s13 }
 0x3be   : > { %563 = vrot.lane.b32.xlu0 %v525_v54, %s2588_s14  ;;  %558 = vrot.lane.b32.xlu1 %v525_v54, %s2589_s17 }
 0x3c2   : > { %573 = vrot.lane.b32.xlu0 %v525_v54, %s2590_s18  ;;  %568 = vrot.lane.b32.xlu1 %v525_v54, %s2591_s19 }
 0x3c6   : > { %583 = vrot.lane.b32.xlu0 %v525_v54, %s2592_s20  ;;  %578 = vrot.lane.b32.xlu1 %v525_v54, %s2593_s21 }
 0x3ca   : > { %594 = vrot.lane.b32.xlu0 %v526_v58, %s2586_s12  ;;  %589 = vrot.lane.b32.xlu1 %v526_v58, %s2587_s13  ;;  %s2595_s12 = smov 125   ;;  %s2361_s13 = sld [smem:[#allocation2 + $0x39]] }
 0x3ce   : > { %604 = vrot.lane.b32.xlu0 %v526_v58, %s2588_s14  ;;  %599 = vrot.lane.b32.xlu1 %v526_v58, %s2589_s17  ;;  %s2596_s14 = smov 124   ;;  %s2597_s17 = smov 123  }
 0x3d2   : > { %614 = vrot.lane.b32.xlu0 %v526_v58, %s2590_s18  ;;  %609 = vrot.lane.b32.xlu1 %v526_v58, %s2591_s19  ;;  %s2362_s18 = sld [smem:[#allocation2 + $0x9]]  ;;  %s2363_s19 = sld [smem:[#allocation2 + $0x3a]] }
 0x3d6   : > { %624 = vrot.lane.b32.xlu0 %v526_v58, %s2592_s20  ;;  %619 = vrot.lane.b32.xlu1 %v526_v58, %s2593_s21  ;;  %s2364_s20 = sld [smem:[#allocation2 + $0xa]]  ;;  %s2598_s21 = smov 122  }
 0x40c   : > { %v708_v59 = vpop.permute.xlu0 %707  ;;  %v703_v60 = vpop.permute.xlu1 %702 }
 0x40d   : > { %v710_v7 = vsel %vm549_vm5, 0.0, %v708_v59  ;;  %v705_v2 = vsel %vm549_vm5, 0.0, %v703_v60 }
 0x40e   : > { %v711_v15 = vsel %vm551_vm6, %v710_v7, 0.0  ;;  %v706_v30 = vsel %vm551_vm6, %v705_v2, 0.0 }
 0x40f   : > { %v784_v8 = vrot.slane %v711_v15, 7 }
 0x410   : > { %v718_v61 = vpop.permute.xlu0 %717  ;;  %v713_v62 = vpop.permute.xlu1 %712 }
 0x411   : > { %v715_v14 = vsel %vm549_vm5, 0.0, %v713_v62  ;;  %v720_v16 = vsel %vm549_vm5, 0.0, %v718_v61  ;;  %v825_v32 = vsel %vm671_vm7, %v706_v30, %v784_v8 }
 0x412   : > { %v716_v17 = vsel %vm551_vm6, %v715_v14, 0.0  ;;  %v721_v10 = vsel %vm551_vm6, %v720_v16, 0.0 }
 0x413   : > { %v787_v11 = vrot.slane %v716_v17, 6  ;;  %v790_v33 = vrot.slane %v721_v10, 5 }
 0x414   : > { %v728_v63 = vpop.permute.xlu0 %727  ;;  %v723_v3 = vpop.permute.xlu1 %722 }
 0x415   : > { %v725_v21 = vsel %vm549_vm5, 0.0, %v723_v3  ;;  %v730_v1 = vsel %vm549_vm5, 0.0, %v728_v63  ;;  %v826_v34 = vsel %vm673_vm8, %v825_v32, %v787_v11 }
 0x416   : > { %v726_v28 = vsel %vm551_vm6, %v725_v21, 0.0  ;;  %v731_v5 = vsel %vm551_vm6, %v730_v1, 0.0  ;;  %v827_v41 = vsel %vm675_vm9, %v826_v34, %v790_v33 }
 0x417   : > { %v793_v35 = vrot.slane %v726_v28, 4  ;;  %v796_v40 = vrot.slane %v731_v5, 3 }
 0x418   : > { %v738_v4 = vpop.permute.xlu0 %737  ;;  %v733_v6 = vpop.permute.xlu1 %732 }
 0x419   : > { %v735_v31 = vsel %vm549_vm5, 0.0, %v733_v6  ;;  %v740_v36 = vsel %vm549_vm5, 0.0, %v738_v4  ;;  %v828_v42 = vsel %vm346_vm4, %v827_v41, %v793_v35 }
 0x41a   : > { %v736_v37 = vsel %vm551_vm6, %v735_v31, 0.0  ;;  %v741_v43 = vsel %vm551_vm6, %v740_v36, 0.0  ;;  %v829_v50 = vsel %vm678_vm10, %v828_v42, %v796_v40 }
 0x41b   : > { %v799_v44 = vrot.slane %v736_v37, 2  ;;  %v802_v49 = vrot.slane %v741_v43, 1 }
 0x41c   : > { %v749_v12 = vpop.permute.xlu0 %748  ;;  %v744_v13 = vpop.permute.xlu1 %743 }
 0x41d   : > { %v751_v47 = vsel %vm549_vm5, 0.0, %v749_v12  ;;  %v830_v52 = vsel %vm680_vm11, %v829_v50, %v799_v44  ;;  %v746_v54 = vsel %vm549_vm5, 0.0, %v744_v13 }
 0x41e   : > { %v752_v53 = vsel %vm551_vm6, %v751_v47, 0.0  ;;  %v2822_v61 = vsel %vm682_vm12, %v830_v52, %v802_v49  ;;  %v747_v4 = vsel %vm551_vm6, %v746_v54, 0.0  ;;  %v884_v54 = vstv %s2833_s24  ;;  %s2366_s24 = sld [smem:[#allocation2 + $0xb]] }
 0x41f   : > { %v805_v3 = vrot.slane %v752_v53, 7  ;;  %v841_v28 = vrot.slane %v2822_v61, 5  ;;  %v864_v53 = vstv %s2829_s22  ;;  %s2365_s22 = sld [smem:[#allocation2 + $0x3b]] }
 0x420   : > { %v759_v18 = vpop.permute.xlu0 %758  ;;  %v754_v19 = vpop.permute.xlu1 %753 }
 0x421   : > { %v756_v55 = vsel %vm549_vm5, 0.0, %v754_v19  ;;  %v761_v12 = vsel %vm549_vm5, 0.0, %v759_v18  ;;  %v832_v30 = vsel %vm671_vm7, %v747_v4, %v805_v3 }
 0x422   : > { %v757_v6 = vsel %vm551_vm6, %v756_v55, 0.0  ;;  %v762_v31 = vsel %vm551_vm6, %v761_v12, 0.0  ;;  %v2868_v55 = vsel %vm675_vm9, 0.0, %v841_v28 }
 0x423   : > { %v808_v10 = vrot.slane %v757_v6, 6  ;;  %v860_v6 = vstv %s2845_s25  ;;  %s2367_s25 = sld [smem:[#allocation2 + $0x3c]] }
 0x424   : > { %v2797_v29 = vpop.permute.xlu0 %768  ;;  %v764_v9 = vpop.permute.xlu1 %763 }
 0x425   : > { %v766_v19 = vsel %vm549_vm5, 0.0, %v764_v9  ;;  %v771_v32 = vsel %vm549_vm5, 0.0, %v2797_v29  ;;  %v811_v29 = vrot.slane %v762_v31, 5  ;;  %v833_v43 = vsel %vm673_vm8, %v832_v30, %v808_v10 }
 0x426   : > { %v767_v33 = vsel %vm551_vm6, %v766_v19, 0.0 }
 0x427   : > { %v814_v47 = vrot.slane %v767_v33, 4 }
 0x428   : > { %v2806_v38 = vpop.permute.xlu0 %778  ;;  %v774_v39 = vpop.permute.xlu1 %773 }
 0x429   : > { %v776_v37 = vsel %vm549_vm5, 0.0, %v774_v39 }
 0x42a   : > { %v777_v49 = vsel %vm551_vm6, %v776_v37, 0.0 }
 0x42b   : > { %v820_v4 = vrot.slane %v777_v49, 2 }
 0x42c   : > { %v554_v45 = vpop.permute.xlu0 %553  ;;  %v547_v46 = vpop.permute.xlu1 %546 }
 0x42d   : > { %v556_v48 = vsel %vm549_vm5, 0.0, %v554_v45  ;;  %v550_v59 = vsel %vm549_vm5, 0.0, %v547_v46  ;;  %v772_v46 = vsel %vm551_vm6, %v771_v32, 0.0 }
 0x42e   : > { %v557_v51 = vsel %vm551_vm6, %v556_v48, 0.0  ;;  %v552_v13 = vsel %vm551_vm6, %v550_v59, 0.0  ;;  %v817_v59 = vrot.slane %v772_v46, 3 }
 0x42f   : > { %v630_v58 = vrot.slane %v557_v51, 7 }
 0x430   : > { %v564_v56 = vpop.permute.xlu0 %563  ;;  %v559_v57 = vpop.permute.xlu1 %558 }
 0x431   : > { %v566_v60 = vsel %vm549_vm5, 0.0, %v564_v56  ;;  %v561_v63 = vsel %vm549_vm5, 0.0, %v559_v57  ;;  %v672_v21 = vsel %vm671_vm7, %v552_v13, %v630_v58  ;;  %v781_v56 = vsel %vm549_vm5, 0.0, %v2806_v38 }
 0x432   : > { %v567_v62 = vsel %vm551_vm6, %v566_v60, 0.0  ;;  %v562_v7 = vsel %vm551_vm6, %v561_v63, 0.0  ;;  %v834_v60 = vsel %vm675_vm9, %v833_v43, %v811_v29 }
 0x433   : > { %v636_v14 = vrot.slane %v567_v62, 5  ;;  %v633_v15 = vrot.slane %v562_v7, 6  ;;  %v835_v3 = vsel %vm346_vm4, %v834_v60, %v814_v47  ;;  %v782_v7 = vsel %vm551_vm6, %v781_v56, 0.0 }
 0x434   : > { %v574_v16 = vpop.permute.xlu0 %573  ;;  %v569_v17 = vpop.permute.xlu1 %568  ;;  %v904_v47 = vstv %s2884_s28  ;;  %s2370_s28 = sld [smem:[#allocation2 + $0xd]] }
 0x435   : > { %v576_v8 = vsel %vm549_vm5, 0.0, %v574_v16  ;;  %v571_v2 = vsel %vm549_vm5, 0.0, %v569_v17  ;;  %v674_v11 = vsel %vm673_vm8, %v672_v21, %v633_v15  ;;  %v880_v16 = vstv %s2851_s26  ;;  %s2368_s26 = sld [smem:[#allocation2 + $0xc]] }
 0x436   : > { %v577_v18 = vsel %vm551_vm6, %v576_v8, 0.0  ;;  %v572_v1 = vsel %vm551_vm6, %v571_v2, 0.0  ;;  %v676_v5 = vsel %vm675_vm9, %v674_v11, %v636_v14  ;;  %v865_v8 = vmul.f32 %v864_v53, %v2868_v55 }
 0x437   : > { %v639_v9 = vrot.slane %v572_v1, 4  ;;  %v642_v34 = vrot.slane %v577_v18, 3  ;;  %v836_v2 = vsel %vm678_vm10, %v835_v3, %v817_v59  ;;  %v823_v1 = vrot.slane %v782_v7, 1 }
 0x438   : > { %v584_v35 = vpop.permute.xlu0 %583  ;;  %v579_v36 = vpop.permute.xlu1 %578  ;;  %v837_v30 = vsel %vm680_vm11, %v836_v2, %v820_v4  ;;  %v920_v59 = vstv %s2899_s29  ;;  %v905_v3 = vmul.f32 %v904_v47, %v2868_v55  ;;  %s2371_s29 = sld [smem:[#allocation2 + $0x3e]] }
 0x439   : > { %v677_v40 = vsel %vm346_vm4, %v676_v5, %v639_v9  ;;  %v586_v41 = vsel %vm549_vm5, 0.0, %v584_v35  ;;  %v581_v42 = vsel %vm549_vm5, 0.0, %v579_v36 }
 0x43a   : > { %v587_v44 = vsel %vm551_vm6, %v586_v41, 0.0  ;;  %v582_v45 = vsel %vm551_vm6, %v581_v42, 0.0  ;;  %v679_v50 = vsel %vm678_vm10, %v677_v40, %v642_v34  ;;  %v900_v42 = vstv %s2874_s27  ;;  %s2369_s27 = sld [smem:[#allocation2 + $0x3d]] }
 0x43b   : > { %v648_v48 = vrot.slane %v587_v44, 1  ;;  %v645_v39 = vrot.slane %v582_v45, 2  ;;  %v885_v44 = vmul.f32 %v884_v54, %v2868_v55  ;;  %v2928_v45 = vsel %vm682_vm12, %v837_v30, %v823_v1 }
 0x43c   : > { %v595_v51 = vpop.permute.xlu0 %594  ;;  %v590_v52 = vpop.permute.xlu1 %589  ;;  %v842_v4 = vrot.slane %v2928_v45, 5  ;;  %v944_v1 = vstv %s2931_s6  ;;  %s2376_s6 = sld [smem:[#allocation2 + $0x10]] }
 0x43d   : > { %v681_v57 = vsel %vm680_vm11, %v679_v50, %v645_v39  ;;  %v597_v58 = vsel %vm549_vm5, 0.0, %v595_v51  ;;  %v592_v13 = vsel %vm549_vm5, 0.0, %v590_v52  ;;  %v945_v61 = vmul.f32 %v944_v1, %v2868_v55 }
 0x43e   : > { %v2878_v62 = vsel %vm682_vm12, %v681_v57, %v648_v48  ;;  %v598_v63 = vsel %vm551_vm6, %v597_v58, 0.0  ;;  %v593_v31 = vsel %vm551_vm6, %v592_v13, 0.0  ;;  %v924_v13 = vstv %s2909_s30  ;;  %s2374_s30 = sld [smem:[#allocation2 + $0xf]] }
 0x43f   : > { %v693_v38 = vrot.slane %v2878_v62, 5  ;;  %v651_v12 = vrot.slane %v598_v63, 7  ;;  %v3008_v45 = vsel %vm675_vm9, %v842_v4, 0.0 }
 0x440   : > { %v605_v14 = vpop.permute.xlu0 %604  ;;  %v600_v15 = vpop.permute.xlu1 %599 }
 0x441   : > { %v2892_v17 = vsel %vm675_vm9, 0.0, %v693_v38  ;;  %v607_v19 = vsel %vm549_vm5, 0.0, %v605_v14  ;;  %v602_v21 = vsel %vm549_vm5, 0.0, %v600_v15  ;;  %v684_v32 = vsel %vm671_vm7, %v593_v31, %v651_v12 }
 0x442   : > { %v608_v10 = vsel %vm551_vm6, %v607_v19, 0.0  ;;  %v603_v11 = vsel %vm551_vm6, %v602_v21, 0.0  ;;  %v861_v18 = vmul.f32 %v860_v6, %v2892_v17  ;;  %v881_v36 = vmul.f32 %v880_v16, %v2892_v17 }
 0x443   : > { %v654_v9 = vrot.slane %v603_v11, 6  ;;  %v657_v33 = vrot.slane %v608_v10, 5  ;;  %v901_v52 = vmul.f32 %v900_v42, %v2892_v17  ;;  %v921_v19 = vmul.f32 %v920_v59, %v2892_v17 }
 0x444   : > { %v615_v34 = vpop.permute.xlu0 %614  ;;  %v610_v5 = vpop.permute.xlu1 %609  ;;  %v867_v35 = vadd.f32 %v865_v8, %v861_v18  ;;  %v887_v51 = vadd.f32 %v885_v44, %v881_v36  ;;  %v940_v8 = vstv %s2919_s5  ;;  %v925_v10 = vmul.f32 %v924_v13, %v2868_v55  ;;  %s2375_s5 = sld [smem:[#allocation2 + $0x40]] }
 0x445   : > { %v685_v37 = vsel %vm673_vm8, %v684_v32, %v654_v9  ;;  %v617_v40 = vsel %vm549_vm5, 0.0, %v615_v34  ;;  %v612_v41 = vsel %vm549_vm5, 0.0, %v610_v5  ;;  %v907_v15 = vadd.f32 %v905_v3, %v901_v52 }
 0x446   : > { %v618_v29 = vsel %vm551_vm6, %v617_v40, 0.0  ;;  %v613_v43 = vsel %vm551_vm6, %v612_v41, 0.0  ;;  %871 = vrot.lane.b32.xlu1 %v867_v35, %s2584_s11  ;;  %v686_v39 = vsel %vm675_vm9, %v685_v37, %v657_v33  ;;  %v2965_v11 = vsel %vm675_vm9, %v841_v28, %v842_v4 }
 0x447   : > { %v660_v46 = vrot.slane %v613_v43, 4  ;;  %v663_v48 = vrot.slane %v618_v29, 3  ;;  %v927_v30 = vadd.f32 %v925_v10, %v921_v19  ;;  %v941_v31 = vmul.f32 %v940_v8, %v2892_v17 }
 0x448   : > { %v625_v49 = vpop.permute.xlu0 %624  ;;  %v620_v50 = vpop.permute.xlu1 %619  ;;  %v960_v32 = vstv %s2941_s7  ;;  %v866_v33 = vmul.f32 %v864_v53, %v2965_v11  ;;  %v964_v34 = vstv %s2951_s9  ;;  %v993_v36 = vstv %s2360_s10  ;;  %s2377_s7 = sld [smem:[#allocation2 + $0x41]]  ;;  %s2379_s10 = sld [smem:[#allocation2 + $0x42]] }
 0x449   : > { %v687_v56 = vsel %vm346_vm4, %v686_v39, %v660_v46  ;;  %v627_v57 = vsel %vm549_vm5, 0.0, %v625_v49  ;;  %v622_v58 = vsel %vm549_vm5, 0.0, %v620_v50  ;;  %v947_v5 = vadd.f32 %v945_v61, %v941_v31  ;;  %s2378_s9 = sld [smem:[#allocation2 + $0x11]] }
 0x44a   : > { %v628_v60 = vsel %vm551_vm6, %v627_v57, 0.0  ;;  %v623_v63 = vsel %vm551_vm6, %v622_v58, 0.0  ;;  %891 = vrot.lane.b32.xlu1 %v887_v51, %s2594_s8  ;;  %v688_v14 = vsel %vm678_vm10, %v687_v56, %v663_v48  ;;  %v886_v53 = vmul.f32 %v884_v54, %v2965_v11 }
 0x44b   : > { %v669_v7 = vrot.slane %v628_v60, 1  ;;  %v666_v12 = vrot.slane %v623_v63, 2  ;;  %v998_v37 = vstv %s2361_s13  ;;  %v994_v29 = vmul.f32 %v993_v36, %v2892_v17  ;;  %s2380_s13 = sld [smem:[#allocation2 + $0x12]] }
 0x44c   : > { %v999_v54 = vmul.f32 %v998_v37, %v2868_v55  ;;  %v906_v44 = vmul.f32 %v904_v47, %v2965_v11  ;;  %v1001_v49 = vmul.f32 %v998_v37, %v3008_v45  ;;  %v926_v50 = vmul.f32 %v924_v13, %v2965_v11 }
 0x44d   : > { %v689_v21 = vsel %vm680_vm11, %v688_v14, %v666_v12  ;;  %v1021_v47 = vstv %s2362_s18  ;;  %v1026_v58 = vstv %s2363_s19  ;;  %v1049_v60 = vstv %s2364_s20  ;;  %s2381_s18 = sld [smem:[#allocation2 + $0x43]]  ;;  %s2383_s20 = sld [smem:[#allocation2 + $0x44]] }
 0x44e   : > { %v690_v2 = vsel %vm682_vm12, %v689_v21, %v669_v7  ;;  %911 = vrot.lane.b32.xlu1 %v907_v15, %s2595_s12  ;;  %v946_v63 = vmul.f32 %v944_v1, %v2965_v11  ;;  %v1054_v3 = vstv %s2365_s22  ;;  %v1050_v12 = vmul.f32 %v1049_v60, %v2892_v17  ;;  %s2382_s19 = sld [smem:[#allocation2 + $0x13]]  ;;  %s2388_s22 = sld [smem:[#allocation2 + $0x16]] }
 0x44f   : > { %v694_v18 = vrot.slane %v690_v2, 5  ;;  %v1055_v14 = vmul.f32 %v1054_v3, %v2868_v55  ;;  %v966_v15 = vmul.f32 %v964_v34, %v2965_v11  ;;  %v1057_v10 = vmul.f32 %v1054_v3, %v3008_v45 }
 0x450   : > { %v1077_v1 = vstv %s2366_s24  ;;  %v1022_v61 = vmul.f32 %v1021_v47, %v2892_v17  ;;  %s2389_s24 = sld [smem:[#allocation2 + $0x47]] }
 0x451   : > { %v2972_v9 = vsel %vm675_vm9, %v693_v38, %v694_v18  ;;  %v961_v38 = vmul.f32 %v960_v32, %v2892_v17  ;;  %v2999_v43 = vsel %vm675_vm9, %v694_v18, 0.0  ;;  %v1058_v19 = vadd.f32 %v1055_v14, %v1050_v12 }
 0x452   : > { %931 = vrot.lane.b32.xlu1 %v927_v30, %s2596_s14  ;;  %v862_v28 = vmul.f32 %v860_v6, %v2972_v9  ;;  %v882_v35 = vmul.f32 %v880_v16, %v2972_v9  ;;  %v965_v6 = vmul.f32 %v964_v34, %v2868_v55  ;;  %v902_v16 = vmul.f32 %v900_v42, %v2972_v9 }
 0x453   : > { %v1002_v42 = vadd.f32 %v999_v54, %v994_v29  ;;  %v996_v48 = vmul.f32 %v993_v36, %v2999_v43  ;;  %v922_v39 = vmul.f32 %v920_v59, %v2972_v9  ;;  %v1023_v56 = vmul.f32 %v1021_v47, %v2972_v9 }
 0x454   : > { %v868_v62 = vadd.f32 %v866_v33, %v862_v28  ;;  %v967_v40 = vadd.f32 %v965_v6, %v961_v38  ;;  %v888_v41 = vadd.f32 %v886_v53, %v882_v35  ;;  %v908_v46 = vadd.f32 %v906_v44, %v902_v16 }
 0x455   : > { %v1004_v51 = vadd.f32 %v1001_v49, %v996_v48  ;;  %v928_v52 = vadd.f32 %v926_v50, %v922_v39  ;;  %v942_v57 = vmul.f32 %v940_v8, %v2972_v9  ;;  %v1028_v59 = vmul.f32 %v1026_v58, %v2965_v11 }
 0x456   : > { %951 = vrot.lane.b32.xlu1 %v947_v5, %s2597_s17  ;;  %873 = vrot.lane.b32.xlu0 %v868_v62, %s2584_s11  ;;  %v962_v13 = vmul.f32 %v960_v32, %v2972_v9  ;;  %v1052_v8 = vmul.f32 %v1049_v60, %v2999_v43  ;;  %v995_v2 = vmul.f32 %v993_v36, %v2972_v9  ;;  %v1082_v28 = vstv %s2367_s25  ;;  %s2416_s25 = sld [smem:[#allocation2 + $0x24]] }
 0x457   : > { %v1031_v4 = vadd.f32 %v1028_v59, %v1023_v56  ;;  %v948_v7 = vadd.f32 %v946_v63, %v942_v57  ;;  %v1000_v18 = vmul.f32 %v998_v37, %v2965_v11  ;;  %v1079_v32 = vmul.f32 %v1077_v1, %v2972_v9 }
 0x458   : > { %v968_v21 = vadd.f32 %v966_v15, %v962_v13  ;;  %v1060_v30 = vadd.f32 %v1057_v10, %v1052_v8  ;;  %v1105_v33 = vstv %s2368_s26  ;;  %v1084_v34 = vmul.f32 %v1082_v28, %v2965_v11  ;;  %s2417_s26 = sld [smem:[#allocation2 + $0x55]] }
 0x459   : > { %v1003_v31 = vadd.f32 %v1000_v18, %v995_v2  ;;  %v1027_v5 = vmul.f32 %v1026_v58, %v2868_v55  ;;  %v1110_v62 = vstv %s2369_s27  ;;  %v1106_v36 = vmul.f32 %v1105_v33, %v2892_v17  ;;  %s2390_s27 = sld [smem:[#allocation2 + $0x17]] }
 0x45a   : > { %971 = vrot.lane.b32.xlu1 %v967_v40, %s2598_s21  ;;  %893 = vrot.lane.b32.xlu0 %v888_v41, %s2594_s8  ;;  %v1087_v38 = vadd.f32 %v1084_v34, %v1079_v32  ;;  %v1024_v6 = vmul.f32 %v1021_v47, %v2999_v43  ;;  %v1111_v53 = vmul.f32 %v1110_v62, %v2868_v55  ;;  %v1138_v50 = vstv %s2371_s29  ;;  %s2418_s29 = sld [smem:[#allocation2 + $0x25]] }
 0x45b   : > { %v1030_v35 = vadd.f32 %v1027_v5, %v1022_v61  ;;  %v1029_v37 = vmul.f32 %v1026_v58, %v3008_v45  ;;  %v1108_v29 = vmul.f32 %v1105_v33, %v2999_v43  ;;  %v1051_v16 = vmul.f32 %v1049_v60, %v2972_v9 }
 0x45c   : > { %v1114_v40 = vadd.f32 %v1111_v53, %v1106_v36  ;;  %v1113_v54 = vmul.f32 %v1110_v62, %v3008_v45  ;;  %v1056_v44 = vmul.f32 %v1054_v3, %v2965_v11  ;;  %v1078_v49 = vmul.f32 %v1077_v1, %v2892_v17 }
 0x45d   : > { %v1032_v41 = vadd.f32 %v1029_v37, %v1024_v6  ;;  %v1174_v47 = vstv %s2374_s30  ;;  %v1179_v56 = vstv %s2375_s5  ;;  %v1080_v59 = vmul.f32 %v1077_v1, %v2999_v43  ;;  %s2419_s30 = sld [smem:[#allocation2 + $0x56]]  ;;  %s2430_s5 = sld [smem:[#allocation2 + $0x2b]] }
 0x45e   : > { %1008 = vrot.lane.b32.xlu1 %v1002_v42, %s2584_s11  ;;  %913 = vrot.lane.b32.xlu0 %v908_v46, %s2595_s12  ;;  %v1133_v42 = vstv %s2370_s28  ;;  %v1116_v46 = vadd.f32 %v1113_v54, %v1108_v29  ;;  %v1059_v48 = vadd.f32 %v1056_v44, %v1051_v16  ;;  %v1175_v60 = vmul.f32 %v1174_v47, %v2892_v17  ;;  %s2391_s28 = sld [smem:[#allocation2 + $0x48]] }
 0x45f   : > { %v1135_v39 = vmul.f32 %v1133_v42, %v2972_v9  ;;  %v1180_v63 = vmul.f32 %v1179_v56, %v2868_v55  ;;  %v1085_v3 = vmul.f32 %v1082_v28, %v3008_v45  ;;  %v1177_v12 = vmul.f32 %v1174_v47, %v2999_v43 }
 0x460   : > { %v1107_v13 = vmul.f32 %v1105_v33, %v2972_v9  ;;  %v1182_v14 = vmul.f32 %v1179_v56, %v3008_v45  ;;  %v1112_v15 = vmul.f32 %v1110_v62, %v2965_v11  ;;  %v1134_v10 = vmul.f32 %v1133_v42, %v2892_v17 }
 0x461   : > { %v1207_v18 = vstv %s2377_s7  ;;  %v1230_v1 = vstv %s2378_s9  ;;  %v1235_v32 = vstv %s2379_s10  ;;  %v1136_v34 = vmul.f32 %v1133_v42, %v2999_v43  ;;  %s2402_s7 = sld [smem:[#allocation2 + $0x1d]]  ;;  %s2403_s9 = sld [smem:[#allocation2 + $0x4e]] }
 0x462   : > { %1012 = vrot.lane.b32.xlu1 %v1004_v51, %s2584_s11  ;;  %933 = vrot.lane.b32.xlu0 %v928_v52, %s2596_s14  ;;  %v1140_v51 = vmul.f32 %v1138_v50, %v2965_v11  ;;  %v1083_v52 = vmul.f32 %v1082_v28, %v2868_v55  ;;  %v1115_v8 = vadd.f32 %v1112_v15, %v1107_v13  ;;  %v1263_v44 = vstv %s2381_s18  ;;  %s2392_s10 = sld [smem:[#allocation2 + $0x18]]  ;;  %s2420_s18 = sld [smem:[#allocation2 + $0x26]] }
 0x463   : > { %v1231_v33 = vmul.f32 %v1230_v1, %v2892_v17  ;;  %v1236_v5 = vmul.f32 %v1235_v32, %v2868_v55  ;;  %v1141_v62 = vmul.f32 %v1138_v50, %v3008_v45  ;;  %v1233_v36 = vmul.f32 %v1230_v1, %v2999_v43 }
 0x464   : > { %v1143_v57 = vadd.f32 %v1140_v51, %v1135_v39  ;;  %v1086_v58 = vadd.f32 %v1083_v52, %v1078_v49  ;;  %v1176_v6 = vmul.f32 %v1174_v47, %v2972_v9  ;;  %v1238_v53 = vmul.f32 %v1235_v32, %v3008_v45 }
 0x465   : > { %v1181_v37 = vmul.f32 %v1179_v56, %v2965_v11  ;;  %v1286_v42 = vstv %s2382_s19  ;;  %v1291_v39 = vstv %s2383_s20  ;;  %v1210_v56 = vmul.f32 %v1207_v18, %v3008_v45  ;;  %s2421_s19 = sld [smem:[#allocation2 + $0x57]]  ;;  %s2432_s20 = sld [smem:[#allocation2 + $0x2c]] }
 0x466   : > { %1038 = vrot.lane.b32.xlu1 %v1031_v4, %s2594_s8  ;;  %953 = vrot.lane.b32.xlu0 %v948_v7, %s2597_s17  ;;  %v1183_v4 = vadd.f32 %v1180_v63, %v1175_v60  ;;  %v1088_v7 = vadd.f32 %v1085_v3, %v1080_v59  ;;  %v1287_v47 = vmul.f32 %v1286_v42, %v2892_v17  ;;  %v1360_v15 = vstv %s2389_s24  ;;  %s2404_s24 = sld [smem:[#allocation2 + $0x1e]] }
 0x467   : > { %v1184_v29 = vadd.f32 %v1181_v37, %v1176_v6  ;;  %v1292_v52 = vmul.f32 %v1291_v39, %v2868_v55  ;;  %v1289_v60 = vmul.f32 %v1286_v42, %v2999_v43  ;;  %v1232_v59 = vmul.f32 %v1230_v1, %v2972_v9 }
 0x468   : > { %v1294_v63 = vmul.f32 %v1291_v39, %v3008_v45  ;;  %v1237_v3 = vmul.f32 %v1235_v32, %v2965_v11  ;;  %v1266_v32 = vmul.f32 %v1263_v44, %v3008_v45  ;;  %v1388_v37 = vstv %s2391_s28  ;;  %s2422_s28 = sld [smem:[#allocation2 + $0x27]] }
 0x46a   : > { %1064 = vrot.lane.b32.xlu1 %v1058_v19, %s2595_s12  ;;  %973 = vrot.lane.b32.xlu0 %v968_v21, %s2598_s21  ;;  %v1202_v19 = vstv %s2376_s6  ;;  %v1185_v21 = vadd.f32 %v1182_v14, %v1177_v12  ;;  %v1240_v12 = vadd.f32 %v1237_v3, %v1232_v59  ;;  %s2431_s6 = sld [smem:[#allocation2 + $0x5c]] }
 0x46b   : > { %v1204_v2 = vmul.f32 %v1202_v19, %v2972_v9  ;;  %v1203_v54 = vmul.f32 %v1202_v19, %v2892_v17  ;;  %v1205_v51 = vmul.f32 %v1202_v19, %v2999_v43  ;;  %v1717_v19 = vstv %s2416_s25  ;;  %s2405_s25 = sld [smem:[#allocation2 + $0x4f]] }
 0x46c   : > { %v1718_v1 = vmul.f32 %v1717_v19, %v2892_v17 }
 0x46e   : > { %1068 = vrot.lane.b32.xlu1 %v1060_v30, %s2595_s12  ;;  %1010 = vrot.lane.b32.xlu0 %v1003_v31, %s2584_s11  ;;  %v1209_v30 = vmul.f32 %v1207_v18, %v2965_v11  ;;  %v1139_v31 = vmul.f32 %v1138_v50, %v2868_v55 }
 0x470   : > { %v1212_v61 = vadd.f32 %v1209_v30, %v1204_v2  ;;  %v1142_v28 = vadd.f32 %v1139_v31, %v1134_v10  ;;  %v1722_v2 = vstv %s2417_s26  ;;  %v1903_v3 = vstv %s2431_s6  ;;  %s2394_s26 = sld [smem:[#allocation2 + $0x19]]  ;;  %s2407_s6 = sld [smem:[#allocation2 + $0x50]] }
 0x471   : > { %v1723_v31 = vmul.f32 %v1722_v2, %v2868_v55 }
 0x472   : > { %1094 = vrot.lane.b32.xlu1 %v1087_v38, %s2596_s14  ;;  %1036 = vrot.lane.b32.xlu0 %v1030_v35, %s2594_s8  ;;  %v1239_v38 = vadd.f32 %v1236_v5, %v1231_v33  ;;  %v1144_v35 = vadd.f32 %v1141_v62, %v1136_v34  ;;  %v1720_v33 = vmul.f32 %v1717_v19, %v2999_v43 }
 0x473   : > { %v1288_v34 = vmul.f32 %v1286_v42, %v2972_v9  ;;  %v1725_v5 = vmul.f32 %v1722_v2, %v3008_v45  ;;  %v1293_v62 = vmul.f32 %v1291_v39, %v2965_v11  ;;  %v1363_v39 = vmul.f32 %v1360_v15, %v3008_v45 }
 0x476   : > { %1120 = vrot.lane.b32.xlu1 %v1114_v40, %s2597_s17  ;;  %1040 = vrot.lane.b32.xlu0 %v1032_v41, %s2594_s8  ;;  %v1258_v40 = vstv %s2380_s13  ;;  %v1241_v41 = vadd.f32 %v1238_v53, %v1233_v36  ;;  %v1296_v36 = vadd.f32 %v1293_v62, %v1288_v34  ;;  %s2393_s13 = sld [smem:[#allocation2 + $0x49]] }
 0x477   : > { %v1260_v16 = vmul.f32 %v1258_v40, %v2972_v9  ;;  %v1259_v14 = vmul.f32 %v1258_v40, %v2892_v17  ;;  %v1261_v30 = vmul.f32 %v1258_v40, %v2999_v43  ;;  %v1745_v40 = vstv %s2418_s29  ;;  %s2434_s29 = sld [smem:[#allocation2 + $0x2d]] }
 0x478   : > { %v1746_v42 = vmul.f32 %v1745_v40, %v2892_v17 }
 0x47a   : > { %1124 = vrot.lane.b32.xlu1 %v1116_v46, %s2597_s17  ;;  %1066 = vrot.lane.b32.xlu0 %v1059_v48, %s2595_s12  ;;  %v1265_v46 = vmul.f32 %v1263_v44, %v2965_v11  ;;  %v1208_v48 = vmul.f32 %v1207_v18, %v2868_v55 }
 0x47c   : > { %v1268_v49 = vadd.f32 %v1265_v46, %v1260_v16  ;;  %v1211_v50 = vadd.f32 %v1208_v48, %v1203_v54  ;;  %v1750_v16 = vstv %s2419_s30  ;;  %s2435_s30 = sld [smem:[#allocation2 + $0x5e]] }
 0x47d   : > { %v1751_v48 = vmul.f32 %v1750_v16, %v2868_v55 }
 0x47e   : > { %1150 = vrot.lane.b32.xlu1 %v1143_v57, %s2598_s21  ;;  %1092 = vrot.lane.b32.xlu0 %v1086_v58, %s2596_s14  ;;  %v1295_v57 = vadd.f32 %v1292_v52, %v1287_v47  ;;  %v1213_v58 = vadd.f32 %v1210_v56, %v1205_v51  ;;  %v1748_v47 = vmul.f32 %v1745_v40, %v2999_v43 }
 0x47f   : > { %v1719_v51 = vmul.f32 %v1717_v19, %v2972_v9  ;;  %v1753_v52 = vmul.f32 %v1750_v16, %v3008_v45  ;;  %v1724_v56 = vmul.f32 %v1722_v2, %v2965_v11 }
 0x482   : > { %1189 = vrot.lane.b32.xlu1 %v1183_v4, %s2584_s11  ;;  %1096 = vrot.lane.b32.xlu0 %v1088_v7, %s2596_s14  ;;  %v1355_v4 = vstv %s2388_s22  ;;  %v1297_v7 = vadd.f32 %v1294_v63, %v1289_v60  ;;  %v1727_v60 = vadd.f32 %v1724_v56, %v1719_v51  ;;  %s2433_s22 = sld [smem:[#allocation2 + $0x5d]] }
 0x483   : > { %v1357_v13 = vmul.f32 %v1355_v4, %v2972_v9  ;;  %v1356_v53 = vmul.f32 %v1355_v4, %v2892_v17  ;;  %v1358_v46 = vmul.f32 %v1355_v4, %v2999_v43  ;;  %v1536_v4 = vstv %s2402_s7  ;;  %s2396_s7 = sld [smem:[#allocation2 + $0x1a]] }
 0x484   : > { %v1538_v51 = vmul.f32 %v1536_v4, %v2972_v9 }
 0x486   : > { %1193 = vrot.lane.b32.xlu1 %v1185_v21, %s2584_s11  ;;  %1122 = vrot.lane.b32.xlu0 %v1115_v8, %s2597_s17  ;;  %v1362_v21 = vmul.f32 %v1360_v15, %v2965_v11  ;;  %v1264_v8 = vmul.f32 %v1263_v44, %v2868_v55 }
 0x488   : > { %v1365_v10 = vadd.f32 %v1362_v21, %v1357_v13  ;;  %v1267_v18 = vadd.f32 %v1264_v8, %v1259_v14  ;;  %v1541_v13 = vstv %s2403_s9  ;;  %v1537_v21 = vmul.f32 %v1536_v4, %v2892_v17  ;;  %s2397_s9 = sld [smem:[#allocation2 + $0x4b]] }
 0x489   : > { %v1542_v2 = vmul.f32 %v1541_v13, %v2868_v55  ;;  %v1543_v56 = vmul.f32 %v1541_v13, %v2965_v11 }
 0x48a   : > { %1219 = vrot.lane.b32.xlu1 %v1212_v61, %s2594_s8  ;;  %1148 = vrot.lane.b32.xlu0 %v1142_v28, %s2598_s21  ;;  %v1726_v61 = vadd.f32 %v1723_v31, %v1718_v1  ;;  %v1269_v28 = vadd.f32 %v1266_v32, %v1261_v30  ;;  %v1539_v31 = vmul.f32 %v1536_v4, %v2999_v43  ;;  %v1931_v4 = vstv %s2433_s22  ;;  %s2372_s22 = sld [smem:[#allocation2 + $0xe]] }
 0x48b   : > { %v1545_v1 = vadd.f32 %v1542_v2, %v1537_v21  ;;  %v1747_v32 = vmul.f32 %v1745_v40, %v2972_v9  ;;  %v1778_v40 = vstv %s2421_s19  ;;  %s2408_s19 = sld [smem:[#allocation2 + $0x20]] }
 0x48e   : > { %1245 = vrot.lane.b32.xlu1 %v1239_v38, %s2595_s12  ;;  %1152 = vrot.lane.b32.xlu0 %v1144_v35, %s2598_s21  ;;  %v1383_v38 = vstv %s2390_s27  ;;  %v1728_v35 = vadd.f32 %v1725_v5, %v1720_v33  ;;  %v1411_v33 = vstv %s2392_s10  ;;  %s2395_s27 = sld [smem:[#allocation2 + $0x4a]]  ;;  %s2424_s10 = sld [smem:[#allocation2 + $0x28]] }
 0x48f   : > { %v1385_v6 = vmul.f32 %v1383_v38, %v2972_v9  ;;  %v1384_v63 = vmul.f32 %v1383_v38, %v2892_v17  ;;  %v1386_v8 = vmul.f32 %v1383_v38, %v2999_v43  ;;  %v1413_v38 = vmul.f32 %v1411_v33, %v2972_v9 }
 0x492   : > { %1249 = vrot.lane.b32.xlu1 %v1241_v41, %s2595_s12  ;;  %1191 = vrot.lane.b32.xlu0 %v1184_v29, %s2584_s11  ;;  %v1390_v41 = vmul.f32 %v1388_v37, %v2965_v11  ;;  %v1361_v29 = vmul.f32 %v1360_v15, %v2868_v55 }
 0x494   : > { %v1393_v54 = vadd.f32 %v1390_v41, %v1385_v6  ;;  %v1364_v44 = vadd.f32 %v1361_v29, %v1356_v53  ;;  %v1773_v6 = vstv %s2420_s18  ;;  %s2437_s18 = sld [smem:[#allocation2 + $0x5f]] }
 0x496   : > { %1275 = vrot.lane.b32.xlu1 %v1268_v49, %s2596_s14  ;;  %1217 = vrot.lane.b32.xlu0 %v1211_v50, %s2594_s8  ;;  %v1754_v49 = vadd.f32 %v1751_v48, %v1746_v42  ;;  %v1366_v50 = vadd.f32 %v1363_v39, %v1358_v46  ;;  %v1779_v42 = vmul.f32 %v1778_v40, %v2868_v55 }
 0x497   : > { %v1906_v46 = vmul.f32 %v1903_v3, %v3008_v45 }
 0x49a   : > { %1301 = vrot.lane.b32.xlu1 %v1295_v57, %s2597_s17  ;;  %1221 = vrot.lane.b32.xlu0 %v1213_v58, %s2594_s8  ;;  %v1898_v57 = vstv %s2430_s5  ;;  %v1756_v58 = vadd.f32 %v1753_v52, %v1748_v47  ;;  %v1776_v47 = vmul.f32 %v1773_v6, %v2999_v43  ;;  %v1781_v52 = vmul.f32 %v1778_v40, %v3008_v45  ;;  %s2406_s5 = sld [smem:[#allocation2 + $0x1f]] }
 0x49b   : > { %v1900_v59 = vmul.f32 %v1898_v57, %v2972_v9 }
 0x49e   : > { %1305 = vrot.lane.b32.xlu1 %v1297_v7, %s2597_s17  ;;  %1247 = vrot.lane.b32.xlu0 %v1240_v12, %s2595_s12  ;;  %v1905_v7 = vmul.f32 %v1903_v3, %v2965_v11  ;;  %v1389_v12 = vmul.f32 %v1388_v37, %v2868_v55 }
 0x4a0   : > { %v1908_v15 = vadd.f32 %v1905_v7, %v1900_v59  ;;  %v1392_v19 = vadd.f32 %v1389_v12, %v1384_v63  ;;  %v1784_v59 = vadd.f32 %v1781_v52, %v1776_v47  ;;  %v1546_v63 = vadd.f32 %v1543_v56, %v1538_v51 }
 0x4a1   : > { %v1412_v7 = vmul.f32 %v1411_v33, %v2892_v17  ;;  %v3198_v12 = vstv %s2404_s24  ;;  %s2373_s24 = sld [smem:[#allocation2 + $0x3f]] }
 0x4a2   : > { %1372 = vrot.lane.b32.xlu1 %v1365_v10, %s2584_s11  ;;  %1273 = vrot.lane.b32.xlu0 %v1267_v18, %s2596_s14  ;;  %v1391_v10 = vmul.f32 %v1388_v37, %v3008_v45  ;;  %v1904_v37 = vmul.f32 %v1903_v3, %v2868_v55 }
 0x4a4   : > { %v1394_v30 = vadd.f32 %v1391_v10, %v1386_v8 }
 0x4a6   : > { %1732 = vrot.lane.b32.xlu1 %v1726_v61, %s2584_s11  ;;  %1277 = vrot.lane.b32.xlu0 %v1269_v28, %s2596_s14  ;;  %v1544_v61 = vmul.f32 %v1541_v13, %v3008_v45  ;;  %v1752_v28 = vmul.f32 %v1750_v16, %v2965_v11  ;;  %v1933_v13 = vmul.f32 %v1931_v4, %v2965_v11 }
 0x4a7   : > { %v1166_v26 = vstv %s2373_s24  ;;  %s2401_s24 = sld [smem:[#allocation2 + $0x4d]] }
 0x4a8   : > { %v1547_v5 = vadd.f32 %v1544_v61, %v1539_v31  ;;  %v1755_v62 = vadd.f32 %v1752_v28, %v1747_v32  ;;  %v1167_v22 = vmul.f32 %v1166_v26, %v2868_v55 }
 0x4aa   : > { %1736 = vrot.lane.b32.xlu1 %v1728_v35, %s2584_s11  ;;  %1303 = vrot.lane.b32.xlu0 %v1296_v36, %s2597_s17  ;;  %v1899_v35 = vmul.f32 %v1898_v57, %v2892_v17  ;;  %v1416_v36 = vstv %s2393_s13  ;;  %s2436_s13 = sld [smem:[#allocation2 + $0x2e]] }
 0x4ab   : > { %v1418_v53 = vmul.f32 %v1416_v36, %v2965_v11  ;;  %v1419_v32 = vmul.f32 %v1416_v36, %v3008_v45 }
 0x4ac   : > { %v1907_v16 = vadd.f32 %v1904_v37, %v1899_v35 }
 0x4ad   : > { %v1421_v29 = vadd.f32 %v1418_v53, %v1413_v38  ;;  %v1775_v38 = vmul.f32 %v1773_v6, %v2972_v9  ;;  %v1439_v53 = vstv %s2394_s26  ;;  %s3364_s26 = sld [smem:[#allocation2 + $0x29]] }
 0x4ae   : > { %1400 = vrot.lane.b32.xlu1 %v1393_v54, %s2594_s8  ;;  %1370 = vrot.lane.b32.xlu0 %v1364_v44, %s2584_s11  ;;  %v1774_v54 = vmul.f32 %v1773_v6, %v2892_v17  ;;  %v1901_v44 = vmul.f32 %v1898_v57, %v2999_v43  ;;  %v1926_v57 = vstv %s2432_s20  ;;  %v1444_v6 = vstv %s2395_s27  ;;  %s2409_s20 = sld [smem:[#allocation2 + $0x51]]  ;;  %s3371_s27 = sld [smem:[#allocation2 + $0x5a]] }
 0x4af   : > { %v1928_v3 = vmul.f32 %v1926_v57, %v2972_v9 }
 0x4b1   : > { %v1936_v2 = vadd.f32 %v1933_v13, %v1928_v3 }
 0x4b2   : > { %1760 = vrot.lane.b32.xlu1 %v1754_v49, %s2594_s8  ;;  %1374 = vrot.lane.b32.xlu0 %v1366_v50, %s2584_s11  ;;  %v1782_v49 = vadd.f32 %v1779_v42, %v1774_v54  ;;  %v1909_v50 = vadd.f32 %v1906_v46, %v1901_v44  ;;  %v1441_v44 = vmul.f32 %v1439_v53, %v2972_v9  ;;  %v3232_v46 = vstv %s2422_s28  ;;  %s3411_s28 = sld [smem:[#allocation2 + $0x2f]] }
 0x4b3   : > { %v1927_v42 = vmul.f32 %v1926_v57, %v2892_v17 }
 0x4b6   : > { %1764 = vrot.lane.b32.xlu1 %v1756_v58, %s2594_s8  ;;  %1734 = vrot.lane.b32.xlu0 %v1727_v60, %s2584_s11 }
 0x4b8   : > { %v3150_v14 = vpop.permute.xlu1 %871 }
 0x4ba   : > { %1915 = vrot.lane.b32.xlu1 %v1908_v15, %s2584_s11  ;;  %1398 = vrot.lane.b32.xlu0 %v1392_v19, %s2594_s8  ;;  %v1417_v15 = vmul.f32 %v1416_v36, %v2868_v55  ;;  %v1569_v19 = vstv %s2405_s25  ;;  %v1780_v36 = vmul.f32 %v1778_v40, %v2965_v11  ;;  %v1446_v40 = vmul.f32 %v1444_v6, %v2965_v11  ;;  %s2398_s25 = sld [smem:[#allocation2 + $0x1b]] }
 0x4bb   : > { %v1570_v31 = vmul.f32 %v1569_v19, %v2868_v55  ;;  %v1572_v35 = vmul.f32 %v1569_v19, %v3008_v45 }
 0x4bc   : > { %v3158_v18 = vpop.permute.xlu1 %891  ;;  %v1420_v10 = vadd.f32 %v1417_v15, %v1412_v7  ;;  %v1783_v54 = vadd.f32 %v1780_v36, %v1775_v38  ;;  %v1449_v52 = vadd.f32 %v1446_v40, %v1441_v44  ;;  %v1934_v7 = vmul.f32 %v1931_v4, %v3008_v45 }
 0x4bd   : > { %3833 = vst [vmem:[#allocation13_spill] sm:$0xff] %v3158_v18  ;;  %v3267_v36 = vstv %s2406_s5  ;;  %s3434_s5 = sld [smem:[#allocation2 + $0x52]] }
 0x4be   : > { %1551 = vrot.lane.b32.xlu1 %v1545_v1, %s2584_s11  ;;  %1402 = vrot.lane.b32.xlu0 %v1394_v30, %s2594_s8  ;;  %v1565_v1 = vmul.f32 %v3198_v12, %v2892_v17  ;;  %v1414_v30 = vmul.f32 %v1411_v33, %v2999_v43  ;;  %v1567_v33 = vmul.f32 %v3198_v12, %v2999_v43 }
 0x4c0   : > { %v3166_v34 = vpop.permute.xlu1 %911 }
 0x4c1   : > { %3834 = vst [vmem:[#allocation14_spill] sm:$0xff] %v3166_v34 }
 0x4c2   : > { %1555 = vrot.lane.b32.xlu1 %v1547_v5, %s2584_s11  ;;  %1762 = vrot.lane.b32.xlu0 %v1755_v62, %s2594_s8  ;;  %v1573_v5 = vadd.f32 %v1570_v31, %v1565_v1  ;;  %v1422_v62 = vadd.f32 %v1419_v32, %v1414_v30  ;;  %v1566_v1 = vmul.f32 %v3198_v12, %v2972_v9  ;;  %v1954_v31 = vstv %s2434_s29  ;;  %s3423_s29 = sld [smem:[#allocation2 + $0x21]] }
 0x4c3   : > { %v1956_v38 = vmul.f32 %v1954_v31, %v2972_v9  ;;  %v1959_v12 = vstv %s2435_s30  ;;  %s3432_s30 = sld [smem:[#allocation2 + $0x15]] }
 0x4c4   : > { %v3174_v41 = vpop.permute.xlu1 %931 }
 0x4c5   : > { %3835 = vst [vmem:[#allocation15_spill] sm:$0xff] %v3174_v41 }
 0x4c6   : > { %1428 = vrot.lane.b32.xlu1 %v1421_v29, %s2595_s12  ;;  %1913 = vrot.lane.b32.xlu0 %v1907_v16, %s2584_s11  ;;  %v1575_v16 = vadd.f32 %v1572_v35, %v1567_v33  ;;  %v1440_v35 = vmul.f32 %v1439_v53, %v2892_v17 }
 0x4c8   : > { %v3182_v48 = vpop.permute.xlu0 %873  ;;  %v3184_v39 = vpop.permute.xlu1 %951 }
 0x4c9   : > { %3836 = vst [vmem:[#allocation16_spill] sm:$0xff] %v3182_v48  ;;  %3837 = vst [vmem:[#allocation17_spill] sm:$0xff] %v3184_v39 }
 0x4ca   : > { %1788 = vrot.lane.b32.xlu1 %v1782_v49, %s2595_s12  ;;  %1917 = vrot.lane.b32.xlu0 %v1909_v50, %s2584_s11  ;;  %v1932_v49 = vmul.f32 %v1931_v4, %v2868_v55  ;;  %v1571_v4 = vmul.f32 %v1569_v19, %v2965_v11  ;;  %v1961_v19 = vmul.f32 %v1959_v12, %v2965_v11 }
 0x4cc   : > { %v3192_v58 = vpop.permute.xlu0 %893  ;;  %v3194_v60 = vpop.permute.xlu1 %971  ;;  %v1935_v56 = vadd.f32 %v1932_v49, %v1927_v42  ;;  %v1574_v33 = vadd.f32 %v1571_v4, %v1566_v1  ;;  %v1964_v40 = vadd.f32 %v1961_v19, %v1956_v38  ;;  %v1955_v19 = vmul.f32 %v1954_v31, %v2892_v17 }
 0x4cd   : > { %3838 = vst [vmem:[#allocation18_spill] sm:$0xff] %v3192_v58  ;;  %3839 = vst [vmem:[#allocation19_spill] sm:$0xff] %v3194_v60  ;;  %v3409_v60 = vstv %s3371_s27  ;;  %s2599_s27 = smov 16  }
 0x4ce   : > { %1792 = vrot.lane.b32.xlu1 %v1784_v59, %s2595_s12  ;;  %1553 = vrot.lane.b32.xlu0 %v1546_v63, %s2584_s11  ;;  %s2423_s11 = sld [smem:[#allocation2 + $0x58]]  ;;  %v1802_v59 = vmul.f32 %v3232_v46, %v2892_v17  ;;  %v1929_v63 = vmul.f32 %v1926_v57, %v2999_v43  ;;  %v1804_v57 = vmul.f32 %v3232_v46, %v2999_v43 }
 0x4d0   : > { %v3204_v21 = vpop.permute.xlu0 %913  ;;  %v3206_v8 = vpop.permute.xlu1 %1008 }
 0x4d1   : > { %3840 = vst [vmem:[#allocation20_spill] sm:$0xff] %v3204_v21 }
 0x4d2   : > { %1943 = vrot.lane.b32.xlu1 %v1936_v2, %s2594_s8  ;;  %1426 = vrot.lane.b32.xlu0 %v1420_v10, %s2595_s12  ;;  %v1937_v10 = vadd.f32 %v1934_v7, %v1929_v63  ;;  %v1447_v63 = vmul.f32 %v1444_v6, %v3008_v45 }
 0x4d4   : > { %v3215_v61 = vpop.permute.xlu0 %933  ;;  %v3217_v28 = vpop.permute.xlu1 %1012  ;;  %v1806_v50 = vstv %s2423_s11  ;;  %s3421_s11 = sld [smem:[#allocation2 + $0x60]] }
 0x4d5   : > { %3841 = vst [vmem:[#allocation21_spill] sm:$0xff] %v3215_v61  ;;  %v1807_v3 = vmul.f32 %v1806_v50, %v2868_v55  ;;  %v1809_v30 = vmul.f32 %v1806_v50, %v3008_v45 }
 0x4d6   : > { %1579 = vrot.lane.b32.xlu1 %v1573_v5, %s2594_s8  ;;  %1430 = vrot.lane.b32.xlu0 %v1422_v62, %s2595_s12 }
 0x4d7   : > { %v1810_v2 = vadd.f32 %v1807_v3, %v1802_v59  ;;  %v1812_v62 = vadd.f32 %v1809_v30, %v1804_v57  ;;  %v1803_v57 = vmul.f32 %v3232_v46, %v2972_v9  ;;  %v1467_v30 = vstv %s2396_s7  ;;  %s3451_s7 = sld [smem:[#allocation2 + $0x23]] }
 0x4d8   : > { %v3226_v37 = vpop.permute.xlu0 %953  ;;  %v3228_v29 = vpop.permute.xlu1 %1038  ;;  %v1472_v46 = vstv %s2397_s9  ;;  %s3454_s9 = sld [smem:[#allocation2 + $0x54]] }
 0x4d9   : > { %3842 = vst [vmem:[#allocation22_spill] sm:$0xff] %v3226_v37  ;;  %v1475_v25 = vmul.f32 %v1472_v46, %v3008_v45  ;;  %v3399_v37 = vstv %s3364_s26  ;;  %s3699_s26 = sld [smem:[#allocation2 + $0x31]] }
 0x4da   : > { %1583 = vrot.lane.b32.xlu1 %v1575_v16, %s2594_s8  ;;  %1790 = vrot.lane.b32.xlu0 %v1783_v54, %s2595_s12  ;;  %v1445_v16 = vmul.f32 %v1444_v6, %v2868_v55  ;;  %v1597_v54 = vstv %s2407_s6  ;;  %v1808_v6 = vmul.f32 %v1806_v50, %v2965_v11  ;;  %v1474_v50 = vmul.f32 %v1472_v46, %v2965_v11  ;;  %s3445_s6 = sld [smem:[#allocation2 + $0x46]] }
 0x4db   : > { %v1598_v59 = vmul.f32 %v1597_v54, %v2868_v55  ;;  %v1600_v1 = vmul.f32 %v1597_v54, %v3008_v45  ;;  %v1858_v39 = vmul.f32 %v3399_v37, %v2892_v17 }
 0x4dc   : > { %v3238_v47 = vpop.permute.xlu0 %973  ;;  %v3240_v51 = vpop.permute.xlu1 %1064  ;;  %v1448_v49 = vadd.f32 %v1445_v16, %v1440_v35  ;;  %v1811_v38 = vadd.f32 %v1808_v6, %v1803_v57  ;;  %v1469_v35 = vmul.f32 %v1467_v30, %v2972_v9  ;;  %v3302_v16 = vstv %s2424_s10  ;;  %s3482_s10 = sld [smem:[#allocation2 + $0x30]] }
 0x4dd   : > { %3843 = vst [vmem:[#allocation23_spill] sm:$0xff] %v3238_v47  ;;  %v1962_v57 = vmul.f32 %v1959_v12, %v3008_v45  ;;  %v1831_v0 = vmul.f32 %v3302_v16, %v2972_v9 }
 0x4de   : > { %1456 = vrot.lane.b32.xlu1 %v1449_v52, %s2596_s14  ;;  %1941 = vrot.lane.b32.xlu0 %v1935_v56, %s2594_s8  ;;  %v1593_v52 = vmul.f32 %v3267_v36, %v2892_v17  ;;  %v1442_v56 = vmul.f32 %v1439_v53, %v2999_v43  ;;  %v1595_v53 = vmul.f32 %v3267_v36, %v2999_v43 }
 0x4e0   : > { %v3249_v13 = vpop.permute.xlu0 %1010  ;;  %v3251_v15 = vpop.permute.xlu1 %1068 }
 0x4e2   : > { %1816 = vrot.lane.b32.xlu1 %v1810_v2, %s2596_s14  ;;  %1945 = vrot.lane.b32.xlu0 %v1937_v10, %s2594_s8  ;;  %v1601_v2 = vadd.f32 %v1598_v59, %v1593_v52  ;;  %v1450_v10 = vadd.f32 %v1447_v63, %v1442_v56  ;;  %v1477_v59 = vadd.f32 %v1474_v50, %v1469_v35  ;;  %v3335_v50 = vstv %s2436_s13  ;;  %s3514_s13 = sld [smem:[#allocation2 + $0x45]] }
 0x4e3   : > { %v1594_v35 = vmul.f32 %v3267_v36, %v2972_v9  ;;  %v1984_v36 = vmul.f32 %v3335_v50, %v2972_v9 }
 0x4e4   : > { %v3261_v32 = vpop.permute.xlu0 %1036  ;;  %v3263_v5 = vpop.permute.xlu1 %1094 }
 0x4e6   : > { %1820 = vrot.lane.b32.xlu1 %v1812_v62, %s2596_s14  ;;  %1581 = vrot.lane.b32.xlu0 %v1574_v33, %s2594_s8  ;;  %s2425_s8 = sld [smem:[#allocation2 + $0x59]]  ;;  %v1603_v33 = vadd.f32 %v1600_v1, %v1595_v53 }
 0x4e8   : > { %v3273_v44 = vpop.permute.xlu0 %1040  ;;  %v3275_v42 = vpop.permute.xlu1 %1120 }
 0x4ea   : > { %1971 = vrot.lane.b32.xlu1 %v1964_v40, %s2595_s12  ;;  %1454 = vrot.lane.b32.xlu0 %v1448_v49, %s2596_s14  ;;  %v1960_v40 = vmul.f32 %v1959_v12, %v2868_v55 }
 0x4ec   : > { %v3284_v3 = vpop.permute.xlu0 %1066  ;;  %v3286_v7 = vpop.permute.xlu1 %1124  ;;  %v3308_v49 = vstv %s2425_s8  ;;  %v1963_v63 = vadd.f32 %v1960_v40, %v1955_v19  ;;  %v1599_v19 = vmul.f32 %v1597_v54, %v2965_v11  ;;  %s3484_s8 = sld [smem:[#allocation2 + $0x61]] }
 0x4ed   : > { %3844 = vst [vmem:[#allocation24_spill] sm:$0xff] %v3286_v7  ;;  %v1835_v53 = vmul.f32 %v3308_v49, %v2868_v55  ;;  %v1837_v12 = vmul.f32 %v3308_v49, %v3008_v45 }
 0x4ee   : > { %1607 = vrot.lane.b32.xlu1 %v1601_v2, %s2595_s12  ;;  %1458 = vrot.lane.b32.xlu0 %v1450_v10, %s2596_s14  ;;  %v1830_v2 = vmul.f32 %v3302_v16, %v2892_v17  ;;  %v1957_v10 = vmul.f32 %v1954_v31, %v2999_v43  ;;  %v1832_v31 = vmul.f32 %v3302_v16, %v2999_v43 }
 0x4ef   : > { %v1168_v16 = vmul.f32 %v1166_v26, %v2965_v11 }
 0x4f0   : > { %v3296_v4 = vpop.permute.xlu0 %1092  ;;  %v3298_v62 = vpop.permute.xlu1 %1150 }
 0x4f1   : > { %3845 = vst [vmem:[#allocation25_spill] sm:$0xff] %v3298_v62 }
 0x4f2   : > { %1611 = vrot.lane.b32.xlu1 %v1603_v33, %s2595_s12  ;;  %1818 = vrot.lane.b32.xlu0 %v1811_v38, %s2596_s14  ;;  %v1838_v33 = vadd.f32 %v1835_v53, %v1830_v2  ;;  %v1965_v38 = vadd.f32 %v1962_v57, %v1957_v10  ;;  %v1602_v2 = vadd.f32 %v1599_v19, %v1594_v35  ;;  %v3344_v53 = vstv %s2437_s18  ;;  %s3563_s18 = sld [smem:[#allocation2 + $0x22]] }
 0x4f3   : > { %v1468_v10 = vmul.f32 %v1467_v30, %v2892_v17  ;;  %v3346_v57 = vstv %s2408_s19  ;;  %v1989_v54 = vmul.f32 %v3344_v53, %v2965_v11  ;;  %s3573_s19 = sld [smem:[#allocation2 + $0x53]] }
 0x4f4   : > { %v3310_v52 = vpop.permute.xlu0 %1096  ;;  %v3312_v56 = vpop.permute.xlu1 %1189  ;;  %v1621_v27 = vmul.f32 %v3346_v57, %v2892_v17 }
 0x4f6   : > { %1484 = vrot.lane.b32.xlu1 %v1477_v59, %s2597_s17  ;;  %1969 = vrot.lane.b32.xlu0 %v1963_v63, %s2595_s12  ;;  %v1840_v63 = vadd.f32 %v1837_v12, %v1832_v31  ;;  %v1992_v12 = vadd.f32 %v1989_v54, %v1984_v36  ;;  %v1161_v36 = vstv %s2372_s22  ;;  %s2400_s22 = sld [smem:[#allocation2 + $0x1c]] }
 0x4f8   : > { %v3322_v1 = vpop.permute.xlu0 %1122  ;;  %v3324_v6 = vpop.permute.xlu1 %1193 }
 0x4fa   : > { %1844 = vrot.lane.b32.xlu1 %v1838_v33, %s2597_s17  ;;  %1973 = vrot.lane.b32.xlu0 %v1965_v38, %s2595_s12  ;;  %v1473_v33 = vmul.f32 %v1472_v46, %v2868_v55  ;;  %v3353_v38 = vstv %s2409_s20  ;;  %v1836_v46 = vmul.f32 %v3308_v49, %v2965_v11  ;;  %s2429_s20 = sld [smem:[#allocation2 + $0x5b]] }
 0x4fc   : > { %v3337_v40 = vpop.permute.xlu0 %1148  ;;  %v3339_v59 = vpop.permute.xlu1 %1219  ;;  %v1476_v19 = vadd.f32 %v1473_v33, %v1468_v10  ;;  %v1839_v24 = vadd.f32 %v1836_v46, %v1831_v0  ;;  %v1988_v0 = vmul.f32 %v3344_v53, %v2868_v55 }
 0x4fd   : > { %3846 = vst [vmem:[#allocation26_spill] sm:$0xff] %v3337_v40 }
 0x4fe   : > { %1848 = vrot.lane.b32.xlu1 %v1840_v63, %s2597_s17  ;;  %1609 = vrot.lane.b32.xlu0 %v1602_v2, %s2595_s12  ;;  %v1470_v63 = vmul.f32 %v1467_v30, %v2999_v43  ;;  %s3362_s12 = sld [smem:[#allocation2 + $0x4c]]  ;;  %v1626_v2 = vmul.f32 %v3353_v38, %v2868_v55 }
 0x500   : > { %v3355_v31 = vpop.permute.xlu0 %1152  ;;  %v3357_v35 = vpop.permute.xlu1 %1245  ;;  %v1629_v30 = vadd.f32 %v1626_v2, %v1621_v27  ;;  %v1478_v33 = vadd.f32 %v1475_v25, %v1470_v63  ;;  %v1628_v25 = vmul.f32 %v3353_v38, %v3008_v45  ;;  %v1162_v27 = vmul.f32 %v1161_v36, %v2892_v17 }
 0x501   : > { %3847 = vst [vmem:[#allocation27_spill] sm:$0xff] %v3355_v31  ;;  %v3388_v63 = vstv %s2398_s25  ;;  %s2359_s25 = sld [smem:[#allocation2 + $0x38]] }
 0x502   : > { %1999 = vrot.lane.b32.xlu1 %v1992_v12, %s2596_s14  ;;  %1482 = vrot.lane.b32.xlu0 %v1476_v19, %s2597_s17  ;;  %v1623_v12 = vmul.f32 %v3346_v57, %v2999_v43  ;;  %v1163_v19 = vmul.f32 %v1161_v36, %v2972_v9  ;;  %v1497_v49 = vmul.f32 %v3388_v63, %v2972_v9 }
 0x503   : > { %v1170_v46 = vadd.f32 %v1167_v22, %v1162_v27 }
 0x504   : > { %v1192_v10 = vpop.permute.xlu0 %1191  ;;  %v3373_v54 = vpop.permute.xlu1 %1249  ;;  %v1171_v23 = vadd.f32 %v1168_v16, %v1163_v19  ;;  %v3396_v47 = vstv %s3362_s12  ;;  %s3691_s12 = sld [smem:[#allocation2]] }
 0x505   : > { %v1198_v22 = vadd.f32 %v3312_v56, %v1170_v46 }
 0x506   : > { %1635 = vrot.lane.b32.xlu1 %v1629_v30, %s2596_s14  ;;  %1486 = vrot.lane.b32.xlu0 %v1478_v33, %s2597_s17  ;;  %v1631_v30 = vadd.f32 %v1628_v25, %v1623_v12  ;;  %v1983_v33 = vmul.f32 %v3335_v50, %v2892_v17  ;;  %v1502_v12 = vmul.f32 %v3396_v47, %v2965_v11 }
 0x507   : > { %v1164_v25 = vmul.f32 %v1161_v36, %v2999_v43  ;;  %v1199_v61 = vadd.f32 %v1192_v10, %v1171_v23  ;;  %v1169_v36 = vmul.f32 %v1166_v26, %v3008_v45  ;;  %v1990_v23 = vmul.f32 %v3344_v53, %v3008_v45 }
 0x508   : > { %v1218_v2 = vpop.permute.xlu0 %1217  ;;  %v1276_v20 = vpop.permute.xlu1 %1275  ;;  %v1505_v21 = vadd.f32 %v1502_v12, %v1497_v49  ;;  %v1622_v53 = vmul.f32 %v3346_v57, %v2972_v9  ;;  %v3457_v57 = vstv %s3411_s28  ;;  %s2600_s28 = smov 32  }
 0x509   : > { %v1172_v10 = vadd.f32 %v1169_v36, %v1164_v25  ;;  %v1226_v27 = vadd.f32 %v1218_v2, %v1198_v22  ;;  %v1227_v56 = vadd.f32 %v3339_v59, %v1199_v61  ;;  %v1627_v61 = vmul.f32 %v3353_v38, %v2965_v11 }
 0x50a   : > { %1846 = vrot.lane.b32.xlu0 %v1839_v24, %s2597_s17  ;;  %1639 = vrot.lane.b32.xlu1 %v1631_v30, %s2596_s14  ;;  %v1991_v24 = vadd.f32 %v1988_v0, %v1983_v33  ;;  %v1985_v30 = vmul.f32 %v3335_v50, %v2999_v43  ;;  %v1863_v50 = vmul.f32 %v3409_v60, %v2868_v55 }
 0x50b   : > { %v1860_v0 = vmul.f32 %v3399_v37, %v2999_v43  ;;  %v1200_v2 = vadd.f32 %v3324_v6, %v1172_v10  ;;  %v1254_v6 = vadd.f32 %v3357_v35, %v1226_v27  ;;  %v1496_v22 = vmul.f32 %v3388_v63, %v2892_v17 }
 0x50c   : > { %v1222_v19 = vpop.permute.xlu0 %1221  ;;  %v3413_v16 = vpop.permute.xlu1 %1301  ;;  %v1993_v49 = vadd.f32 %v1990_v23, %v1985_v30  ;;  %v1630_v30 = vadd.f32 %v1627_v61, %v1622_v53  ;;  %v2012_v36 = vmul.f32 %v3457_v57, %v2972_v9  ;;  %v3464_v23 = vstv %s3421_s11  ;;  %s2601_s11 = smov 48  }
 0x50d   : > { %v1228_v59 = vadd.f32 %v1222_v19, %v1200_v2  ;;  %v3467_v35 = vstv %s3423_s29  ;;  %v3476_v10 = vstv %s3432_s30  ;;  %s2602_s29 = smov 64   ;;  %s2603_s30 = smov 80  }
 0x50e   : > { %1997 = vrot.lane.b32.xlu0 %v1991_v24, %s2596_s14  ;;  %1512 = vrot.lane.b32.xlu1 %v1505_v21, %s2598_s21  ;;  %v1866_v21 = vadd.f32 %v1863_v50, %v1858_v39  ;;  %v1865_v39 = vmul.f32 %v3409_v60, %v3008_v45  ;;  %v2017_v50 = vmul.f32 %v3464_v23, %v2965_v11 }
 0x50f   : > { %v1256_v27 = vadd.f32 %v3373_v54, %v1228_v59  ;;  %v1649_v2 = vmul.f32 %v3467_v35, %v2892_v17  ;;  %v1344_v54 = vmul.f32 %v3476_v10, %v2972_v9  ;;  %v3501_v59 = vstv %s3451_s7 }
 0x510   : > { %v1248_v26 = vpop.permute.xlu0 %1247  ;;  %v3436_v33 = vpop.permute.xlu1 %1305  ;;  %v1868_v38 = vadd.f32 %v1865_v39, %v1860_v0  ;;  %v2020_v53 = vadd.f32 %v2017_v50, %v2012_v36  ;;  %v1498_v0 = vmul.f32 %v3388_v63, %v2999_v43  ;;  %v3498_v39 = vstv %s3445_s6  ;;  %s2605_s6 = smov 112  }
 0x511   : > { %v1255_v12 = vadd.f32 %v1248_v26, %v1227_v56  ;;  %v3480_v56 = vstv %s3434_s5  ;;  %v1503_v63 = vmul.f32 %v3396_v47, %v3008_v45  ;;  %v1705_v50 = vmul.f32 %v3501_v59, %v2892_v17  ;;  %s2604_s5 = smov 96  }
 0x512   : > { %2001 = vrot.lane.b32.xlu0 %v1993_v49, %s2596_s14  ;;  %1872 = vrot.lane.b32.xlu1 %v1866_v21, %s2598_s21 }
 0x513   : > { %v1283_v46 = vadd.f32 %v1276_v20, %v1255_v12  ;;  %v1501_v20 = vmul.f32 %v3396_v47, %v2868_v55  ;;  %v1651_v47 = vmul.f32 %v3467_v35, %v2999_v43 }
 0x514   : > { %v1274_v25 = vpop.permute.xlu0 %1273  ;;  %v1373_v24 = vpop.permute.xlu1 %1372 }
 0x515   : > { %v1282_v19 = vadd.f32 %v1274_v25, %v1254_v6  ;;  %v1504_v21 = vadd.f32 %v1501_v20, %v1496_v22  ;;  %v1654_v6 = vmul.f32 %v3480_v56, %v2868_v55  ;;  %v1349_v25 = vmul.f32 %v3498_v39, %v2965_v11 }
 0x516   : > { %1637 = vrot.lane.b32.xlu0 %v1630_v30, %s2596_s14  ;;  %1876 = vrot.lane.b32.xlu1 %v1868_v38, %s2598_s21  ;;  %s3492_s14 = sld [smem:[#allocation2 + $0x14]]  ;;  %v3512_v30 = vstv %s3454_s9  ;;  %v1506_v22 = vadd.f32 %v1503_v63, %v1498_v0 }
 0x517   : > { %v3495_v61 = vadd.f32 %v3413_v16, %v1282_v19  ;;  %v1657_v36 = vadd.f32 %v1654_v6, %v1649_v2  ;;  %v1859_v19 = vmul.f32 %v3399_v37, %v2972_v9  ;;  %v1352_v20 = vadd.f32 %v1349_v25, %v1344_v54 }
 0x518   : > { %v1278_v26 = vpop.permute.xlu0 %1277  ;;  %v1733_v49 = vpop.permute.xlu1 %1732  ;;  %v1864_v37 = vmul.f32 %v3409_v60, %v2965_v11  ;;  %v1710_v0 = vmul.f32 %v3512_v30, %v2868_v55  ;;  %v3539_v2 = vstv %s3484_s8  ;;  %v2011_v6 = vmul.f32 %v3457_v57, %v2892_v17 }
 0x519   : > { %v1284_v12 = vadd.f32 %v1278_v26, %v1256_v27 }
 0x51a   : > { %1510 = vrot.lane.b32.xlu0 %v1504_v21, %s2598_s21  ;;  %2027 = vrot.lane.b32.xlu1 %v2020_v53, %s2597_s17  ;;  %v1656_v21 = vmul.f32 %v3480_v56, %v3008_v45  ;;  %v1380_v53 = vadd.f32 %v1373_v24, %v1352_v20  ;;  %v1713_v25 = vadd.f32 %v1710_v0, %v1705_v50  ;;  %v3561_v50 = vstv %s3514_s13 }
 0x51b   : > { %v3525_v26 = vadd.f32 %v3436_v33, %v1284_v12  ;;  %v1867_v12 = vadd.f32 %v1864_v37, %v1859_v19  ;;  %v1707_v24 = vmul.f32 %v3501_v59, %v2999_v43  ;;  %v2045_v19 = vmul.f32 %v3539_v2, %v2965_v11 }
 0x51c   : > { %v1304_v16 = vpop.permute.xlu0 %1303  ;;  %v1737_v38 = vpop.permute.xlu1 %1736  ;;  %v1659_v63 = vadd.f32 %v1656_v21, %v1651_v47  ;;  %v1741_v47 = vadd.f32 %v1733_v49, %v1713_v25  ;;  %v1712_v20 = vmul.f32 %v3512_v30, %v3008_v45  ;;  %v1343_v49 = vmul.f32 %v3476_v10, %v2892_v17 }
 0x51d   : > { %v3522_v27 = vadd.f32 %v1304_v16, %v1283_v46  ;;  %v3536_v46 = vstv %s3482_s10  ;;  %s211_s10 = scalar_lea.vmem %s3815_s4, %s2446_s23 }
 0x51e   : > { %1514 = vrot.lane.b32.xlu0 %v1506_v22, %s2598_s21  ;;  %1663 = vrot.lane.b32.xlu1 %v1657_v36, %s2597_s17  ;;  %v2040_v60 = vmul.f32 %v3536_v46, %v2972_v9  ;;  %v3550_v22 = vstv %s3492_s14  ;;  %v2016_v36 = vmul.f32 %v3464_v23, %v2868_v55 }
 0x51f   : > { %3848 = vst [vmem:[#allocation28_spill] sm:$0xff] %v3522_v27 }
 0x520   : > { %v1371_v33 = vpop.permute.xlu0 %1370  ;;  %v1401_v54 = vpop.permute.xlu1 %1400  ;;  %v2048_v0 = vadd.f32 %v2045_v19, %v2040_v60 }
 0x521   : > { %v3547_v16 = vadd.f32 %v1401_v54, %v1380_v53  ;;  %v2019_v53 = vadd.f32 %v2016_v36, %v2011_v6  ;;  %v2013_v54 = vmul.f32 %v3457_v57, %v2999_v43  ;;  %v2018_v6 = vmul.f32 %v3464_v23, %v3008_v45 }
 0x522   : > { %1874 = vrot.lane.b32.xlu0 %v1867_v12, %s2598_s21  ;;  %1667 = vrot.lane.b32.xlu1 %v1659_v63, %s2597_s17  ;;  %v1315_v12 = vmul.f32 %v3550_v22, %v2892_v17  ;;  %v1715_v63 = vadd.f32 %v1712_v20, %v1707_v24  ;;  %v1320_v57 = vmul.f32 %v3561_v50, %v2868_v55 }
 0x523   : > { %v1348_v24 = vmul.f32 %v3498_v39, %v2868_v55  ;;  %v1345_v23 = vmul.f32 %v3476_v10, %v2999_v43 }
 0x524   : > { %v1375_v37 = vpop.permute.xlu0 %1374  ;;  %v1761_v21 = vpop.permute.xlu1 %1760  ;;  %v1743_v60 = vadd.f32 %v1737_v38, %v1715_v63  ;;  %v1323_v20 = vadd.f32 %v1320_v57, %v1315_v12  ;;  %v1655_v38 = vmul.f32 %v3480_v56, %v2965_v11  ;;  %v1350_v12 = vmul.f32 %v3498_v39, %v3008_v45 }
 0x525   : > { %v3571_v25 = vadd.f32 %v1761_v21, %v1741_v47  ;;  %v2021_v47 = vadd.f32 %v2018_v6, %v2013_v54  ;;  %v1650_v21 = vmul.f32 %v3467_v35, %v2972_v9  ;;  %v1322_v35 = vmul.f32 %v3561_v50, %v3008_v45 }
 0x526   : > { %2025 = vrot.lane.b32.xlu0 %v2019_v53, %s2597_s17  ;;  %2055 = vrot.lane.b32.xlu1 %v2048_v0, %s2598_s21  ;;  %v1317_v53 = vmul.f32 %v3550_v22, %v2999_v43  ;;  %v1351_v0 = vadd.f32 %v1348_v24, %v1343_v49  ;;  %v1676_v63 = vstv %s3563_s18  ;;  %v1706_v56 = vmul.f32 %v3501_v59, %v2972_v9 }
 0x527   : > { %v1658_v6 = vadd.f32 %v1655_v38, %v1650_v21  ;;  %v1678_v24 = vmul.f32 %v1676_v63, %v2972_v9  ;;  %v2044_v39 = vmul.f32 %v3539_v2, %v2868_v55 }
 0x528   : > { %v1735_v36 = vpop.permute.xlu0 %1734  ;;  %v1765_v19 = vpop.permute.xlu1 %1764  ;;  %v1379_v54 = vadd.f32 %v1371_v33, %v1351_v0  ;;  %v1325_v57 = vadd.f32 %v1322_v35, %v1317_v53  ;;  %v1681_v33 = vstv %s3573_s19  ;;  %v1711_v53 = vmul.f32 %v3512_v30, %v2965_v11 }
 0x529   : > { %v3589_v58 = vadd.f32 %v1765_v19, %v1743_v60  ;;  %v2039_v60 = vmul.f32 %v3536_v46, %v2892_v17  ;;  %v1353_v19 = vadd.f32 %v1350_v12, %v1345_v23  ;;  %v2041_v35 = vmul.f32 %v3536_v46, %v2999_v43 }
 0x52a   : > { %2029 = vrot.lane.b32.xlu0 %v2021_v47, %s2597_s17  ;;  %1329 = vrot.lane.b32.xlu1 %v1323_v20, %s2598_s21  ;;  %v1683_v20 = vmul.f32 %v1681_v33, %v2965_v11  ;;  %v1321_v46 = vmul.f32 %v3561_v50, %v2965_v11 }
 0x52b   : > { %v1381_v21 = vadd.f32 %v1375_v37, %v1353_v19  ;;  %v2047_v38 = vadd.f32 %v2044_v39, %v2039_v60  ;;  %v1316_v60 = vmul.f32 %v3550_v22, %v2972_v9  ;;  %v1682_v22 = vmul.f32 %v1681_v33, %v2868_v55 }
 0x52c   : > { %v1399_v49 = vpop.permute.xlu0 %1398  ;;  %v3600_v10 = vpop.permute.xlu1 %1915  ;;  %v1686_v59 = vadd.f32 %v1683_v20, %v1678_v24 }
 0x52d   : > { %v3607_v47 = vadd.f32 %v1399_v49, %v1379_v54  ;;  %v1714_v54 = vadd.f32 %v1711_v53, %v1706_v56  ;;  %v2046_v49 = vmul.f32 %v3539_v2, %v3008_v45  ;;  %v1324_v2 = vadd.f32 %v1321_v46, %v1316_v60 }
 0x52e   : > { %1665 = vrot.lane.b32.xlu0 %v1658_v6, %s2597_s17  ;;  %1333 = vrot.lane.b32.xlu1 %v1325_v57, %s2598_s21  ;;  %s2428_s17 = sld [smem:[#allocation2 + $0x2a]] }
 0x52f   : > { %v1742_v37 = vadd.f32 %v1735_v36, %v1714_v54  ;;  %v2049_v57 = vadd.f32 %v2046_v49, %v2041_v35  ;;  %v1677_v36 = vmul.f32 %v1676_v63, %v2892_v17  ;;  %v1890_v35 = vstv %s2429_s20 }
 0x530   : > { %v1403_v0 = vpop.permute.xlu0 %1402  ;;  %v1552_v23 = vpop.permute.xlu1 %1551  ;;  %v1523_v54 = vstv %s2400_s22  ;;  %v1892_v49 = vmul.f32 %v1890_v35, %v2965_v11  ;;  %v1891_v31 = vmul.f32 %v1890_v35, %v2868_v55 }
 0x531   : > { %v1409_v12 = vadd.f32 %v1403_v0, %v1381_v21  ;;  %v1685_v0 = vadd.f32 %v1682_v22, %v1677_v36 }
 0x532   : > { %2053 = vrot.lane.b32.xlu0 %v2047_v38, %s2598_s21  ;;  %1693 = vrot.lane.b32.xlu1 %v1686_v59, %s2598_s21  ;;  %v1679_v38 = vmul.f32 %v1676_v63, %v2999_v43 }
 0x534   : > { %v1763_v6 = vpop.permute.xlu0 %1762  ;;  %v1556_v30 = vpop.permute.xlu1 %1555  ;;  %v1885_v20 = vstv %s2428_s17 }
 0x535   : > { %v1770_v24 = vadd.f32 %v1763_v6, %v1742_v37  ;;  %v1887_v50 = vmul.f32 %v1885_v20, %v2972_v9  ;;  %v1528_v37 = vstv %s2401_s24 }
 0x536   : > { %2057 = vrot.lane.b32.xlu0 %v2049_v57, %s2598_s21 }
 0x537   : > { %v1895_v46 = vadd.f32 %v1892_v49, %v1887_v50  ;;  %v1531_v50 = vmul.f32 %v1528_v37, %v3008_v45 }
 0x538   : > { %v1914_v19 = vpop.permute.xlu0 %1913  ;;  %v1429_v56 = vpop.permute.xlu1 %1428 }
 0x539   : > { %v1436_v39 = vadd.f32 %v1429_v56, %v3547_v16  ;;  %v1684_v16 = vmul.f32 %v1681_v33, %v3008_v45  ;;  %v1524_v56 = vmul.f32 %v1523_v54, %v2892_v17 }
 0x53a   : > { %1331 = vrot.lane.b32.xlu0 %v1324_v2, %s2598_s21  ;;  %v1529_v2 = vmul.f32 %v1528_v37, %v2868_v55 }
 0x53b   : > { %v1687_v60 = vadd.f32 %v1684_v16, %v1679_v38 }
 0x53c   : > { %v1918_v21 = vpop.permute.xlu0 %1917  ;;  %v1789_v53 = vpop.permute.xlu1 %1788  ;;  %v1532_v33 = vadd.f32 %v1529_v2, %v1524_v56 }
 0x53d   : > { %v1797_v59 = vadd.f32 %v1789_v53, %v3571_v25  ;;  %v1923_v25 = vadd.f32 %v3600_v10, %v1895_v46  ;;  %v1526_v53 = vmul.f32 %v1523_v54, %v2999_v43 }
 0x53e   : > { %1691 = vrot.lane.b32.xlu0 %v1685_v0, %s2598_s21  ;;  %v1560_v38 = vadd.f32 %v1552_v23, %v1532_v33 }
 0x540   : > { %v1554_v6 = vpop.permute.xlu0 %1553  ;;  %v1793_v57 = vpop.permute.xlu1 %1792 }
 0x541   : > { %v1799_v63 = vadd.f32 %v1793_v57, %v3589_v58  ;;  %v1534_v58 = vadd.f32 %v1531_v50, %v1526_v53  ;;  %v1886_v57 = vmul.f32 %v1885_v20, %v2892_v17 }
 0x542   : > { %1695 = vrot.lane.b32.xlu0 %v1687_v60, %s2598_s21  ;;  %s2358_s21 = sld [smem:[#allocation2 + $0x7]] }
 0x543   : > { %v1562_v46 = vadd.f32 %v1556_v30, %v1534_v58  ;;  %v1894_v27 = vadd.f32 %v1891_v31, %v1886_v57 }
 0x544   : > { %v1427_v36 = vpop.permute.xlu0 %1426  ;;  %v1944_v22 = vpop.permute.xlu1 %1943 }
 0x545   : > { %v1435_v0 = vadd.f32 %v1427_v36, %v3607_v47  ;;  %v1951_v41 = vadd.f32 %v1944_v22, %v1923_v25  ;;  %v1888_v47 = vmul.f32 %v1885_v20, %v2999_v43  ;;  %v1922_v36 = vadd.f32 %v1914_v19, %v1894_v27 }
 0x546   : > { %v1893_v22 = vmul.f32 %v1890_v35, %v3008_v45 }
 0x548   : > { %v1431_v16 = vpop.permute.xlu0 %1430  ;;  %v1580_v49 = vpop.permute.xlu1 %1579  ;;  %v1896_v50 = vadd.f32 %v1893_v22, %v1888_v47  ;;  %v980_v18 = vstv %s2358_s21 }
 0x549   : > { %v1437_v60 = vadd.f32 %v1431_v16, %v1409_v12  ;;  %v3647_v10 = vadd.f32 %v1580_v49, %v1560_v38  ;;  %v1525_v12 = vmul.f32 %v1523_v54, %v2972_v9  ;;  %v1530_v49 = vmul.f32 %v1528_v37, %v2965_v11 }
 0x54a   : > { %v1924_v16 = vadd.f32 %v1918_v21, %v1896_v50 }
 0x54b   : > { %3849 = vst [vmem:[#allocation29_spill] sm:$0xff] %v3647_v10  ;;  %v1533_v57 = vadd.f32 %v1530_v49, %v1525_v12 }
 0x54c   : > { %v1791_v56 = vpop.permute.xlu0 %1790  ;;  %v1584_v2 = vpop.permute.xlu1 %1583 }
 0x54d   : > { %v1798_v25 = vadd.f32 %v1791_v56, %v1770_v24  ;;  %v3651_v23 = vadd.f32 %v1584_v2, %v1562_v46  ;;  %v1561_v46 = vadd.f32 %v1554_v6, %v1533_v57 }
 0x54f   : > { %3850 = vst [vmem:[#allocation30_spill] sm:$0xff] %v3651_v23 }
 0x550   : > { %v1942_v33 = vpop.permute.xlu0 %1941  ;;  %v1457_v53 = vpop.permute.xlu1 %1456 }
 0x551   : > { %v1950_v38 = vadd.f32 %v1942_v33, %v1922_v36  ;;  %v1464_v30 = vadd.f32 %v1457_v53, %v1436_v39 }
 0x554   : > { %v1946_v58 = vpop.permute.xlu0 %1945  ;;  %v1817_v31 = vpop.permute.xlu1 %1816 }
 0x555   : > { %v3656_v20 = vadd.f32 %v1946_v58, %v1924_v16  ;;  %v1825_v24 = vadd.f32 %v1817_v31, %v1797_v59 }
 0x558   : > { %v1582_v27 = vpop.permute.xlu0 %1581  ;;  %v1821_v19 = vpop.permute.xlu1 %1820 }
 0x559   : > { %v3658_v35 = vadd.f32 %v1582_v27, %v1561_v46  ;;  %v1827_v56 = vadd.f32 %v1821_v19, %v1799_v63 }
 0x55c   : > { %v1455_v2 = vpop.permute.xlu0 %1454  ;;  %v1972_v47 = vpop.permute.xlu1 %1971 }
 0x55d   : > { %v1463_v54 = vadd.f32 %v1455_v2, %v1435_v0  ;;  %v3660_v36 = vadd.f32 %v1972_v47, %v1951_v41 }
 0x560   : > { %v1459_v39 = vpop.permute.xlu0 %1458  ;;  %v3662_v21 = vpop.permute.xlu1 %1607 }
 0x561   : > { %3851 = vst [vmem:[#allocation31_spill] sm:$0xff] %v3662_v21  ;;  %v1465_v37 = vadd.f32 %v1459_v39, %v1437_v60 }
 0x564   : > { %v1819_v22 = vpop.permute.xlu0 %1818  ;;  %v3664_v33 = vpop.permute.xlu1 %1611 }
 0x565   : > { %3852 = vst [vmem:[#allocation32_spill] sm:$0xff] %v3664_v33  ;;  %v1826_v53 = vadd.f32 %v1819_v22, %v1798_v25 }
 0x568   : > { %v1970_v59 = vpop.permute.xlu0 %1969  ;;  %v1485_v6 = vpop.permute.xlu1 %1484 }
 0x569   : > { %v3666_v50 = vadd.f32 %v1970_v59, %v1950_v38  ;;  %v1492_v47 = vadd.f32 %v1485_v6, %v1464_v30 }
 0x56c   : > { %v3668_v12 = vpop.permute.xlu0 %1973  ;;  %v1845_v63 = vpop.permute.xlu1 %1844 }
 0x56d   : > { %v1853_v34 = vadd.f32 %v1845_v63, %v1825_v24  ;;  %v982_v24 = vmul.f32 %v980_v18, %v2972_v9 }
 0x570   : > { %v3670_v16 = vpop.permute.xlu0 %1609  ;;  %v1849_v0 = vpop.permute.xlu1 %1848 }
 0x571   : > { %v1855_v21 = vadd.f32 %v1849_v0, %v1827_v56 }
 0x574   : > { %v1483_v41 = vpop.permute.xlu0 %1482  ;;  %v3672_v49 = vpop.permute.xlu1 %1999 }
 0x575   : > { %v1491_v39 = vadd.f32 %v1483_v41, %v1463_v54 }
 0x578   : > { %v1487_v58 = vpop.permute.xlu0 %1486  ;;  %v3674_v31 = vpop.permute.xlu1 %1635 }
 0x579   : > { %3853 = vst [vmem:[#allocation33_spill] sm:$0xff] %v3674_v31  ;;  %v1493_v31 = vadd.f32 %v1487_v58, %v1465_v37 }
 0x57c   : > { %v1847_v60 = vpop.permute.xlu0 %1846  ;;  %v3676_v57 = vpop.permute.xlu1 %1639 }
 0x57d   : > { %3854 = vst [vmem:[#allocation34_spill] sm:$0xff] %v3676_v57  ;;  %v1854_v30 = vadd.f32 %v1847_v60, %v1826_v53 }
 0x580   : > { %v3678_v25 = vpop.permute.xlu0 %1997  ;;  %v1513_v46 = vpop.permute.xlu1 %1512 }
 0x581   : > { %v1520_v22 = vadd.f32 %v1513_v46, %v1492_v47 }
 0x583   : > { %v2081_v48 = vrot.slane %v1520_v22, 1 }
 0x584   : > { %v3680_v38 = vpop.permute.xlu0 %2001  ;;  %v1873_v27 = vpop.permute.xlu1 %1872 }
 0x585   : > { %v1881_v6 = vadd.f32 %v1873_v27, %v1853_v34 }
 0x587   : > { %v2094_v56 = vrot.slane %v1881_v6, 1  ;;  %v850_v6 = vstv %s3691_s12 }
 0x588   : > { %v3682_v19 = vpop.permute.xlu0 %1637  ;;  %v1877_v2 = vpop.permute.xlu1 %1876 }
 0x589   : > { %v3687_v54 = vadd.f32 %v1877_v2, %v1855_v21 }
 0x58b   : > { %v2097_v34 = vrot.slane %v3687_v54, 1 }
 0x58c   : > { %v1511_v59 = vpop.permute.xlu0 %1510  ;;  %v2028_v33 = vpop.permute.xlu1 %2027 }
 0x58d   : > { %v1519_v23 = vadd.f32 %v1511_v59, %v1491_v39 }
 0x58f   : > { %v2080_v57 = vrot.slane %v1519_v23, 1  ;;  %v985_v23 = vstv %s2359_s25 }
 0x590   : > { %v1515_v7 = vpop.permute.xlu0 %1514  ;;  %v3684_v62 = vpop.permute.xlu1 %1663  ;;  %v987_v53 = vmul.f32 %v985_v23, %v2965_v11  ;;  %v988_v39 = vmul.f32 %v985_v23, %v3008_v45  ;;  %v851_v45 = vmul.f32 %v850_v6, %v2892_v17 }
 0x591   : > { %v1521_v10 = vadd.f32 %v1515_v7, %v1493_v31  ;;  %v2082_v40 = vsel %vm682_vm12, %v2080_v57, %v2081_v48  ;;  %v981_v7 = vmul.f32 %v980_v18, %v2892_v17  ;;  %v983_v57 = vmul.f32 %v980_v18, %v2999_v43 }
 0x592   : > { %v990_v27 = vadd.f32 %v987_v53, %v982_v24  ;;  %v2007_v43 = vadd.f32 %v3672_v49, %v3660_v36 }
 0x593   : > { %v2083_v41 = vrot.slane %v1521_v10, 1  ;;  %v986_v10 = vmul.f32 %v985_v23, %v2868_v55 }
 0x594   : > { %v1875_v46 = vpop.permute.xlu0 %1874  ;;  %v3689_v47 = vpop.permute.xlu1 %1667  ;;  %v1018_v22 = vadd.f32 %v3249_v13, %v990_v27 }
 0x595   : > { %v1882_v37 = vadd.f32 %v1875_v46, %v1854_v30  ;;  %v3694_v58 = vsel %vm682_vm12, %v2081_v48, %v2083_v41  ;;  %v989_v60 = vadd.f32 %v986_v10, %v981_v7  ;;  %v1617_v7 = vadd.f32 %v3670_v16, %v3658_v35 }
 0x596   : > { %v1046_v23 = vadd.f32 %v3228_v29, %v1018_v22  ;;  %v2035_v35 = vadd.f32 %v2028_v33, %v2007_v43  ;;  %v3855_v22 = vld [vmem:[#allocation13_spill] sm:$0xff] }
 0x597   : > { %v2095_v21 = vrot.slane %v1882_v37, 1  ;;  %v1017_v2 = vadd.f32 %v3206_v8, %v989_v60  ;;  %v991_v37 = vadd.f32 %v988_v39, %v983_v57  ;;  %v854_v8 = vstv %s3699_s26 }
 0x598   : > { %v2026_v63 = vpop.permute.xlu0 %2025  ;;  %v2056_v0 = vpop.permute.xlu1 %2055  ;;  %v1074_v36 = vadd.f32 %v3284_v3, %v1046_v23  ;;  %v856_v39 = vmul.f32 %v854_v8, %v2965_v11  ;;  %v3862_v11 = vld [vmem:[#allocation16_spill] sm:$0xff] }
 0x599   : > { %v2098_v48 = vsel %vm682_vm12, %v2095_v21, %v2097_v34  ;;  %v3707_v31 = vsel %vm682_vm12, %v2094_v56, %v2095_v21  ;;  %v1045_v56 = vadd.f32 %v3261_v32, %v1017_v2  ;;  %v1019_v13 = vadd.f32 %v3217_v28, %v991_v37 }
 0x59a   : > { %v2006_v32 = vadd.f32 %v3678_v25, %v3666_v50  ;;  %v1645_v21 = vadd.f32 %v3682_v19, %v1617_v7  ;;  %v1980_v28 = vadd.f32 %v3668_v12, %v3656_v20  ;;  %v2063_v49 = vadd.f32 %v2056_v0, %v2035_v35  ;;  %v3865_v35 = vld [vmem:[#allocation27_spill] sm:$0xff] }
 0x59b   : > { %v1073_v17 = vadd.f32 %v3240_v51, %v1045_v56  ;;  %v855_v50 = vmul.f32 %v854_v8, %v2868_v55  ;;  %v852_v51 = vmul.f32 %v850_v6, %v2972_v9  ;;  %v1102_v20 = vadd.f32 %v3263_v5, %v1074_v36  ;;  %v3867_v36 = vld [vmem:[#allocation32_spill] sm:$0xff] }
 0x59c   : > { %v2030_v59 = vpop.permute.xlu0 %2029  ;;  %v1330_v30 = vpop.permute.xlu1 %1329  ;;  %v2034_v29 = vadd.f32 %v2026_v63, %v2006_v32  ;;  %v2121_v12 = vrot.slane %v2063_v49, 2 }
 0x59d   : > { %v1338_v46 = vadd.f32 %v1330_v30, %v3495_v61  ;;  %v1101_v25 = vadd.f32 %v3296_v4, %v1073_v17  ;;  %v857_v3 = vadd.f32 %v855_v50, %v851_v45  ;;  %v1130_v27 = vadd.f32 %v3322_v1, %v1102_v20  ;;  %v3856_v30 = vld [vmem:[#allocation26_spill] sm:$0xff]  ;;  %v3860_v1 = vld [vmem:[#allocation25_spill] sm:$0xff] }
 0x59e   : > { %v858_v6 = vadd.f32 %v856_v39, %v852_v51 }
 0x59f   : > { %v3720_v18 = vadd.f32 %v2082_v40, %v1338_v46  ;;  %v1047_v40 = vadd.f32 %v3273_v44, %v1019_v13  ;;  %v877_v55 = vadd.f32 %v3150_v14, %v857_v3  ;;  %v3858_v46 = vld [vmem:[#allocation31_spill] sm:$0xff]  ;;  %v1158_v7 = vadd.f32 %v3860_v1, %v1130_v27  ;;  %v3863_v13 = vld [vmem:[#allocation33_spill] sm:$0xff] }
 0x5a0   : > { %v1666_v24 = vpop.permute.xlu0 %1665  ;;  %v1334_v61 = vpop.permute.xlu1 %1333  ;;  %v878_v8 = vadd.f32 %v3862_v11, %v858_v6 }
 0x5a1   : > { %v1340_v16 = vadd.f32 %v1334_v61, %v3525_v26  ;;  %v1673_v10 = vadd.f32 %v1666_v24, %v1645_v21  ;;  %v2008_v26 = vadd.f32 %v3680_v38, %v1980_v28  ;;  %v1075_v57 = vadd.f32 %v3251_v15, %v1047_v40  ;;  %v3864_v61 = vld [vmem:[#allocation28_spill] sm:$0xff]  ;;  %v3866_v40 = vld [vmem:[#allocation30_spill] sm:$0xff] }
 0x5a2   : > { %v1129_v38 = vadd.f32 %v3275_v42, %v1101_v25  ;;  %v897_v5 = vadd.f32 %v3855_v22, %v877_v55  ;;  %v3861_v42 = vld [vmem:[#allocation24_spill] sm:$0xff]  ;;  %v1618_v17 = vadd.f32 %v3867_v36, %v3866_v40  ;;  %v3869_v25 = vld [vmem:[#allocation18_spill] sm:$0xff]  ;;  %v2108_v3 = vrot.slane %v3720_v18, 2 }
 0x5a3   : > { %v2090_v53 = vadd.f32 %v2083_v41, %v1340_v16  ;;  %v2036_v63 = vadd.f32 %v2030_v59, %v2008_v26  ;;  %v1103_v4 = vadd.f32 %v3310_v52, %v1075_v57  ;;  %v3859_v52 = vld [vmem:[#allocation14_spill] sm:$0xff] }
 0x5a4   : > { %v2054_v33 = vpop.permute.xlu0 %2053  ;;  %v1694_v19 = vpop.permute.xlu1 %1693  ;;  %v1157_v59 = vadd.f32 %v3856_v30, %v1129_v38  ;;  %v917_v56 = vadd.f32 %v3859_v52, %v897_v5  ;;  %v3870_v26 = vld [vmem:[#allocation34_spill] sm:$0xff]  ;;  %v3876_v52 = vld [vmem:[#allocation23_spill] sm:$0xff] }
 0x5a5   : > { %v2062_v44 = vadd.f32 %v2054_v33, %v2034_v29  ;;  %v1701_v60 = vadd.f32 %v1694_v19, %v1673_v10  ;;  %v1131_v43 = vadd.f32 %v3861_v42, %v1103_v4  ;;  %v3868_v10 = vld [vmem:[#allocation15_spill] sm:$0xff]  ;;  %v898_v33 = vadd.f32 %v3869_v25, %v878_v8  ;;  %v3875_v30 = vld [vmem:[#allocation22_spill] sm:$0xff] }
 0x5a6   : > { %v2068_v21 = vrot.slane %v1157_v59, 1  ;;  %v937_v50 = vadd.f32 %v3868_v10, %v917_v56  ;;  %v2069_v19 = vrot.slane %v1158_v7, 1  ;;  %v2111_v51 = vrot.slane %v2090_v53, 2  ;;  %v3874_v53 = vld [vmem:[#allocation21_spill] sm:$0xff] }
 0x5a7   : > { %v2120_v41 = vrot.slane %v2062_v44, 2  ;;  %v2103_v0 = vadd.f32 %v2098_v48, %v1701_v60  ;;  %v3857_v48 = vld [vmem:[#allocation29_spill] sm:$0xff]  ;;  %v1159_v16 = vadd.f32 %v3865_v35, %v1131_v43  ;;  %v1646_v44 = vadd.f32 %v3870_v26, %v1618_v17 }
 0x5a8   : > { %v2058_v2 = vpop.permute.xlu0 %2057  ;;  %v1616_v14 = vadd.f32 %v3858_v46, %v3857_v48 }
 0x5a9   : > { %v2064_v9 = vadd.f32 %v2058_v2, %v2036_v63  ;;  %v2122_v15 = vsel %vm680_vm11, %v2120_v41, %v2121_v12  ;;  %v3872_v41 = vld [vmem:[#allocation20_spill] sm:$0xff]  ;;  %v1674_v55 = vadd.f32 %v3689_v47, %v1646_v44  ;;  %v3873_v2 = vld [vmem:[#allocation19_spill] sm:$0xff] }
 0x5aa   : > { %v1644_v23 = vadd.f32 %v3863_v13, %v1616_v14 }
 0x5ab   : > { %v2123_v37 = vrot.slane %v2064_v9, 2 }
 0x5ac   : > { %v1332_v45 = vpop.permute.xlu0 %1331  ;;  %v1672_v29 = vadd.f32 %v3684_v62, %v1644_v23  ;;  %v2070_v62 = vsel %vm682_vm12, %v2068_v21, %v2069_v19 }
 0x5ad   : > { %v2124_v24 = vsel %vm680_vm11, %v2121_v12, %v2123_v37  ;;  %v1339_v32 = vadd.f32 %v1332_v45, %v3864_v61  ;;  %v3871_v12 = vld [vmem:[#allocation17_spill] sm:$0xff] }
 0x5ae   : > { %v2129_v28 = vadd.f32 %v2124_v24, %v2103_v0  ;;  %v957_v63 = vadd.f32 %v3871_v12, %v937_v50  ;;  %v918_v0 = vadd.f32 %v3872_v41, %v898_v33  ;;  %v2233_v12 = vlaneseq }
 0x5af   : > { %v2089_v49 = vadd.f32 %v3694_v58, %v1339_v32  ;;  %v2071_v58 = vrot.slane %v1159_v16, 1 }
 0x5b0   : > { %v1692_v60 = vpop.permute.xlu0 %1691  ;;  %v977_v18 = vadd.f32 %v3873_v2, %v957_v63  ;;  %v938_v39 = vadd.f32 %v3874_v53, %v918_v0  ;;  %v2135_v46 = vrot.slane %v2129_v28, 4  ;;  %v2234_v0 = vshrl.u32 %v2233_v12, 7 }
 0x5b1   : > { %v2109_v57 = vrot.slane %v2089_v49, 2  ;;  %v1700_v20 = vadd.f32 %v1692_v60, %v1672_v29  ;;  %v2072_v48 = vsel %vm682_vm12, %v2069_v19, %v2071_v58 }
 0x5b2   : > { %v958_v59 = vadd.f32 %v3875_v30, %v938_v39  ;;  %v2075_v6 = vadd.f32 %v2070_v62, %v977_v18  ;;  %v2235_v18 = vsub.s32 0, %v2234_v0 }
 0x5b3   : > { %v2110_v4 = vsel %vm680_vm11, %v2108_v3, %v2109_v57  ;;  %v2112_v27 = vsel %vm680_vm11, %v2109_v57, %v2111_v51  ;;  %v2102_v38 = vadd.f32 %v3707_v31, %v1700_v20 }
 0x5b4   : > { %v1696_v9 = vpop.permute.xlu0 %1695  ;;  %v978_v56 = vadd.f32 %v3876_v52, %v958_v59  ;;  %v2115_v31 = vadd.f32 %v2110_v4, %v2075_v6 }
 0x5b5   : > { %v2128_v22 = vadd.f32 %v2122_v15, %v2102_v38  ;;  %v1702_v5 = vadd.f32 %v1696_v9, %v1674_v55 }
 0x5b6   : > { %v2076_v42 = vadd.f32 %v2072_v48, %v978_v56  ;;  %v3878_v56 = vld [vmem:[#allocation6_spill] sm:$0xff] }
 0x5b7   : > { %v2134_v47 = vrot.slane %v2128_v22, 4  ;;  %v2104_v14 = vadd.f32 %v2097_v34, %v1702_v5 }
 0x5b8   : > { %v2116_v45 = vadd.f32 %v2112_v27, %v2076_v42  ;;  %v3880_v42 = vld [vmem:[#allocation5_spill] sm:$0xff] }
 0x5b9   : > { %v2136_v1 = vsel %vm346_vm4, %v2134_v47, %v2135_v46  ;;  %v2130_v7 = vadd.f32 %v2123_v37, %v2104_v14  ;;  %v3877_v14 = vld [vmem:[#allocation7_spill] sm:$0xff] }
 0x5ba   : > { %v2141_v43 = vadd.f32 %v2136_v1, %v2115_v31  ;;  %v3879_v1 = vld [vmem:[#allocation8_spill] sm:$0xff] }
 0x5bb   : > { %v2137_v15 = vrot.slane %v2130_v7, 4 }
 0x5bc   : > { %v2442_v11 = vmul.f32 -1.442695, %v2141_v43 }
 0x5bd   : > { %v2138_v8 = vsel %vm346_vm4, %v2135_v46, %v2137_v15 }
 0x5be   : > { %2545 = vpow2.f32 %v2442_v11  ;;  %v2142_v13 = vadd.f32 %v2138_v8, %v2116_v45  ;;  %v3881_v8 = vld [vmem:[#allocation10_spill] sm:$0xff] }
 0x5c0   : > { %v2443_v23 = vmul.f32 -1.442695, %v2142_v13 }
 0x5c2   : > { %2547 = vpow2.f32 %v2443_v23  ;;  %v3882_v23 = vld [vmem:[#allocation12_spill] sm:$0xff] }
 0x5c8   : > { %v2546_v24 = vpop.eup %2545 }
 0x5c9   : > { %v2149_v54 = vadd.f32 1.0, %v2546_v24 }
 0x5cb   : > { %2549 = vrcp.f32 %v2149_v54  ;;  %v3883_v54 = vld [vmem:[#allocation9_spill] sm:$0xff] }
 0x5cc   : > { %v2548_v34 = vpop.eup %2547 }
 0x5cd   : > { %v2150_v61 = vadd.f32 1.0, %v2548_v34 }
 0x5cf   : > { %2551 = vrcp.f32 %v2150_v61  ;;  %v3884_v61 = vld [vmem:[#allocation11_spill] sm:$0xff] }
 0x5d5   : > { %v2550_v32 = vpop.eup %2549 }
 0x5d6   : > { %v2156_v21 = vrot.slane %v2550_v32, 1  ;;  %v2160_v16 = vrot.slane %v2550_v32, 2  ;;  %v2164_v36 = vrot.slane %v2550_v32, 3  ;;  %v2168_v28 = vrot.slane %v2550_v32, 4 }
 0x5d7   : > { %v2172_v49 = vrot.slane %v2550_v32, 5  ;;  %v2176_v50 = vrot.slane %v2550_v32, 6  ;;  %v2180_v33 = vrot.slane %v2550_v32, 7 }
 0x5d8   : > { %2157 = vrot.lane.b32.xlu1 %v2156_v21, %s2599_s27 }
 0x5d9   : > { %v2552_v37 = vpop.eup %2551 }
 0x5da   : > { %v2185_v35 = vrot.slane %v2552_v37, 1  ;;  %v2189_v40 = vrot.slane %v2552_v37, 2  ;;  %v2193_v17 = vrot.slane %v2552_v37, 3  ;;  %v2197_v29 = vrot.slane %v2552_v37, 4 }
 0x5db   : > { %v2201_v10 = vrot.slane %v2552_v37, 5  ;;  %v2205_v25 = vrot.slane %v2552_v37, 6  ;;  %v2209_v19 = vrot.slane %v2552_v37, 7 }
 0x5dc   : > { %2186 = vrot.lane.b32.xlu0 %v2185_v35, %s2599_s27  ;;  %2161 = vrot.lane.b32.xlu1 %v2160_v16, %s2600_s28 }
 0x5e0   : > { %2190 = vrot.lane.b32.xlu0 %v2189_v40, %s2600_s28  ;;  %2165 = vrot.lane.b32.xlu1 %v2164_v36, %s2601_s11 }
 0x5e4   : > { %2194 = vrot.lane.b32.xlu0 %v2193_v17, %s2601_s11  ;;  %2169 = vrot.lane.b32.xlu1 %v2168_v28, %s2602_s29 }
 0x5e8   : > { %2198 = vrot.lane.b32.xlu0 %v2197_v29, %s2602_s29  ;;  %2173 = vrot.lane.b32.xlu1 %v2172_v49, %s2603_s30 }
 0x5ec   : > { %2202 = vrot.lane.b32.xlu0 %v2201_v10, %s2603_s30  ;;  %2177 = vrot.lane.b32.xlu1 %v2176_v50, %s2604_s5 }
 0x5f0   : > { %2206 = vrot.lane.b32.xlu0 %v2205_v25, %s2604_s5  ;;  %2181 = vrot.lane.b32.xlu1 %v2180_v33, %s2605_s6 }
 0x5f4   : > { %2210 = vrot.lane.b32.xlu0 %v2209_v19, %s2605_s6 }
 0x64a   : > { %v2158_v26 = vpop.permute.xlu1 %2157 }
 0x64b   : > { %v2214_v62 = vsel %vm2213_vm13, %v2550_v32, %v2158_v26 }
 0x64e   : > { %v2187_v44 = vpop.permute.xlu0 %2186  ;;  %v2162_v60 = vpop.permute.xlu1 %2161 }
 0x64f   : > { %v2215_v58 = vsel %vm258_vm2, %v2214_v62, %v2162_v60  ;;  %v2226_v38 = vsel %vm2213_vm13, %v2552_v37, %v2187_v44 }
 0x652   : > { %v2191_v3 = vpop.permute.xlu0 %2190  ;;  %v2166_v51 = vpop.permute.xlu1 %2165 }
 0x653   : > { %v2217_v27 = vsel %vm2216_vm14, %v2215_v58, %v2166_v51  ;;  %v2227_v53 = vsel %vm258_vm2, %v2226_v38, %v2191_v3 }
 0x656   : > { %v2195_v57 = vpop.permute.xlu0 %2194  ;;  %v2170_v20 = vpop.permute.xlu1 %2169 }
 0x657   : > { %v2219_v2 = vsel %vm2218_vm15, %v2217_v27, %v2170_v20  ;;  %v2228_v9 = vsel %vm2216_vm14, %v2227_v53, %v2195_v57 }
 0x65a   : > { %v2199_v63 = vpop.permute.xlu0 %2198  ;;  %v2174_v41 = vpop.permute.xlu1 %2173 }
 0x65b   : > { %v2221_v39 = vsel %vm2220_vm0, %v2219_v2, %v2174_v41  ;;  %v2229_v59 = vsel %vm2218_vm15, %v2228_v9, %v2199_v63 }
 0x65e   : > { %v2203_v55 = vpop.permute.xlu0 %2202  ;;  %v2178_v4 = vpop.permute.xlu1 %2177 }
 0x65f   : > { %v2223_v22 = vsel %vm2222_vm1, %v2221_v39, %v2178_v4  ;;  %v2230_v48 = vsel %vm2220_vm0, %v2229_v59, %v2203_v55 }
 0x662   : > { %v2207_v5 = vpop.permute.xlu0 %2206  ;;  %v2182_v30 = vpop.permute.xlu1 %2181 }
 0x663   : > { %v2225_v6 = vsel %vm2224_vm3, %v2223_v22, %v2182_v30  ;;  %v2231_v47 = vsel %vm2222_vm1, %v2230_v48, %v2207_v5 }
 0x664   : > { %v2236_v46 = vrot.slane %v2225_v6, %v2235_v18 }
 0x666   : > { %v2241_v52 = vmul.f32 %v2236_v46, %v3877_v14  ;;  %v2243_v31 = vmul.f32 %v2236_v46, %v3878_v56  ;;  %v2245_v7 = vmul.f32 %v2236_v46, %v3879_v1  ;;  %v2247_v43 = vmul.f32 %v2236_v46, %v3880_v42  ;;  %v2211_v15 = vpop.permute.xlu0 %2210 }
 0x667   : > { %v2232_v45 = vsel %vm2224_vm3, %v2231_v47, %v2211_v15 }
 0x668   : > { %2249 = vst [vmem:[%s211_s10] sm:$0xff] %v2241_v52  ;;  %2251 = vst [vmem:[%s211_s10 + $0x10] sm:$0xff] %v2243_v31  ;;  %v2240_v11 = vrot.slane %v2232_v45, %v2235_v18 }
 0x669   : > { %2253 = vst [vmem:[%s211_s10 + $0x20] sm:$0xff] %v2245_v7  ;;  %2255 = vst [vmem:[%s211_s10 + $0x30] sm:$0xff] %v2247_v43 }
 0x66a   : > { %v2242_v13 = vmul.f32 %v2240_v11, %v3881_v8  ;;  %v2244_v24 = vmul.f32 %v2240_v11, %v3882_v23  ;;  %v2246_v34 = vmul.f32 %v2240_v11, %v3883_v54  ;;  %v2248_v32 = vmul.f32 %v2240_v11, %v3884_v61 }
 0x66c   : > { %2250 = vst [vmem:[%s211_s10 + $0x8] sm:$0xff] %v2242_v13  ;;  %2252 = vst [vmem:[%s211_s10 + $0x18] sm:$0xff] %v2244_v24 }
 0x66d   : > { %2254 = vst [vmem:[%s211_s10 + $0x28] sm:$0xff] %v2246_v34  ;;  %2256 = vst [vmem:[%s211_s10 + $0x38] sm:$0xff] %v2248_v32 }
 0x66e PF: > { %s15_s15 = sadd.s32 1, %s2578_s15  }
 0x66f   : > { %p12_p1 = scmp.ge.s32.totalorder %s15_s15, 4  }
 0x671   :  { %14 = sbr.rel (!%p12_p1) target bundleno = 1 (0x1), region = 71 }
 0x678   :  { %2278 = vsyncpa [#allocation3], 1 }
 0x679   :  { %2280 = vsyncpa [#allocation3 + $0x1], 1 }

</bundles_post_ra>
